<compile_context>
chip_gen: v7x
topology: tpu7x:2x2x1
jax: 0.10.0
libtpu: 0.0.40
codegen_flags: <defaults>
</compile_context>

<pallas_src>
import functools

import jax
import jax.numpy as jnp
from jax import lax
from jax.experimental import pallas as pl
from jax.experimental.pallas import tpu as pltpu

LEAKY_SLOPE = 0.2
BN_EPS = 1e-5
TILE_M = 512          # max rows of the im2col matrix processed per grid step
LANE = 128
SUBLANE = 8


def _round_up(x, m):
    return (x + m - 1) // m * m


# ------------------------------ Pallas kernel --------------------------------

def _conv_kernel(a_ref, b_ref, *out_refs, act, with_stats, valid_rows,
                 padded_rows):
    """bf16 matmul (f32 acc) -> optional activation -> bf16/f32 store,
    plus optional per-channel partial sum / sum-of-squares (f32)."""
    if with_stats:
        y_ref, psum_ref, psq_ref = out_refs
    else:
        (y_ref,) = out_refs

    a = a_ref[...]                                        # (tile, Kp) bf16
    y = jnp.dot(a, b_ref[...],
                preferred_element_type=jnp.float32)       # (tile, Cp) f32

    if act == "leaky":
        y = jnp.where(y > 0, y, LEAKY_SLOPE * y)
    elif act == "sigmoid":
        y = jax.nn.sigmoid(y)

    y_ref[...] = y.astype(y_ref.dtype)

    if with_stats:
        ys = y
        if padded_rows:
            # Only emitted for layers whose M is actually padded (static flag);
            # keeps interior layers free of iota/compare/select VALU work.
            tile = ys.shape[0]
            row = (pl.program_id(0) * tile
                   + lax.broadcasted_iota(jnp.int32, (tile, 1), 0))
            ys = jnp.where(row < valid_rows, ys, 0.0)
        tile, cp = ys.shape
        yg = ys.reshape(tile // SUBLANE, SUBLANE, cp)     # sublane-grouped
        psum_ref[...] = jnp.sum(yg, axis=0)               # (8, Cp) partials
        psq_ref[...] = jnp.sum(yg * yg, axis=0)


# ------------------------------ pallas_call glue ------------------------------

def conv_matmul(patches, wmat, *, act="none", with_stats=False,
                out_dtype=jnp.bfloat16):
    """y = act(patches @ wmat) as a single Pallas launch.

    patches: (M, K) activations patch matrix (cast to bf16 here).
    wmat:    (K, Cout) weight matrix (tiny; cast to bf16 here).
    Returns (y_padded (Mp, Cp) out_dtype, (psum, psumsq) f32 partials or None).
    """
    m, k = patches.shape
    cout = wmat.shape[1]
    kp = _round_up(k, LANE)
    cp = _round_up(cout, LANE)

    # Pick the M tile: >=2 grid steps whenever M allows (v7x megacore / SW
    # pipelining), bf16-friendly sublane counts (multiples of 16) otherwise
    # full-array blocks for tiny layers.
    mp8 = _round_up(m, SUBLANE)
    if mp8 > TILE_M:
        tile = TILE_M
    elif mp8 >= 32:
        tile = _round_up(mp8 // 2, 16)
    else:
        tile = mp8
    mp = _round_up(m, tile)
    g = mp // tile

    a = jnp.pad(patches.astype(jnp.bfloat16), ((0, mp - m), (0, kp - k)))
    b = jnp.pad(wmat.astype(jnp.float32),
                ((0, kp - k), (0, cp - cout))).astype(jnp.bfloat16)

    in_specs = [pl.BlockSpec((tile, kp), lambda i: (i, 0)),
                pl.BlockSpec((kp, cp), lambda i: (0, 0))]

    out_shapes = [jax.ShapeDtypeStruct((mp, cp), out_dtype)]
    out_specs = [pl.BlockSpec((tile, cp), lambda i: (i, 0))]
    if with_stats:
        out_shapes += [jax.ShapeDtypeStruct((g * SUBLANE, cp), jnp.float32),
                       jax.ShapeDtypeStruct((g * SUBLANE, cp), jnp.float32)]
        out_specs += [pl.BlockSpec((SUBLANE, cp), lambda i: (i, 0)),
                      pl.BlockSpec((SUBLANE, cp), lambda i: (i, 0))]

    kernel = functools.partial(
        _conv_kernel, act=act, with_stats=with_stats,
        valid_rows=m, padded_rows=(mp > m))

    outs = pl.pallas_call(
        kernel,
        out_shape=tuple(out_shapes),
        grid=(g,),
        in_specs=in_specs,
        out_specs=tuple(out_specs),
        compiler_params=pltpu.CompilerParams(
            dimension_semantics=("parallel",),
            vmem_limit_bytes=64 * 1024 * 1024),
    )(a, b)

    y = outs[0]
    if with_stats:
        return y, (outs[1], outs[2])
    return y, None


# ------------------------------- host-side glue -------------------------------

def _im2col(x, kh, kw, stride, pad):
    """(n,h,w,c) -> (n*oh*ow, kh*kw*c) patches, (kh,kw,c)-major columns.

    No minor-dim transpose of the 16x-amplified patch tensor; the tiny weight
    matrix is reordered to match instead."""
    n, h, w, c = x.shape
    xp = jnp.pad(x, ((0, 0), (pad, pad), (pad, pad), (0, 0)))
    oh = (h + 2 * pad - kh) // stride + 1
    ow = (w + 2 * pad - kw) // stride + 1
    cols = []
    for i in range(kh):
        for j in range(kw):
            cols.append(xp[:, i:i + stride * (oh - 1) + 1:stride,
                              j:j + stride * (ow - 1) + 1:stride, :])
    patches = jnp.stack(cols, axis=3)                      # (n, oh, ow, kh*kw, c)
    return patches.reshape(n * oh * ow, kh * kw * c), (oh, ow)


def _wmat(w):
    # PyTorch OIHW -> (kh*kw*cin, cout); row order matches _im2col's
    # (kh, kw, c)-major patch columns.
    return jnp.transpose(w, (2, 3, 1, 0)).reshape(-1, w.shape[0])


def _bn_scale_shift(psum, psumsq, m, gamma, beta):
    c = gamma.shape[0]
    s = jnp.sum(psum, axis=0)[:c]
    sq = jnp.sum(psumsq, axis=0)[:c]
    mean = s / m
    # biased (training-mode) variance; clamp guards fp cancellation -> no NaN
    var = jnp.maximum(sq / m - mean * mean, 0.0)
    inv = gamma * lax.rsqrt(var + BN_EPS)
    return inv, beta - mean * inv                          # scale, shift


def _bn_lrelu(y, scale, shift):
    # BN affine + LeakyReLU on the small activation tensor, BEFORE spatial
    # padding / im2col (correct conv zero-padding semantics).  f32 math,
    # bf16 result so the next layer's patch matrix streams as bf16.
    z = y.astype(jnp.float32) * scale + shift
    z = jnp.where(z > 0, z, LEAKY_SLOPE * z)
    return z.astype(jnp.bfloat16)


def discriminator_forward(x_nchw, p):
    x = jnp.transpose(x_nchw, (0, 2, 3, 1)).astype(jnp.bfloat16)   # NCHW -> NHWC
    n = x.shape[0]

    # layer 1: conv1 + LeakyReLU (fused epilogue)
    a, (oh, ow) = _im2col(x, 4, 4, 2, 1)
    c1 = p["w1"].shape[0]
    y1, _ = conv_matmul(a, _wmat(p["w1"]), act="leaky")
    x1 = y1[: n * oh * ow, :c1].reshape(n, oh, ow, c1)

    # layer 2: raw conv2 + fused batch statistics
    a, (oh, ow) = _im2col(x1, 4, 4, 2, 1)
    c2 = p["w2"].shape[0]
    m2 = n * oh * ow
    y2, (ps, pq) = conv_matmul(a, _wmat(p["w2"]), with_stats=True)
    sc2, sh2 = _bn_scale_shift(ps, pq, m2, p["g1"], p["b1"])
    x2 = _bn_lrelu(y2[:m2, :c2].reshape(n, oh, ow, c2), sc2, sh2)

    # layer 3: conv3 + stats (input already BN1 + LeakyReLU normalized)
    a, (oh, ow) = _im2col(x2, 4, 4, 2, 1)
    c3 = p["w3"].shape[0]
    m3 = n * oh * ow
    y3, (ps, pq) = conv_matmul(a, _wmat(p["w3"]), with_stats=True)
    sc3, sh3 = _bn_scale_shift(ps, pq, m3, p["g2"], p["b2"])
    x3 = _bn_lrelu(y3[:m3, :c3].reshape(n, oh, ow, c3), sc3, sh3)

    # layer 4: conv4 + stats
    a, (oh, ow) = _im2col(x3, 4, 4, 2, 1)
    c4 = p["w4"].shape[0]
    m4 = n * oh * ow
    y4, (ps, pq) = conv_matmul(a, _wmat(p["w4"]), with_stats=True)
    sc4, sh4 = _bn_scale_shift(ps, pq, m4, p["g3"], p["b3"])
    x4 = _bn_lrelu(y4[:m4, :c4].reshape(n, oh, ow, c4), sc4, sh4)

    # layer 5: conv5 + sigmoid (fused epilogue), f32 output (tiny)
    a, (oh, ow) = _im2col(x4, 4, 4, 1, 0)
    y5, _ = conv_matmul(a, _wmat(p["w5"]), act="sigmoid",
                        out_dtype=jnp.float32)
    out = y5[: n * oh * ow, :1].reshape(n, oh, ow, 1)
    out = jnp.transpose(out, (0, 3, 1, 2))        # NHWC -> NCHW, (N,1,1,1)
    return jnp.squeeze(out)                       # torch.squeeze semantics


# ----------------------------- reference (plain JAX) --------------------------

def reference_forward(x, p):
    def conv(x, w, stride, pad):
        return lax.conv_general_dilated(
            x, w, (stride, stride), [(pad, pad), (pad, pad)],
            dimension_numbers=("NCHW", "OIHW", "NCHW"))

    def bn(x, g, b):
        mean = jnp.mean(x, axis=(0, 2, 3), keepdims=True)
        var = jnp.var(x, axis=(0, 2, 3), keepdims=True)
        return ((x - mean) * lax.rsqrt(var + BN_EPS) * g.reshape(1, -1, 1, 1)
                + b.reshape(1, -1, 1, 1))

    def lrelu(x):
        return jnp.where(x > 0, x, LEAKY_SLOPE * x)

    x = lrelu(conv(x, p["w1"], 2, 1))
    x = lrelu(bn(conv(x, p["w2"], 2, 1), p["g1"], p["b1"]))
    x = lrelu(bn(conv(x, p["w3"], 2, 1), p["g2"], p["b2"]))
    x = lrelu(bn(conv(x, p["w4"], 2, 1), p["g3"], p["b3"]))
    x = jax.nn.sigmoid(conv(x, p["w5"], 1, 0))
    return jnp.squeeze(x)


# ------------------------------------ main ------------------------------------

if __name__ == "__main__":
    NC, NDF, N, HW = 3, 8, 2, 64   # conv5 (4x4, stride 1, no pad) needs 64x64 input

    key = jax.random.PRNGKey(0)
    kx, kw1, kw2, kw3, kw4, kw5, kg = jax.random.split(key, 7)

    x = jax.random.normal(kx, (N, NC, HW, HW), dtype=jnp.float32)

    def winit(k, shape):
        return 0.02 * jax.random.normal(k, shape, dtype=jnp.float32)

    kg1, kg2, kg3, kb1, kb2, kb3 = jax.random.split(kg, 6)
    params = {
        "w1": winit(kw1, (NDF, NC, 4, 4)),
        "w2": winit(kw2, (NDF * 2, NDF, 4, 4)),
        "w3": winit(kw3, (NDF * 4, NDF * 2, 4, 4)),
        "w4": winit(kw4, (NDF * 8, NDF * 4, 4, 4)),
        "w5": winit(kw5, (1, NDF * 8, 4, 4)),
        "g1": 1.0 + 0.1 * jax.random.normal(kg1, (NDF * 2,), dtype=jnp.float32),
        "g2": 1.0 + 0.1 * jax.random.normal(kg2, (NDF * 4,), dtype=jnp.float32),
        "g3": 1.0 + 0.1 * jax.random.normal(kg3, (NDF * 8,), dtype=jnp.float32),
        "b1": 0.1 * jax.random.normal(kb1, (NDF * 2,), dtype=jnp.float32),
        "b2": 0.1 * jax.random.normal(kb2, (NDF * 4,), dtype=jnp.float32),
        "b3": 0.1 * jax.random.normal(kb3, (NDF * 8,), dtype=jnp.float32),
    }

    out = jax.jit(discriminator_forward)(x, params)
    out = jax.block_until_ready(out).astype(jnp.float32)

    ref = jax.block_until_ready(reference_forward(x, params))
    assert out.shape == ref.shape == (N,), (out.shape, ref.shape)
    assert bool(jnp.all(jnp.isfinite(out))), out
    # bf16 activations / MXU inputs (f32 accumulation) -> relaxed tolerance
    assert jnp.allclose(out, ref, atol=2e-2, rtol=2e-2), (out, ref)

    print("KERNEL_OK")
</pallas_src>

<mosaic_0001>
module attributes {stable_mosaic.version = 11 : i64} {
  func.func @_conv_kernel(%arg0: i32, %arg1: memref<512x128xbf16, #tpu.memory_space<vmem>>, %arg2: memref<128x128xbf16, #tpu.memory_space<vmem>>, %arg3: memref<512x128xbf16, #tpu.memory_space<vmem>>) attributes {dimension_semantics = [#tpu.dimension_semantics<parallel>], iteration_bounds = array<i64: 4>, scalar_prefetch = 0 : i64, scratch_operands = 0 : i64, tpu.core_type = #tpu.core_type<tc>, window_params = [{transform_indices = @transform_0, window_bounds = array<i64: 512, 128>}, {pipeline_mode = #tpu.pipeline_mode<synchronous>, transform_indices = @transform_1, window_bounds = array<i64: 128, 128>}, {transform_indices = @transform_2, window_bounds = array<i64: 512, 128>}]} {
    %c0 = arith.constant 0 : index
    %c0_0 = arith.constant 0 : index
    %0 = vector.load %arg1[%c0, %c0_0] : memref<512x128xbf16, #tpu.memory_space<vmem>>, vector<512x128xbf16>
    %c0_1 = arith.constant 0 : index
    %c0_2 = arith.constant 0 : index
    %1 = vector.load %arg2[%c0_1, %c0_2] : memref<128x128xbf16, #tpu.memory_space<vmem>>, vector<128x128xbf16>
    %cst = arith.constant dense<0.000000e+00> : vector<512x128xf32>
    %2 = tpu.matmul %0, %1, %cst {dimension_numbers = #tpu.dot_dimension_numbers<[1], [0], [0], [1], [0, 0, 1, 1], [], []>} : vector<512x128xbf16>, vector<128x128xbf16>, vector<512x128xf32> -> vector<512x128xf32>
    %cst_3 = arith.constant 0.000000e+00 : f32
    %3 = vector.broadcast %cst_3 : f32 to vector<512x128xf32>
    %4 = arith.cmpf ogt, %2, %3 : vector<512x128xf32>
    %cst_4 = arith.constant 2.000000e-01 : f32
    %5 = vector.broadcast %cst_4 : f32 to vector<512x128xf32>
    %6 = arith.mulf %5, %2 : vector<512x128xf32>
    %7 = arith.select %4, %2, %6 : vector<512x128xi1>, vector<512x128xf32>
    %8 = arith.truncf %7 : vector<512x128xf32> to vector<512x128xbf16>
    %c0_5 = arith.constant 0 : index
    %c0_6 = arith.constant 0 : index
    %9 = vector.load %arg3[%c0_5, %c0_6] : memref<512x128xbf16, #tpu.memory_space<vmem>>, vector<512x128xbf16>
    tpu.vector_store %arg3[%c0_5, %c0_6], %8 {strides = array<i32>} : memref<512x128xbf16, #tpu.memory_space<vmem>>, vector<512x128xbf16>,
    return
  }
  func.func @transform_0(%arg0: i32) -> (i32, i32) {
    %c0_i32 = arith.constant 0 : i32
    %c0_i32_0 = arith.constant 0 : i32
    return %arg0, %c0_i32 : i32, i32
  }
  func.func @transform_1(%arg0: i32) -> (i32, i32) {
    %c0_i32 = arith.constant 0 : i32
    %c0_i32_0 = arith.constant 0 : i32
    %c0_i32_1 = arith.constant 0 : i32
    return %c0_i32, %c0_i32_0 : i32, i32
  }
  func.func @transform_2(%arg0: i32) -> (i32, i32) {
    %c0_i32 = arith.constant 0 : i32
    %c0_i32_0 = arith.constant 0 : i32
    return %arg0, %c0_i32 : i32, i32
  }
}

module attributes {stable_mosaic.version = 11 : i64} {
  func.func @_conv_kernel(%arg0: i32, %arg1: memref<256x128xbf16, #tpu.memory_space<vmem>>, %arg2: memref<128x128xbf16, #tpu.memory_space<vmem>>, %arg3: memref<256x128xbf16, #tpu.memory_space<vmem>>, %arg4: memref<8x128xf32, #tpu.memory_space<vmem>>, %arg5: memref<8x128xf32, #tpu.memory_space<vmem>>) attributes {dimension_semantics = [#tpu.dimension_semantics<parallel>], iteration_bounds = array<i64: 2>, scalar_prefetch = 0 : i64, scratch_operands = 0 : i64, tpu.core_type = #tpu.core_type<tc>, window_params = [{transform_indices = @transform_0, window_bounds = array<i64: 256, 128>}, {pipeline_mode = #tpu.pipeline_mode<synchronous>, transform_indices = @transform_1, window_bounds = array<i64: 128, 128>}, {transform_indices = @transform_2, window_bounds = array<i64: 256, 128>}, {transform_indices = @transform_3, window_bounds = array<i64: 8, 128>}, {transform_indices = @transform_4, window_bounds = array<i64: 8, 128>}]} {
    %c0 = arith.constant 0 : index
    %c0_0 = arith.constant 0 : index
    %0 = vector.load %arg1[%c0, %c0_0] : memref<256x128xbf16, #tpu.memory_space<vmem>>, vector<256x128xbf16>
    %c0_1 = arith.constant 0 : index
    %c0_2 = arith.constant 0 : index
    %1 = vector.load %arg2[%c0_1, %c0_2] : memref<128x128xbf16, #tpu.memory_space<vmem>>, vector<128x128xbf16>
    %cst = arith.constant dense<0.000000e+00> : vector<256x128xf32>
    %2 = tpu.matmul %0, %1, %cst {dimension_numbers = #tpu.dot_dimension_numbers<[1], [0], [0], [1], [0, 0, 1, 1], [], []>} : vector<256x128xbf16>, vector<128x128xbf16>, vector<256x128xf32> -> vector<256x128xf32>
    %3 = arith.truncf %2 : vector<256x128xf32> to vector<256x128xbf16>
    %c0_3 = arith.constant 0 : index
    %c0_4 = arith.constant 0 : index
    %4 = vector.load %arg3[%c0_3, %c0_4] : memref<256x128xbf16, #tpu.memory_space<vmem>>, vector<256x128xbf16>
    tpu.vector_store %arg3[%c0_3, %c0_4], %3 {strides = array<i32>} : memref<256x128xbf16, #tpu.memory_space<vmem>>, vector<256x128xbf16>,
    %5 = vector.shape_cast %2 : vector<256x128xf32> to vector<32x8x128xf32>
    %cst_5 = arith.constant dense<0.000000e+00> : vector<8x128xf32>
    %6 = vector.multi_reduction <add>, %5, %cst_5 [0] : vector<32x8x128xf32> to vector<8x128xf32>
    %c0_6 = arith.constant 0 : index
    %c0_7 = arith.constant 0 : index
    %7 = vector.load %arg4[%c0_6, %c0_7] : memref<8x128xf32, #tpu.memory_space<vmem>>, vector<8x128xf32>
    tpu.vector_store %arg4[%c0_6, %c0_7], %6 {strides = array<i32>} : memref<8x128xf32, #tpu.memory_space<vmem>>, vector<8x128xf32>,
    %8 = arith.mulf %5, %5 : vector<32x8x128xf32>
    %cst_8 = arith.constant dense<0.000000e+00> : vector<8x128xf32>
    %9 = vector.multi_reduction <add>, %8, %cst_8 [0] : vector<32x8x128xf32> to vector<8x128xf32>
    %c0_9 = arith.constant 0 : index
    %c0_10 = arith.constant 0 : index
    %10 = vector.load %arg5[%c0_9, %c0_10] : memref<8x128xf32, #tpu.memory_space<vmem>>, vector<8x128xf32>
    tpu.vector_store %arg5[%c0_9, %c0_10], %9 {strides = array<i32>} : memref<8x128xf32, #tpu.memory_space<vmem>>, vector<8x128xf32>,
    return
  }
  func.func @transform_0(%arg0: i32) -> (i32, i32) {
    %c0_i32 = arith.constant 0 : i32
    %c0_i32_0 = arith.constant 0 : i32
    return %arg0, %c0_i32 : i32, i32
  }
  func.func @transform_1(%arg0: i32) -> (i32, i32) {
    %c0_i32 = arith.constant 0 : i32
    %c0_i32_0 = arith.constant 0 : i32
    %c0_i32_1 = arith.constant 0 : i32
    return %c0_i32, %c0_i32_0 : i32, i32
  }
  func.func @transform_2(%arg0: i32) -> (i32, i32) {
    %c0_i32 = arith.constant 0 : i32
    %c0_i32_0 = arith.constant 0 : i32
    return %arg0, %c0_i32 : i32, i32
  }
  func.func @transform_3(%arg0: i32) -> (i32, i32) {
    %c0_i32 = arith.constant 0 : i32
    %c0_i32_0 = arith.constant 0 : i32
    return %arg0, %c0_i32 : i32, i32
  }
  func.func @transform_4(%arg0: i32) -> (i32, i32) {
    %c0_i32 = arith.constant 0 : i32
    %c0_i32_0 = arith.constant 0 : i32
    return %arg0, %c0_i32 : i32, i32
  }
}

module attributes {stable_mosaic.version = 11 : i64} {
  func.func @_conv_kernel(%arg0: i32, %arg1: memref<64x256xbf16, #tpu.memory_space<vmem>>, %arg2: memref<256x128xbf16, #tpu.memory_space<vmem>>, %arg3: memref<64x128xbf16, #tpu.memory_space<vmem>>, %arg4: memref<8x128xf32, #tpu.memory_space<vmem>>, %arg5: memref<8x128xf32, #tpu.memory_space<vmem>>) attributes {dimension_semantics = [#tpu.dimension_semantics<parallel>], iteration_bounds = array<i64: 2>, scalar_prefetch = 0 : i64, scratch_operands = 0 : i64, tpu.core_type = #tpu.core_type<tc>, window_params = [{transform_indices = @transform_0, window_bounds = array<i64: 64, 256>}, {pipeline_mode = #tpu.pipeline_mode<synchronous>, transform_indices = @transform_1, window_bounds = array<i64: 256, 128>}, {transform_indices = @transform_2, window_bounds = array<i64: 64, 128>}, {transform_indices = @transform_3, window_bounds = array<i64: 8, 128>}, {transform_indices = @transform_4, window_bounds = array<i64: 8, 128>}]} {
    %c0 = arith.constant 0 : index
    %c0_0 = arith.constant 0 : index
    %0 = vector.load %arg1[%c0, %c0_0] : memref<64x256xbf16, #tpu.memory_space<vmem>>, vector<64x256xbf16>
    %c0_1 = arith.constant 0 : index
    %c0_2 = arith.constant 0 : index
    %1 = vector.load %arg2[%c0_1, %c0_2] : memref<256x128xbf16, #tpu.memory_space<vmem>>, vector<256x128xbf16>
    %cst = arith.constant dense<0.000000e+00> : vector<64x128xf32>
    %2 = tpu.matmul %0, %1, %cst {dimension_numbers = #tpu.dot_dimension_numbers<[1], [0], [0], [1], [0, 0, 1, 1], [], []>} : vector<64x256xbf16>, vector<256x128xbf16>, vector<64x128xf32> -> vector<64x128xf32>
    %3 = arith.truncf %2 : vector<64x128xf32> to vector<64x128xbf16>
    %c0_3 = arith.constant 0 : index
    %c0_4 = arith.constant 0 : index
    %4 = vector.load %arg3[%c0_3, %c0_4] : memref<64x128xbf16, #tpu.memory_space<vmem>>, vector<64x128xbf16>
    tpu.vector_store %arg3[%c0_3, %c0_4], %3 {strides = array<i32>} : memref<64x128xbf16, #tpu.memory_space<vmem>>, vector<64x128xbf16>,
    %5 = vector.shape_cast %2 : vector<64x128xf32> to vector<8x8x128xf32>
    %cst_5 = arith.constant dense<0.000000e+00> : vector<8x128xf32>
    %6 = vector.multi_reduction <add>, %5, %cst_5 [0] : vector<8x8x128xf32> to vector<8x128xf32>
    %c0_6 = arith.constant 0 : index
    %c0_7 = arith.constant 0 : index
    %7 = vector.load %arg4[%c0_6, %c0_7] : memref<8x128xf32, #tpu.memory_space<vmem>>, vector<8x128xf32>
    tpu.vector_store %arg4[%c0_6, %c0_7], %6 {strides = array<i32>} : memref<8x128xf32, #tpu.memory_space<vmem>>, vector<8x128xf32>,
    %8 = arith.mulf %5, %5 : vector<8x8x128xf32>
    %cst_8 = arith.constant dense<0.000000e+00> : vector<8x128xf32>
    %9 = vector.multi_reduction <add>, %8, %cst_8 [0] : vector<8x8x128xf32> to vector<8x128xf32>
    %c0_9 = arith.constant 0 : index
    %c0_10 = arith.constant 0 : index
    %10 = vector.load %arg5[%c0_9, %c0_10] : memref<8x128xf32, #tpu.memory_space<vmem>>, vector<8x128xf32>
    tpu.vector_store %arg5[%c0_9, %c0_10], %9 {strides = array<i32>} : memref<8x128xf32, #tpu.memory_space<vmem>>, vector<8x128xf32>,
    return
  }
  func.func @transform_0(%arg0: i32) -> (i32, i32) {
    %c0_i32 = arith.constant 0 : i32
    %c0_i32_0 = arith.constant 0 : i32
    return %arg0, %c0_i32 : i32, i32
  }
  func.func @transform_1(%arg0: i32) -> (i32, i32) {
    %c0_i32 = arith.constant 0 : i32
    %c0_i32_0 = arith.constant 0 : i32
    %c0_i32_1 = arith.constant 0 : i32
    return %c0_i32, %c0_i32_0 : i32, i32
  }
  func.func @transform_2(%arg0: i32) -> (i32, i32) {
    %c0_i32 = arith.constant 0 : i32
    %c0_i32_0 = arith.constant 0 : i32
    return %arg0, %c0_i32 : i32, i32
  }
  func.func @transform_3(%arg0: i32) -> (i32, i32) {
    %c0_i32 = arith.constant 0 : i32
    %c0_i32_0 = arith.constant 0 : i32
    return %arg0, %c0_i32 : i32, i32
  }
  func.func @transform_4(%arg0: i32) -> (i32, i32) {
    %c0_i32 = arith.constant 0 : i32
    %c0_i32_0 = arith.constant 0 : i32
    return %arg0, %c0_i32 : i32, i32
  }
}

module attributes {stable_mosaic.version = 11 : i64} {
  func.func @_conv_kernel(%arg0: i32, %arg1: memref<16x512xbf16, #tpu.memory_space<vmem>>, %arg2: memref<512x128xbf16, #tpu.memory_space<vmem>>, %arg3: memref<16x128xbf16, #tpu.memory_space<vmem>>, %arg4: memref<8x128xf32, #tpu.memory_space<vmem>>, %arg5: memref<8x128xf32, #tpu.memory_space<vmem>>) attributes {dimension_semantics = [#tpu.dimension_semantics<parallel>], iteration_bounds = array<i64: 2>, scalar_prefetch = 0 : i64, scratch_operands = 0 : i64, tpu.core_type = #tpu.core_type<tc>, window_params = [{transform_indices = @transform_0, window_bounds = array<i64: 16, 512>}, {pipeline_mode = #tpu.pipeline_mode<synchronous>, transform_indices = @transform_1, window_bounds = array<i64: 512, 128>}, {transform_indices = @transform_2, window_bounds = array<i64: 16, 128>}, {transform_indices = @transform_3, window_bounds = array<i64: 8, 128>}, {transform_indices = @transform_4, window_bounds = array<i64: 8, 128>}]} {
    %c0 = arith.constant 0 : index
    %c0_0 = arith.constant 0 : index
    %0 = vector.load %arg1[%c0, %c0_0] : memref<16x512xbf16, #tpu.memory_space<vmem>>, vector<16x512xbf16>
    %c0_1 = arith.constant 0 : index
    %c0_2 = arith.constant 0 : index
    %1 = vector.load %arg2[%c0_1, %c0_2] : memref<512x128xbf16, #tpu.memory_space<vmem>>, vector<512x128xbf16>
    %cst = arith.constant dense<0.000000e+00> : vector<16x128xf32>
    %2 = tpu.matmul %0, %1, %cst {dimension_numbers = #tpu.dot_dimension_numbers<[1], [0], [0], [1], [0, 0, 1, 1], [], []>} : vector<16x512xbf16>, vector<512x128xbf16>, vector<16x128xf32> -> vector<16x128xf32>
    %3 = arith.truncf %2 : vector<16x128xf32> to vector<16x128xbf16>
    %c0_3 = arith.constant 0 : index
    %c0_4 = arith.constant 0 : index
    %4 = vector.load %arg3[%c0_3, %c0_4] : memref<16x128xbf16, #tpu.memory_space<vmem>>, vector<16x128xbf16>
    tpu.vector_store %arg3[%c0_3, %c0_4], %3 {strides = array<i32>} : memref<16x128xbf16, #tpu.memory_space<vmem>>, vector<16x128xbf16>,
    %5 = vector.shape_cast %2 : vector<16x128xf32> to vector<2x8x128xf32>
    %cst_5 = arith.constant dense<0.000000e+00> : vector<8x128xf32>
    %6 = vector.multi_reduction <add>, %5, %cst_5 [0] : vector<2x8x128xf32> to vector<8x128xf32>
    %c0_6 = arith.constant 0 : index
    %c0_7 = arith.constant 0 : index
    %7 = vector.load %arg4[%c0_6, %c0_7] : memref<8x128xf32, #tpu.memory_space<vmem>>, vector<8x128xf32>
    tpu.vector_store %arg4[%c0_6, %c0_7], %6 {strides = array<i32>} : memref<8x128xf32, #tpu.memory_space<vmem>>, vector<8x128xf32>,
    %8 = arith.mulf %5, %5 : vector<2x8x128xf32>
    %cst_8 = arith.constant dense<0.000000e+00> : vector<8x128xf32>
    %9 = vector.multi_reduction <add>, %8, %cst_8 [0] : vector<2x8x128xf32> to vector<8x128xf32>
    %c0_9 = arith.constant 0 : index
    %c0_10 = arith.constant 0 : index
    %10 = vector.load %arg5[%c0_9, %c0_10] : memref<8x128xf32, #tpu.memory_space<vmem>>, vector<8x128xf32>
    tpu.vector_store %arg5[%c0_9, %c0_10], %9 {strides = array<i32>} : memref<8x128xf32, #tpu.memory_space<vmem>>, vector<8x128xf32>,
    return
  }
  func.func @transform_0(%arg0: i32) -> (i32, i32) {
    %c0_i32 = arith.constant 0 : i32
    %c0_i32_0 = arith.constant 0 : i32
    return %arg0, %c0_i32 : i32, i32
  }
  func.func @transform_1(%arg0: i32) -> (i32, i32) {
    %c0_i32 = arith.constant 0 : i32
    %c0_i32_0 = arith.constant 0 : i32
    %c0_i32_1 = arith.constant 0 : i32
    return %c0_i32, %c0_i32_0 : i32, i32
  }
  func.func @transform_2(%arg0: i32) -> (i32, i32) {
    %c0_i32 = arith.constant 0 : i32
    %c0_i32_0 = arith.constant 0 : i32
    return %arg0, %c0_i32 : i32, i32
  }
  func.func @transform_3(%arg0: i32) -> (i32, i32) {
    %c0_i32 = arith.constant 0 : i32
    %c0_i32_0 = arith.constant 0 : i32
    return %arg0, %c0_i32 : i32, i32
  }
  func.func @transform_4(%arg0: i32) -> (i32, i32) {
    %c0_i32 = arith.constant 0 : i32
    %c0_i32_0 = arith.constant 0 : i32
    return %arg0, %c0_i32 : i32, i32
  }
}

module attributes {stable_mosaic.version = 11 : i64} {
  func.func @_conv_kernel(%arg0: i32, %arg1: memref<8x1024xbf16, #tpu.memory_space<vmem>>, %arg2: memref<1024x128xbf16, #tpu.memory_space<vmem>>, %arg3: memref<8x128xf32, #tpu.memory_space<vmem>>) attributes {dimension_semantics = [#tpu.dimension_semantics<parallel>], iteration_bounds = array<i64: 1>, scalar_prefetch = 0 : i64, scratch_operands = 0 : i64, tpu.core_type = #tpu.core_type<tc>, window_params = [{transform_indices = @transform_0, window_bounds = array<i64: 8, 1024>}, {pipeline_mode = #tpu.pipeline_mode<synchronous>, transform_indices = @transform_1, window_bounds = array<i64: 1024, 128>}, {transform_indices = @transform_2, window_bounds = array<i64: 8, 128>}]} {
    %c0 = arith.constant 0 : index
    %c0_0 = arith.constant 0 : index
    %0 = vector.load %arg1[%c0, %c0_0] : memref<8x1024xbf16, #tpu.memory_space<vmem>>, vector<8x1024xbf16>
    %c0_1 = arith.constant 0 : index
    %c0_2 = arith.constant 0 : index
    %1 = vector.load %arg2[%c0_1, %c0_2] : memref<1024x128xbf16, #tpu.memory_space<vmem>>, vector<1024x128xbf16>
    %cst = arith.constant dense<0.000000e+00> : vector<8x128xf32>
    %2 = tpu.matmul %0, %1, %cst {dimension_numbers = #tpu.dot_dimension_numbers<[1], [0], [0], [1], [0, 0, 1, 1], [], []>} : vector<8x1024xbf16>, vector<1024x128xbf16>, vector<8x128xf32> -> vector<8x128xf32>
    %3 = arith.negf %2 : vector<8x128xf32>
    %4 = math.exp %3 : vector<8x128xf32>
    %cst_3 = arith.constant 1.000000e+00 : f32
    %5 = vector.broadcast %cst_3 : f32 to vector<8x128xf32>
    %6 = arith.addf %5, %4 : vector<8x128xf32>
    %7 = arith.divf %5, %6 : vector<8x128xf32>
    %c0_4 = arith.constant 0 : index
    %c0_5 = arith.constant 0 : index
    %8 = vector.load %arg3[%c0_4, %c0_5] : memref<8x128xf32, #tpu.memory_space<vmem>>, vector<8x128xf32>
    tpu.vector_store %arg3[%c0_4, %c0_5], %7 {strides = array<i32>} : memref<8x128xf32, #tpu.memory_space<vmem>>, vector<8x128xf32>,
    return
  }
  func.func @transform_0(%arg0: i32) -> (i32, i32) {
    %c0_i32 = arith.constant 0 : i32
    %c0_i32_0 = arith.constant 0 : i32
    return %arg0, %c0_i32 : i32, i32
  }
  func.func @transform_1(%arg0: i32) -> (i32, i32) {
    %c0_i32 = arith.constant 0 : i32
    %c0_i32_0 = arith.constant 0 : i32
    %c0_i32_1 = arith.constant 0 : i32
    return %c0_i32, %c0_i32_0 : i32, i32
  }
  func.func @transform_2(%arg0: i32) -> (i32, i32) {
    %c0_i32 = arith.constant 0 : i32
    %c0_i32_0 = arith.constant 0 : i32
    return %arg0, %c0_i32 : i32, i32
  }
}

</mosaic_0001>

<bundles_post_ra>
// kernel: discriminator_forward.5
= control target key start
LH: loop header
LB: loop body
LE: loop exit
PB: predicated region body
PF: predicated region fallthrough
CT: control target
= control target key end

     0   :  { %7 = vsyncpa [#allocation3], 0  ;;  %s2444_s0 = inlined_call_operand.hbm [shape: bf16[2048,128], index: 0, kind: input, shape index: {}]   ;;  %s2445_s1 = inlined_call_operand.hbm [shape: bf16[128,128], index: 1, kind: input, shape index: {}]   ;;  %s2446_s2 = inlined_call_operand.hbm [shape: bf16[2048,128], index: 2, kind: output, shape index: {}]  }
   0x1   :  { %9 = vsyncpa [#allocation3 + $0x1], 0 }
   0x2   :  { %10 = vsyncpa [#allocation6], 0 }
   0x3   :  { %11 = vsyncpa [#allocation4], 0 }
   0x4   :  { %13 = vsyncpa [#allocation4 + $0x1], 0  ;;  %s2164_s9 = smov 0   ;;  %s2166_s10 = smov 0  }
   0x5   :  { %s2168_s11 = smov 0   ;;  %s2170_s12 = smov 0  }
   0x6 LB: > { %s2185_s13 = sadd.s32 4294967295, %s2140_s12   ;;  %s1398_s14 = sadd.s32 4294967294, %s2140_s12   ;;  %s2140_s12 = sphi %s2170_s12, %s2465_s12   ;;  %s2136_s11 = sphi %s2168_s11, %s2464_s11   ;;  %s2132_s10 = sphi %s2166_s10, %s2463_s10   ;;  %s2128_s9 = sphi %s2164_s9, %s2462_s9  }
   0x7   : > { %p39_p0 = scmp.ne.s32.totalorder %s2132_s10, %s2128_s9  ;;  %p2447_p1 = scmp.eq.s32.totalorder %s2185_s13, 0 }
   0x8   : > { %p90_p3 = scmp.eq.s32.totalorder %s1398_s14, 3  ;;  %p1399_p5 = scmp.ge.s32.totalorder %s2140_s12, 1 }
   0x9   : > { %p2194_p4 = por %p2447_p1, %p39_p0  ;;  %p97_p7 = scmp.lt.s32.totalorder %s2140_s12, 5 }
   0xa   : > { %p2199_p6 = por %p90_p3, %p39_p0  ;;  %s2142_s18 = smov [#allocation5]  }
   0xb   : > { %s2450_s15 = scalar_select %p2194_p4, 1, 0 }
   0xc   : > { %s2451_s16 = scalar_select %p2199_p6, 1, 0 }
   0xd   : > { %p2204_p8 = pnand %p1399_p5, %p97_p7  ;;  %s109_s19 = sshll.u32 %s2142_s18, 4  ;;  %s110_s19 = int_to_ptr.vmem [resolvable:$true] %s109_s19 }
   0xe   : > { %s2217_s21 = sadd.s32 1, %s2140_s12   ;;  %s26_s22 = sadd.s32 1, %s2136_s11 }
   0xf   : > { %s2452_s17 = scalar_select %p2204_p8, 1, 0 }
  0x10   : > { %p1919_p9 = pneg %p2204_p8  ;;  %s23_s23 = ssub.s32 %s2140_s12, %s2217_s21 }
  0x11   : > { %s2012_s26 = scalar_lea.hbm %s2445_s1, 1024 }
  0x12   : > { %p2212_p10 = pnand %p1919_p9, %p2447_p1  ;;  %p2013_p11 = scmp.ne.s32.totalorder %s2445_s1, %s2012_s26 }
  0x13   : > { %p2019_p3 = scmp.lt.u32.totalorder %s2012_s26, %s2445_s1 }
  0x14   : > { %p2014_p12 = pneg %p2212_p10 }
  0x16   : > { %p2015_p13 = pnand %p2014_p12, %p2013_p11 }
  0x18   : > { %p2016_p0 = pneg %p2015_p13 }
  0x1a   : > { %p2021_p5 = pnand %p2019_p3, %p2016_p0 }
  0x1c   : > { %2024 = shalt.err (!%p2021_p5)
}
  0x1d   : > { %s2025_s3 = scalar_lea.vmem %s110_s19, 1024  ;;  %p2033_p2 = scmp.lt.s32.totalorder %s110_s19, %s110_s19 }
  0x1e   : > { %p2026_p7 = scmp.ne.s32.totalorder %s110_s19, %s2025_s3  ;;  %p2034_p6 = scmp.lt.s32.totalorder %s2025_s3, %s2025_s3 }
  0x20   : > { %p2028_p9 = pnand %p2026_p7, %p2014_p12  ;;  %p2035_p4 = por %p2034_p6, %p2033_p2 }
  0x22   : > { %p2029_p1 = pneg %p2028_p9 }
  0x24   : > { %p2036_p8 = pnand %p2035_p4, %p2029_p1 }
  0x26   : > { %2039 = shalt.err (!%p2036_p8)
}
  0x27   : > { %s2143_s4 = smov 64   ;;  %s2144_s5 = smov 4  }
  0x28   : > { %1922 = dma.hbm_to_vmem [thread:$0]  (!%p2212_p10), %s2445_s1, 1024, %s110_s19, [#allocation6], %s2143_s4, %s2143_s4, %s2144_s5  }
  0x29   : > { %p24_p1 = scmp.eq.s32.totalorder %s23_s23, 0  ;;  %p33_p2 = scmp.ne.s32.totalorder %s2136_s11, %s2132_s10 }
  0x2a   : > { %p34_p4 = scmp.eq.s32.totalorder %s2140_s12, 0  ;;  %p1932_p6 = scmp.lt.s32.totalorder %s2140_s12, 4 }
  0x2b   : > { %s2246_s8 = scalar_select %p24_p1, %s2136_s11, %s26_s22  }
  0x2c   : > { %p35_p8 = por %p34_p4, %p33_p2  ;;  %p2454_p11 = scmp.eq.s32.totalorder %s2185_s13, 3 }
  0x2d   : > { %s123_s18 = sand.u32 1, %s2136_s11   ;;  %s1518_s20 = sshll.u32 %s2140_s12, 12 }
  0x2e   : > { %p2250_p12 = por %p2454_p11, %p33_p2  ;;  %s1402_s24 = sshll.u32 %s123_s18, 8 }
  0x2f   : > { %s2259_s27 = scalar_lea.hbm %s2444_s0, %s1518_s20  ;;  %s127_s19 = scalar_lea.vmem [#allocation2], %s1402_s24 }
  0x30   : > { %s134_s22 = sshll.u32 %s127_s19, 4  ;;  %p2261_p10 = pnand %p1932_p6, %p35_p8  ;;  %s2265_s22 = int_to_ptr.vmem [resolvable:$true] %s134_s22 }
  0x31   : > { %s2267_s28 = scalar_lea.sflag [#allocation3], %s123_s18  ;;  %s2040_s29 = scalar_lea.hbm %s2259_s27, 4096 }
  0x32   : > { %p2041_p13 = scmp.ne.s32.totalorder %s2259_s27, %s2040_s29  ;;  %p2042_p0 = pneg %p2261_p10 }
  0x33   : > { %s2045_s6 = scalar_lea.hbm %s2444_s0, 16384  ;;  %p2046_p7 = scmp.lt.u32.totalorder %s2259_s27, %s2444_s0 }
  0x34   : > { %p2043_p3 = pnand %p2042_p0, %p2041_p13  ;;  %p2047_p9 = scmp.lt.u32.totalorder %s2045_s6, %s2040_s29 }
  0x35   : > { %p2049_p2 = scmp.lt.u32.totalorder %s2040_s29, %s2259_s27 }
  0x36   : > { %p2044_p5 = pneg %p2043_p3  ;;  %p2048_p1 = por %p2047_p9, %p2046_p7 }
  0x38   : > { %p2050_p4 = por %p2049_p2, %p2048_p1 }
  0x3a   : > { %p2051_p6 = pnand %p2050_p4, %p2044_p5 }
  0x3c   : > { %2054 = shalt.err (!%p2051_p6)
}
  0x3d   : > { %s2055_s18 = scalar_lea.vmem %s2265_s22, 4096  ;;  %s2145_s24 = smov [#allocation2]  }
  0x3e   : > { %p2056_p8 = scmp.ne.s32.totalorder %s2265_s22, %s2055_s18  ;;  %s2060_s25 = sshll.u32 %s2145_s24, 4  ;;  %s2061_s25 = int_to_ptr.vmem [resolvable:$false] %s2060_s25 }
  0x3f   : > { %s2062_s26 = scalar_lea.vmem %s2061_s25, 8192  ;;  %p2063_p3 = scmp.lt.s32.totalorder %s2265_s22, %s2061_s25 }
  0x40   : > { %p2058_p11 = pnand %p2056_p8, %p2042_p0  ;;  %p2064_p7 = scmp.lt.s32.totalorder %s2062_s26, %s2055_s18 }
  0x42   : > { %p2059_p13 = pneg %p2058_p11  ;;  %p2065_p9 = por %p2064_p7, %p2063_p3 }
  0x44   : > { %p2066_p1 = pnand %p2065_p9, %p2059_p13 }
  0x46   : > { %2069 = shalt.err (!%p2066_p1)
}
  0x47   : > { %1926 = dma.hbm_to_vmem [thread:$0]  (!%p2261_p10), %s2259_s27, 4096, %s2265_s22, %s2267_s28, %s2143_s4, %s2143_s4, %s2144_s5  }
  0x48   : > { %p2457_p0 = scmp.ne.s32.totalorder %s2452_s17, 0 }
  0x49   : > { %s2301_s19 = sand.u32 (!%p2457_p0), 1, %s2132_s10   ;;  %p2458_p5 = scmp.ne.s32.totalorder (!%p2457_p0), %s2450_s15, 0 }
  0x4a   : > { %146 = sbr.rel (%p2457_p0) target bundleno = 411 (0x19b), region = 28  ;;  %s1406_s29 = sshll.u32 (!%p2457_p0), %s2301_s19, 8 }
  0x4b   : > { %s149_s30 = scalar_lea.sflag (!%p2457_p0), [#allocation3], %s2301_s19  ;;  %s2307_s23 = scalar_lea.vmem (!%p2457_p0), [#allocation2], %s1406_s29 }
  0x51   : > { %2115 = dma.done.wait (%p2458_p5), %s149_s30, 4096  }
  0x52   : > { %2117 = vsyncadd (%p2458_p5), %s149_s30, 4294963200  ;;  %p2459_p10 = scmp.eq.s32.totalorder %s2185_s13, 0 }
  0x54   : > { %2119 = dma.done.wait (%p2459_p10), [#allocation6], 1024   ;;  %p2460_p2 = pmov %p2459_p10 }
  0x55   : > { %v1972_v0 = vld [vmem:[#allocation5] sm:$0xff]   ;;  %v1973_v1 = vld [vmem:[#allocation5 + $0x8] sm:$0xff]   ;;  %v1974_v2 = vld [vmem:[#allocation5 + $0x10] sm:$0xff]   ;;  %s2351_s15 = scalar_lea.vmem [#allocation7], %s1406_s29  ;;  %s1583_s17 = sshll.u32 %s2185_s13, 12 }
  0x56   : > { %2121 = vsyncadd (%p2460_p2), [#allocation6], 4294966272  ;;  %1815 = vmatprep.subr.bf16.mxu0 %v1972_v0  ;;  %1895 = vmatprep.subr.bf16.mxu1 %v1972_v0  ;;  %v1975_v3 = vld [vmem:[#allocation5 + $0x18] sm:$0xff]   ;;  %v1980_v4 = vld [vmem:[%s2307_s23] sm:$0xff]   ;;  %s1315_s4 = sshll.u32 %s2351_s15, 4  ;;  %s2395_s22 = scalar_lea.hbm %s2446_s2, %s1583_s17  ;;  %s2397_s4 = int_to_ptr.vmem [resolvable:$true] %s1315_s4 }
  0x57   : > { %1816 = vmatpush3.bf16.msra.mxu0 %v1972_v0  ;;  %1903 = vmatpush3.bf16.msra.mxu1 %v1972_v0  ;;  %v1981_v5 = vld [vmem:[%s2307_s23 + $0x80] sm:$0xff]   ;;  %v1977_v7 = vld [vmem:[#allocation5 + $0x28] sm:$0xff]   ;;  %v1978_v8 = vld [vmem:[#allocation5 + $0x30] sm:$0xff]   ;;  %s1302_s28 = scalar_lea.sflag [#allocation4], %s2301_s19  ;;  %s2070_s3 = scalar_lea.vmem %s2397_s4, 4096 }
  0x58   : > { %1817 = vmatprep.subr.bf16.mxu0 %v1973_v1  ;;  %1896 = vmatprep.subr.bf16.mxu1 %v1973_v1  ;;  %v1976_v6 = vld [vmem:[#allocation5 + $0x20] sm:$0xff]   ;;  %v1979_v9 = vld [vmem:[#allocation5 + $0x38] sm:$0xff]   ;;  %v1982_v10 = vld [vmem:[%s2307_s23 + $0x8] sm:$0xff]   ;;  %p2071_p4 = scmp.ne.s32.totalorder %s2397_s4, %s2070_s3  ;;  %s2146_s13 = smov [#allocation7]  }
  0x59   : > { %1831 = vmatprep.mubr.bf16.mxu0 %v1980_v4  ;;  %1863 = vmatprep.mubr.bf16.mxu1 %v1981_v5  ;;  %v1983_v11 = vld [vmem:[%s2307_s23 + $0x88] sm:$0xff]   ;;  %v1984_v12 = vld [vmem:[%s2307_s23 + $0x10] sm:$0xff]   ;;  %v1986_v14 = vld [vmem:[%s2307_s23 + $0x18] sm:$0xff]   ;;  %s2074_s6 = sshll.u32 %s2146_s13, 4  ;;  %s2075_s6 = int_to_ptr.vmem [resolvable:$false] %s2074_s6 }
  0x5a   : > { %v1985_v13 = vld [vmem:[%s2307_s23 + $0x90] sm:$0xff]   ;;  %v1987_v15 = vld [vmem:[%s2307_s23 + $0x98] sm:$0xff]   ;;  %v1988_v16 = vld [vmem:[%s2307_s23 + $0x20] sm:$0xff]   ;;  %p2072_p6 = pnand %p2071_p4, %p2250_p12  ;;  %s2076_s7 = scalar_lea.vmem %s2075_s6, 8192 }
  0x5b   : > { %1818 = vmatpush3.bf16.msra.mxu0 %v1973_v1  ;;  %1904 = vmatpush3.bf16.msra.mxu1 %v1973_v1  ;;  %v1989_v17 = vld [vmem:[%s2307_s23 + $0xa0] sm:$0xff]   ;;  %v1990_v18 = vld [vmem:[%s2307_s23 + $0x28] sm:$0xff]   ;;  %v1992_v20 = vld [vmem:[%s2307_s23 + $0x30] sm:$0xff]   ;;  %p2077_p11 = scmp.lt.s32.totalorder %s2397_s4, %s2075_s6  ;;  %p2078_p13 = scmp.lt.s32.totalorder %s2076_s7, %s2070_s3 }
  0x5c   : > { %1819 = vmatprep.subr.bf16.mxu0 %v1974_v2  ;;  %1897 = vmatprep.subr.bf16.mxu1 %v1974_v2  ;;  %v1991_v19 = vld [vmem:[%s2307_s23 + $0xa8] sm:$0xff]   ;;  %v1993_v21 = vld [vmem:[%s2307_s23 + $0xb0] sm:$0xff]   ;;  %v1994_v22 = vld [vmem:[%s2307_s23 + $0x38] sm:$0xff]   ;;  %p2073_p8 = pneg %p2072_p6 }
  0x5d   : > { %v1995_v23 = vld [vmem:[%s2307_s23 + $0xb8] sm:$0xff]   ;;  %v1996_v24 = vld [vmem:[%s2307_s23 + $0x40] sm:$0xff]   ;;  %v1998_v26 = vld [vmem:[%s2307_s23 + $0x48] sm:$0xff]   ;;  %p2079_p3 = por %p2078_p13, %p2077_p11 }
  0x5e   : > { %v1997_v25 = vld [vmem:[%s2307_s23 + $0xc0] sm:$0xff]   ;;  %v1999_v27 = vld [vmem:[%s2307_s23 + $0xc8] sm:$0xff]   ;;  %v2000_v28 = vld [vmem:[%s2307_s23 + $0x50] sm:$0xff]  }
  0x5f   : > { %1820 = vmatpush3.bf16.msra.mxu0 %v1974_v2  ;;  %1905 = vmatpush3.bf16.msra.mxu1 %v1974_v2  ;;  %v2001_v29 = vld [vmem:[%s2307_s23 + $0xd0] sm:$0xff]   ;;  %v2002_v30 = vld [vmem:[%s2307_s23 + $0x58] sm:$0xff]   ;;  %v2004_v32 = vld [vmem:[%s2307_s23 + $0x60] sm:$0xff]   ;;  %p2080_p7 = pnand %p2079_p3, %p2073_p8 }
  0x60   : > { %1821 = vmatprep.subr.bf16.mxu0 %v1975_v3  ;;  %1898 = vmatprep.subr.bf16.mxu1 %v1975_v3  ;;  %v2003_v31 = vld [vmem:[%s2307_s23 + $0xd8] sm:$0xff]   ;;  %v2005_v33 = vld [vmem:[%s2307_s23 + $0xe0] sm:$0xff]   ;;  %v2006_v34 = vld [vmem:[%s2307_s23 + $0x68] sm:$0xff]  }
  0x61   : > { %v2007_v35 = vld [vmem:[%s2307_s23 + $0xe8] sm:$0xff]   ;;  %v2008_v36 = vld [vmem:[%s2307_s23 + $0x70] sm:$0xff]   ;;  %v2010_v38 = vld [vmem:[%s2307_s23 + $0x78] sm:$0xff]  }
  0x62   : > { %v2009_v37 = vld [vmem:[%s2307_s23 + $0xf0] sm:$0xff]   ;;  %v2011_v39 = vld [vmem:[%s2307_s23 + $0xf8] sm:$0xff]  }
  0x63   : > { %1822 = vmatpush3.bf16.msra.mxu0 %v1975_v3  ;;  %1906 = vmatpush3.bf16.msra.mxu1 %v1975_v3 }
  0x64   : > { %1823 = vmatprep.subr.bf16.mxu0 %v1976_v6  ;;  %1899 = vmatprep.subr.bf16.mxu1 %v1976_v6 }
  0x67   : > { %1824 = vmatpush3.bf16.msra.mxu0 %v1976_v6  ;;  %1907 = vmatpush3.bf16.msra.mxu1 %v1976_v6 }
  0x68   : > { %1825 = vmatprep.subr.bf16.mxu0 %v1977_v7  ;;  %1900 = vmatprep.subr.bf16.mxu1 %v1977_v7 }
  0x6b   : > { %1826 = vmatpush3.bf16.msra.mxu0 %v1977_v7  ;;  %1908 = vmatpush3.bf16.msra.mxu1 %v1977_v7 }
  0x6c   : > { %1827 = vmatprep.subr.bf16.mxu0 %v1978_v8  ;;  %1901 = vmatprep.subr.bf16.mxu1 %v1978_v8 }
  0x6f   : > { %1828 = vmatpush3.bf16.msra.mxu0 %v1978_v8  ;;  %1909 = vmatpush3.bf16.msra.mxu1 %v1978_v8 }
  0x70   : > { %1829 = vmatprep.subr.bf16.mxu0 %v1979_v9  ;;  %1902 = vmatprep.subr.bf16.mxu1 %v1979_v9 }
  0x73   : > { %1830 = vmatpush3.bf16.msra.mxu0 %v1979_v9  ;;  %1910 = vmatpush3.bf16.msra.mxu1 %v1979_v9 }
  0x76   : > { %1832 = vmatmul.mubr.bf16.vlgmr.msra.gmra.mrb[0].mxu0 %v1982_v10  ;;  %1864 = vmatmul.mubr.bf16.vlgmr.msra.gmra.mrb[0].mxu1 %v1983_v11 }
  0x77   : > { %1835 = vmatprep.mubr.bf16.mxu0 %v1984_v12  ;;  %1867 = vmatprep.mubr.bf16.mxu1 %v1985_v13 }
  0x7e   : > { %1836 = vmatmul.mubr.bf16.gmra.mrb[4].mxu0 %v1986_v14  ;;  %1868 = vmatmul.mubr.bf16.gmra.mrb[4].mxu1 %v1987_v15 }
  0x7f   : > { %1839 = vmatprep.mubr.bf16.mxu0 %v1988_v16  ;;  %1871 = vmatprep.mubr.bf16.mxu1 %v1989_v17 }
  0x86   : > { %1840 = vmatmul.mubr.bf16.gmra.mrb[8].mxu0 %v1990_v18  ;;  %1872 = vmatmul.mubr.bf16.gmra.mrb[8].mxu1 %v1991_v19 }
  0x87   : > { %1843 = vmatprep.mubr.bf16.mxu0 %v1992_v20  ;;  %1875 = vmatprep.mubr.bf16.mxu1 %v1993_v21 }
  0x8e   : > { %1844 = vmatmul.mubr.bf16.gmra.mrb[12].mxu0 %v1994_v22  ;;  %1876 = vmatmul.mubr.bf16.gmra.mrb[12].mxu1 %v1995_v23 }
  0x8f   : > { %1847 = vmatprep.mubr.bf16.mxu0 %v1996_v24  ;;  %1879 = vmatprep.mubr.bf16.mxu1 %v1997_v25 }
  0x96   : > { %1848 = vmatmul.mubr.bf16.gmra.mrb[16].mxu0 %v1998_v26  ;;  %1880 = vmatmul.mubr.bf16.gmra.mrb[16].mxu1 %v1999_v27 }
  0x97   : > { %1851 = vmatprep.mubr.bf16.mxu0 %v2000_v28  ;;  %1883 = vmatprep.mubr.bf16.mxu1 %v2001_v29 }
  0x9e   : > { %1852 = vmatmul.mubr.bf16.gmra.mrb[20].mxu0 %v2002_v30  ;;  %1884 = vmatmul.mubr.bf16.gmra.mrb[20].mxu1 %v2003_v31 }
  0x9f   : > { %1855 = vmatprep.mubr.bf16.mxu0 %v2004_v32  ;;  %1887 = vmatprep.mubr.bf16.mxu1 %v2005_v33 }
  0xa6   : > { %1856 = vmatmul.mubr.bf16.gmra.mrb[24].mxu0 %v2006_v34  ;;  %1888 = vmatmul.mubr.bf16.gmra.mrb[24].mxu1 %v2007_v35 }
  0xa7   : > { %1859 = vmatprep.mubr.bf16.mxu0 %v2008_v36  ;;  %1891 = vmatprep.mubr.bf16.mxu1 %v2009_v37 }
  0xae   : > { %1860 = vmatmul.mubr.bf16.gmra.mrb[28].mxu0 %v2010_v38  ;;  %1892 = vmatmul.mubr.bf16.gmra.mrb[28].mxu1 %v2011_v39 }
 0x149   : > { %v1833_v40 = vpop.f32.mrb[0].mxu0  ;;  %v1865_v41 = vpop.f32.mrb[0].mxu1 }
 0x14a   : > { %vm791_vm0 = vcmp.gt.f32.partialorder %v1833_v40, 0.0  ;;  %v855_v42 = vmul.f32 0.2, %v1833_v40  ;;  %v887_v43 = vmul.f32 0.2, %v1865_v41  ;;  %vm823_vm1 = vcmp.gt.f32.partialorder %v1865_v41, 0.0 }
 0x14b   : > { %v534_v44 = vpop.f32.mrb[1].mxu0  ;;  %v662_v45 = vpop.f32.mrb[1].mxu1 }
 0x14c   : > { %v853_v46 = vmul.f32 0.2, %v534_v44  ;;  %v1834_v47 = vpop.f32.mrb[2].mxu0  ;;  %v1866_v48 = vpop.f32.mrb[2].mxu1  ;;  %v919_v49 = vsel %vm791_vm0, %v1833_v40, %v855_v42  ;;  %v885_v50 = vmul.f32 0.2, %v662_v45  ;;  %v951_v52 = vsel %vm823_vm1, %v1865_v41, %v887_v43 }
 0x14d   : > { %vm792_vm2 = vcmp.gt.f32.partialorder %v1834_v47, 0.0  ;;  %v856_v51 = vmul.f32 0.2, %v1834_v47  ;;  %vm789_vm3 = vcmp.gt.f32.partialorder %v534_v44, 0.0  ;;  %vm824_vm4 = vcmp.gt.f32.partialorder %v1866_v48, 0.0  ;;  %v537_v54 = vpop.f32.mrb[3].mxu0 }
 0x14e   : > { %v888_v53 = vmul.f32 0.2, %v1866_v48  ;;  %v665_v55 = vpop.f32.mrb[3].mxu1  ;;  %vm821_vm5 = vcmp.gt.f32.partialorder %v662_v45, 0.0  ;;  %vm790_vm6 = vcmp.gt.f32.partialorder %v537_v54, 0.0  ;;  %v917_v61 = vsel %vm789_vm3, %v534_v44, %v853_v46 }
 0x14f   : > { %v920_v56 = vsel %vm792_vm2, %v1834_v47, %v856_v51  ;;  %v854_v57 = vmul.f32 0.2, %v537_v54  ;;  %vm822_vm7 = vcmp.gt.f32.partialorder %v665_v55, 0.0  ;;  %v886_v60 = vmul.f32 0.2, %v665_v55 }
 0x150   : > { %v1592_v58 = vpack.c.bf16 %v920_v56, %v919_v49  ;;  %v952_v59 = vsel %vm824_vm4, %v1866_v48, %v888_v53  ;;  %v949_v2 = vsel %vm821_vm5, %v662_v45, %v885_v50 }
 0x151   : > { %v1672_v62 = vpack.c.bf16 %v952_v59, %v951_v52  ;;  %v918_v63 = vsel %vm790_vm6, %v537_v54, %v854_v57  ;;  %v1837_v0 = vpop.f32.mrb[4].mxu0  ;;  %v1869_v1 = vpop.f32.mrb[4].mxu1  ;;  %v950_v4 = vsel %vm822_vm7, %v665_v55, %v886_v60 }
 0x152   : > { %1744 = vst [vmem:[%s2351_s15 + $0x8] sm:$0xff] %v1592_v58   ;;  %v1587_v3 = vpack.c.bf16 %v918_v63, %v917_v61  ;;  %v859_v5 = vmul.f32 0.2, %v1837_v0  ;;  %v550_v6 = vpop.f32.mrb[5].mxu0  ;;  %v678_v7 = vpop.f32.mrb[5].mxu1  ;;  %v1667_v8 = vpack.c.bf16 %v950_v4, %v949_v2  ;;  %vm795_vm8 = vcmp.gt.f32.partialorder %v1837_v0, 0.0 }
 0x153   : > { %1760 = vst [vmem:[%s2351_s15 + $0x88] sm:$0xff] %v1672_v62   ;;  %v891_v9 = vmul.f32 0.2, %v1869_v1  ;;  %v1838_v10 = vpop.f32.mrb[6].mxu0  ;;  %v1870_v11 = vpop.f32.mrb[6].mxu1  ;;  %vm827_vm9 = vcmp.gt.f32.partialorder %v1869_v1, 0.0 }
 0x154   : > { %1588 = vst [vmem:[%s2351_s15] sm:$0xff] %v1587_v3   ;;  %v857_v12 = vmul.f32 0.2, %v550_v6  ;;  %v889_v13 = vmul.f32 0.2, %v678_v7  ;;  %v553_v14 = vpop.f32.mrb[7].mxu0  ;;  %1759 = vst [vmem:[%s2351_s15 + $0x80] sm:$0xff] %v1667_v8   ;;  %v923_v17 = vsel %vm795_vm8, %v1837_v0, %v859_v5 }
 0x155   : > { %vm793_vm10 = vcmp.gt.f32.partialorder %v550_v6, 0.0  ;;  %vm796_vm11 = vcmp.gt.f32.partialorder %v1838_v10, 0.0  ;;  %v860_v15 = vmul.f32 0.2, %v1838_v10  ;;  %vm828_vm12 = vcmp.gt.f32.partialorder %v1870_v11, 0.0  ;;  %v681_v16 = vpop.f32.mrb[7].mxu1 }
 0x156   : > { %vm825_vm13 = vcmp.gt.f32.partialorder %v678_v7, 0.0  ;;  %v892_v18 = vmul.f32 0.2, %v1870_v11  ;;  %vm794_vm14 = vcmp.gt.f32.partialorder %v553_v14, 0.0  ;;  %v858_v20 = vmul.f32 0.2, %v553_v14 }
 0x157   : > { %v924_v19 = vsel %vm796_vm11, %v1838_v10, %v860_v15  ;;  %vm826_vm15 = vcmp.gt.f32.partialorder %v681_v16, 0.0  ;;  %v890_v21 = vmul.f32 0.2, %v681_v16  ;;  %v955_v22 = vsel %vm827_vm9, %v1869_v1, %v891_v9 }
 0x158   : > { %v921_v23 = vsel %vm793_vm10, %v550_v6, %v857_v12  ;;  %v1602_v24 = vpack.c.bf16 %v924_v19, %v923_v17  ;;  %v956_v25 = vsel %vm828_vm12, %v1870_v11, %v892_v18  ;;  %v953_v26 = vsel %vm825_vm13, %v678_v7, %v889_v13 }
 0x159   : > { %v1682_v27 = vpack.c.bf16 %v956_v25, %v955_v22  ;;  %v922_v28 = vsel %vm794_vm14, %v553_v14, %v858_v20  ;;  %v954_v29 = vsel %vm826_vm15, %v681_v16, %v890_v21  ;;  %v1841_v30 = vpop.f32.mrb[8].mxu0  ;;  %v1873_v31 = vpop.f32.mrb[8].mxu1 }
 0x15a   : > { %1746 = vst [vmem:[%s2351_s15 + $0x18] sm:$0xff] %v1602_v24   ;;  %v1597_v32 = vpack.c.bf16 %v922_v28, %v921_v23  ;;  %v1677_v33 = vpack.c.bf16 %v954_v29, %v953_v26  ;;  %vm799_vm0 = vcmp.gt.f32.partialorder %v1841_v30, 0.0  ;;  %v863_v34 = vmul.f32 0.2, %v1841_v30  ;;  %v566_v35 = vpop.f32.mrb[9].mxu0  ;;  %v694_v36 = vpop.f32.mrb[9].mxu1 }
 0x15b   : > { %1762 = vst [vmem:[%s2351_s15 + $0x98] sm:$0xff] %v1682_v27   ;;  %vm831_vm1 = vcmp.gt.f32.partialorder %v1873_v31, 0.0  ;;  %v895_v37 = vmul.f32 0.2, %v1873_v31  ;;  %v861_v38 = vmul.f32 0.2, %v566_v35 }
 0x15c   : > { %1745 = vst [vmem:[%s2351_s15 + $0x10] sm:$0xff] %v1597_v32   ;;  %1761 = vst [vmem:[%s2351_s15 + $0x90] sm:$0xff] %v1677_v33   ;;  %v893_v39 = vmul.f32 0.2, %v694_v36  ;;  %v1842_v40 = vpop.f32.mrb[10].mxu0  ;;  %v1874_v41 = vpop.f32.mrb[10].mxu1  ;;  %v927_v42 = vsel %vm799_vm0, %v1841_v30, %v863_v34 }
 0x15d   : > { %vm797_vm2 = vcmp.gt.f32.partialorder %v566_v35, 0.0  ;;  %vm800_vm3 = vcmp.gt.f32.partialorder %v1842_v40, 0.0  ;;  %v864_v43 = vmul.f32 0.2, %v1842_v40  ;;  %v569_v44 = vpop.f32.mrb[11].mxu0  ;;  %v697_v45 = vpop.f32.mrb[11].mxu1  ;;  %v959_v50 = vsel %vm831_vm1, %v1873_v31, %v895_v37 }
 0x15e   : > { %vm829_vm4 = vcmp.gt.f32.partialorder %v694_v36, 0.0  ;;  %vm832_vm5 = vcmp.gt.f32.partialorder %v1874_v41, 0.0  ;;  %v896_v46 = vmul.f32 0.2, %v1874_v41  ;;  %vm798_vm6 = vcmp.gt.f32.partialorder %v569_v44, 0.0 }
 0x15f   : > { %v928_v47 = vsel %vm800_vm3, %v1842_v40, %v864_v43  ;;  %v862_v48 = vmul.f32 0.2, %v569_v44  ;;  %vm830_vm7 = vcmp.gt.f32.partialorder %v697_v45, 0.0  ;;  %v894_v49 = vmul.f32 0.2, %v697_v45 }
 0x160   : > { %v925_v51 = vsel %vm797_vm2, %v566_v35, %v861_v38  ;;  %v1612_v52 = vpack.c.bf16 %v928_v47, %v927_v42  ;;  %v960_v53 = vsel %vm832_vm5, %v1874_v41, %v896_v46  ;;  %v957_v54 = vsel %vm829_vm4, %v694_v36, %v893_v39 }
 0x161   : > { %v1692_v55 = vpack.c.bf16 %v960_v53, %v959_v50  ;;  %v926_v56 = vsel %vm798_vm6, %v569_v44, %v862_v48  ;;  %v958_v57 = vsel %vm830_vm7, %v697_v45, %v894_v49  ;;  %v1845_v58 = vpop.f32.mrb[12].mxu0  ;;  %v1877_v59 = vpop.f32.mrb[12].mxu1 }
 0x162   : > { %1748 = vst [vmem:[%s2351_s15 + $0x28] sm:$0xff] %v1612_v52   ;;  %v1607_v60 = vpack.c.bf16 %v926_v56, %v925_v51  ;;  %v1687_v61 = vpack.c.bf16 %v958_v57, %v957_v54  ;;  %vm803_vm8 = vcmp.gt.f32.partialorder %v1845_v58, 0.0  ;;  %v867_v62 = vmul.f32 0.2, %v1845_v58  ;;  %v582_v63 = vpop.f32.mrb[13].mxu0  ;;  %v710_v0 = vpop.f32.mrb[13].mxu1 }
 0x163   : > { %1764 = vst [vmem:[%s2351_s15 + $0xa8] sm:$0xff] %v1692_v55   ;;  %vm835_vm9 = vcmp.gt.f32.partialorder %v1877_v59, 0.0  ;;  %v899_v1 = vmul.f32 0.2, %v1877_v59  ;;  %v865_v2 = vmul.f32 0.2, %v582_v63 }
 0x164   : > { %1747 = vst [vmem:[%s2351_s15 + $0x20] sm:$0xff] %v1607_v60   ;;  %1763 = vst [vmem:[%s2351_s15 + $0xa0] sm:$0xff] %v1687_v61   ;;  %v897_v3 = vmul.f32 0.2, %v710_v0  ;;  %v1846_v4 = vpop.f32.mrb[14].mxu0  ;;  %v1878_v5 = vpop.f32.mrb[14].mxu1  ;;  %v931_v6 = vsel %vm803_vm8, %v1845_v58, %v867_v62 }
 0x165   : > { %vm801_vm10 = vcmp.gt.f32.partialorder %v582_v63, 0.0  ;;  %vm804_vm11 = vcmp.gt.f32.partialorder %v1846_v4, 0.0  ;;  %v868_v7 = vmul.f32 0.2, %v1846_v4  ;;  %v585_v8 = vpop.f32.mrb[15].mxu0  ;;  %v713_v9 = vpop.f32.mrb[15].mxu1  ;;  %v963_v14 = vsel %vm835_vm9, %v1877_v59, %v899_v1 }
 0x166   : > { %vm833_vm12 = vcmp.gt.f32.partialorder %v710_v0, 0.0  ;;  %vm836_vm13 = vcmp.gt.f32.partialorder %v1878_v5, 0.0  ;;  %v900_v10 = vmul.f32 0.2, %v1878_v5  ;;  %vm802_vm14 = vcmp.gt.f32.partialorder %v585_v8, 0.0 }
 0x167   : > { %v932_v11 = vsel %vm804_vm11, %v1846_v4, %v868_v7  ;;  %v866_v12 = vmul.f32 0.2, %v585_v8  ;;  %vm834_vm15 = vcmp.gt.f32.partialorder %v713_v9, 0.0  ;;  %v898_v13 = vmul.f32 0.2, %v713_v9 }
 0x168   : > { %v929_v15 = vsel %vm801_vm10, %v582_v63, %v865_v2  ;;  %v1622_v16 = vpack.c.bf16 %v932_v11, %v931_v6  ;;  %v964_v17 = vsel %vm836_vm13, %v1878_v5, %v900_v10  ;;  %v961_v18 = vsel %vm833_vm12, %v710_v0, %v897_v3 }
 0x169   : > { %v1702_v19 = vpack.c.bf16 %v964_v17, %v963_v14  ;;  %v930_v20 = vsel %vm802_vm14, %v585_v8, %v866_v12  ;;  %v962_v21 = vsel %vm834_vm15, %v713_v9, %v898_v13  ;;  %v1849_v22 = vpop.f32.mrb[16].mxu0  ;;  %v1881_v23 = vpop.f32.mrb[16].mxu1 }
 0x16a   : > { %1750 = vst [vmem:[%s2351_s15 + $0x38] sm:$0xff] %v1622_v16   ;;  %v1617_v24 = vpack.c.bf16 %v930_v20, %v929_v15  ;;  %v1697_v25 = vpack.c.bf16 %v962_v21, %v961_v18  ;;  %vm807_vm0 = vcmp.gt.f32.partialorder %v1849_v22, 0.0  ;;  %v871_v26 = vmul.f32 0.2, %v1849_v22  ;;  %v598_v27 = vpop.f32.mrb[17].mxu0  ;;  %v726_v28 = vpop.f32.mrb[17].mxu1 }
 0x16b   : > { %1766 = vst [vmem:[%s2351_s15 + $0xb8] sm:$0xff] %v1702_v19   ;;  %vm839_vm1 = vcmp.gt.f32.partialorder %v1881_v23, 0.0  ;;  %v903_v29 = vmul.f32 0.2, %v1881_v23  ;;  %v869_v30 = vmul.f32 0.2, %v598_v27 }
 0x16c   : > { %1749 = vst [vmem:[%s2351_s15 + $0x30] sm:$0xff] %v1617_v24   ;;  %1765 = vst [vmem:[%s2351_s15 + $0xb0] sm:$0xff] %v1697_v25   ;;  %v901_v31 = vmul.f32 0.2, %v726_v28  ;;  %v1850_v32 = vpop.f32.mrb[18].mxu0  ;;  %v1882_v33 = vpop.f32.mrb[18].mxu1  ;;  %v935_v34 = vsel %vm807_vm0, %v1849_v22, %v871_v26 }
 0x16d   : > { %vm805_vm2 = vcmp.gt.f32.partialorder %v598_v27, 0.0  ;;  %vm808_vm3 = vcmp.gt.f32.partialorder %v1850_v32, 0.0  ;;  %v872_v35 = vmul.f32 0.2, %v1850_v32  ;;  %v601_v36 = vpop.f32.mrb[19].mxu0  ;;  %v729_v37 = vpop.f32.mrb[19].mxu1  ;;  %v967_v42 = vsel %vm839_vm1, %v1881_v23, %v903_v29 }
 0x16e   : > { %vm837_vm4 = vcmp.gt.f32.partialorder %v726_v28, 0.0  ;;  %vm840_vm5 = vcmp.gt.f32.partialorder %v1882_v33, 0.0  ;;  %v904_v38 = vmul.f32 0.2, %v1882_v33  ;;  %vm806_vm6 = vcmp.gt.f32.partialorder %v601_v36, 0.0 }
 0x16f   : > { %v936_v39 = vsel %vm808_vm3, %v1850_v32, %v872_v35  ;;  %v870_v40 = vmul.f32 0.2, %v601_v36  ;;  %vm838_vm7 = vcmp.gt.f32.partialorder %v729_v37, 0.0  ;;  %v902_v41 = vmul.f32 0.2, %v729_v37 }
 0x170   : > { %v933_v43 = vsel %vm805_vm2, %v598_v27, %v869_v30  ;;  %v1632_v44 = vpack.c.bf16 %v936_v39, %v935_v34  ;;  %v968_v45 = vsel %vm840_vm5, %v1882_v33, %v904_v38  ;;  %v965_v46 = vsel %vm837_vm4, %v726_v28, %v901_v31 }
 0x171   : > { %v1712_v47 = vpack.c.bf16 %v968_v45, %v967_v42  ;;  %v934_v48 = vsel %vm806_vm6, %v601_v36, %v870_v40  ;;  %v966_v49 = vsel %vm838_vm7, %v729_v37, %v902_v41  ;;  %v1853_v50 = vpop.f32.mrb[20].mxu0  ;;  %v1885_v51 = vpop.f32.mrb[20].mxu1 }
 0x172   : > { %1752 = vst [vmem:[%s2351_s15 + $0x48] sm:$0xff] %v1632_v44   ;;  %v1627_v52 = vpack.c.bf16 %v934_v48, %v933_v43  ;;  %v1707_v53 = vpack.c.bf16 %v966_v49, %v965_v46  ;;  %vm811_vm8 = vcmp.gt.f32.partialorder %v1853_v50, 0.0  ;;  %v875_v54 = vmul.f32 0.2, %v1853_v50  ;;  %v614_v55 = vpop.f32.mrb[21].mxu0  ;;  %v742_v56 = vpop.f32.mrb[21].mxu1 }
 0x173   : > { %1768 = vst [vmem:[%s2351_s15 + $0xc8] sm:$0xff] %v1712_v47   ;;  %vm843_vm9 = vcmp.gt.f32.partialorder %v1885_v51, 0.0  ;;  %v907_v57 = vmul.f32 0.2, %v1885_v51  ;;  %v873_v58 = vmul.f32 0.2, %v614_v55 }
 0x174   : > { %1751 = vst [vmem:[%s2351_s15 + $0x40] sm:$0xff] %v1627_v52   ;;  %1767 = vst [vmem:[%s2351_s15 + $0xc0] sm:$0xff] %v1707_v53   ;;  %v905_v59 = vmul.f32 0.2, %v742_v56  ;;  %v1854_v60 = vpop.f32.mrb[22].mxu0  ;;  %v1886_v61 = vpop.f32.mrb[22].mxu1  ;;  %v939_v62 = vsel %vm811_vm8, %v1853_v50, %v875_v54 }
 0x175   : > { %vm809_vm10 = vcmp.gt.f32.partialorder %v614_v55, 0.0  ;;  %vm812_vm11 = vcmp.gt.f32.partialorder %v1854_v60, 0.0  ;;  %v876_v63 = vmul.f32 0.2, %v1854_v60  ;;  %v617_v0 = vpop.f32.mrb[23].mxu0  ;;  %v745_v1 = vpop.f32.mrb[23].mxu1  ;;  %v971_v6 = vsel %vm843_vm9, %v1885_v51, %v907_v57 }
 0x176   : > { %vm841_vm12 = vcmp.gt.f32.partialorder %v742_v56, 0.0  ;;  %vm844_vm13 = vcmp.gt.f32.partialorder %v1886_v61, 0.0  ;;  %v908_v2 = vmul.f32 0.2, %v1886_v61  ;;  %vm810_vm14 = vcmp.gt.f32.partialorder %v617_v0, 0.0 }
 0x177   : > { %v940_v3 = vsel %vm812_vm11, %v1854_v60, %v876_v63  ;;  %v874_v4 = vmul.f32 0.2, %v617_v0  ;;  %vm842_vm15 = vcmp.gt.f32.partialorder %v745_v1, 0.0  ;;  %v906_v5 = vmul.f32 0.2, %v745_v1 }
 0x178   : > { %v937_v7 = vsel %vm809_vm10, %v614_v55, %v873_v58  ;;  %v1642_v8 = vpack.c.bf16 %v940_v3, %v939_v62  ;;  %v972_v9 = vsel %vm844_vm13, %v1886_v61, %v908_v2  ;;  %v969_v10 = vsel %vm841_vm12, %v742_v56, %v905_v59 }
 0x179   : > { %v1722_v11 = vpack.c.bf16 %v972_v9, %v971_v6  ;;  %v938_v12 = vsel %vm810_vm14, %v617_v0, %v874_v4  ;;  %v970_v13 = vsel %vm842_vm15, %v745_v1, %v906_v5  ;;  %v1857_v14 = vpop.f32.mrb[24].mxu0  ;;  %v1889_v15 = vpop.f32.mrb[24].mxu1 }
 0x17a   : > { %1754 = vst [vmem:[%s2351_s15 + $0x58] sm:$0xff] %v1642_v8   ;;  %v1637_v16 = vpack.c.bf16 %v938_v12, %v937_v7  ;;  %v1717_v17 = vpack.c.bf16 %v970_v13, %v969_v10  ;;  %vm815_vm0 = vcmp.gt.f32.partialorder %v1857_v14, 0.0  ;;  %v879_v18 = vmul.f32 0.2, %v1857_v14  ;;  %v630_v19 = vpop.f32.mrb[25].mxu0  ;;  %v758_v20 = vpop.f32.mrb[25].mxu1 }
 0x17b   : > { %1770 = vst [vmem:[%s2351_s15 + $0xd8] sm:$0xff] %v1722_v11   ;;  %vm847_vm1 = vcmp.gt.f32.partialorder %v1889_v15, 0.0  ;;  %v911_v21 = vmul.f32 0.2, %v1889_v15  ;;  %v877_v22 = vmul.f32 0.2, %v630_v19 }
 0x17c   : > { %1753 = vst [vmem:[%s2351_s15 + $0x50] sm:$0xff] %v1637_v16   ;;  %1769 = vst [vmem:[%s2351_s15 + $0xd0] sm:$0xff] %v1717_v17   ;;  %v909_v23 = vmul.f32 0.2, %v758_v20  ;;  %v1858_v24 = vpop.f32.mrb[26].mxu0  ;;  %v1890_v25 = vpop.f32.mrb[26].mxu1  ;;  %v943_v26 = vsel %vm815_vm0, %v1857_v14, %v879_v18 }
 0x17d   : > { %vm813_vm2 = vcmp.gt.f32.partialorder %v630_v19, 0.0  ;;  %vm816_vm3 = vcmp.gt.f32.partialorder %v1858_v24, 0.0  ;;  %v880_v27 = vmul.f32 0.2, %v1858_v24  ;;  %v633_v28 = vpop.f32.mrb[27].mxu0  ;;  %v761_v29 = vpop.f32.mrb[27].mxu1  ;;  %v975_v34 = vsel %vm847_vm1, %v1889_v15, %v911_v21 }
 0x17e   : > { %vm845_vm4 = vcmp.gt.f32.partialorder %v758_v20, 0.0  ;;  %vm848_vm5 = vcmp.gt.f32.partialorder %v1890_v25, 0.0  ;;  %v912_v30 = vmul.f32 0.2, %v1890_v25  ;;  %vm814_vm6 = vcmp.gt.f32.partialorder %v633_v28, 0.0 }
 0x17f   : > { %v944_v31 = vsel %vm816_vm3, %v1858_v24, %v880_v27  ;;  %v878_v32 = vmul.f32 0.2, %v633_v28  ;;  %vm846_vm7 = vcmp.gt.f32.partialorder %v761_v29, 0.0  ;;  %v910_v33 = vmul.f32 0.2, %v761_v29 }
 0x180   : > { %v941_v35 = vsel %vm813_vm2, %v630_v19, %v877_v22  ;;  %v1652_v36 = vpack.c.bf16 %v944_v31, %v943_v26  ;;  %v976_v37 = vsel %vm848_vm5, %v1890_v25, %v912_v30  ;;  %v973_v38 = vsel %vm845_vm4, %v758_v20, %v909_v23 }
 0x181   : > { %v1732_v39 = vpack.c.bf16 %v976_v37, %v975_v34  ;;  %v942_v40 = vsel %vm814_vm6, %v633_v28, %v878_v32  ;;  %v974_v41 = vsel %vm846_vm7, %v761_v29, %v910_v33  ;;  %v1861_v42 = vpop.f32.mrb[28].mxu0  ;;  %v1893_v43 = vpop.f32.mrb[28].mxu1 }
 0x182   : > { %1756 = vst [vmem:[%s2351_s15 + $0x68] sm:$0xff] %v1652_v36   ;;  %v1647_v44 = vpack.c.bf16 %v942_v40, %v941_v35  ;;  %v1727_v45 = vpack.c.bf16 %v974_v41, %v973_v38  ;;  %vm819_vm8 = vcmp.gt.f32.partialorder %v1861_v42, 0.0  ;;  %v883_v46 = vmul.f32 0.2, %v1861_v42  ;;  %v646_v47 = vpop.f32.mrb[29].mxu0  ;;  %v774_v48 = vpop.f32.mrb[29].mxu1 }
 0x183   : > { %1772 = vst [vmem:[%s2351_s15 + $0xe8] sm:$0xff] %v1732_v39   ;;  %vm851_vm9 = vcmp.gt.f32.partialorder %v1893_v43, 0.0  ;;  %v915_v49 = vmul.f32 0.2, %v1893_v43  ;;  %v881_v50 = vmul.f32 0.2, %v646_v47 }
 0x184   : > { %1755 = vst [vmem:[%s2351_s15 + $0x60] sm:$0xff] %v1647_v44   ;;  %1771 = vst [vmem:[%s2351_s15 + $0xe0] sm:$0xff] %v1727_v45   ;;  %v913_v51 = vmul.f32 0.2, %v774_v48  ;;  %v1862_v52 = vpop.f32.mrb[30].mxu0  ;;  %v1894_v53 = vpop.f32.mrb[30].mxu1  ;;  %v947_v54 = vsel %vm819_vm8, %v1861_v42, %v883_v46 }
 0x185   : > { %vm817_vm10 = vcmp.gt.f32.partialorder %v646_v47, 0.0  ;;  %vm820_vm11 = vcmp.gt.f32.partialorder %v1862_v52, 0.0  ;;  %v884_v55 = vmul.f32 0.2, %v1862_v52  ;;  %v649_v56 = vpop.f32.mrb[31].mxu0  ;;  %v777_v57 = vpop.f32.mrb[31].mxu1  ;;  %v979_v62 = vsel %vm851_vm9, %v1893_v43, %v915_v49 }
 0x186   : > { %vm849_vm12 = vcmp.gt.f32.partialorder %v774_v48, 0.0  ;;  %vm852_vm13 = vcmp.gt.f32.partialorder %v1894_v53, 0.0  ;;  %v916_v58 = vmul.f32 0.2, %v1894_v53  ;;  %vm818_vm14 = vcmp.gt.f32.partialorder %v649_v56, 0.0 }
 0x187   : > { %v948_v59 = vsel %vm820_vm11, %v1862_v52, %v884_v55  ;;  %v882_v60 = vmul.f32 0.2, %v649_v56  ;;  %vm850_vm15 = vcmp.gt.f32.partialorder %v777_v57, 0.0  ;;  %v914_v61 = vmul.f32 0.2, %v777_v57 }
 0x188   : > { %v945_v63 = vsel %vm817_vm10, %v646_v47, %v881_v50  ;;  %v1662_v0 = vpack.c.bf16 %v948_v59, %v947_v54  ;;  %v980_v1 = vsel %vm852_vm13, %v1894_v53, %v916_v58  ;;  %v977_v2 = vsel %vm849_vm12, %v774_v48, %v913_v51 }
 0x189   : > { %v1742_v3 = vpack.c.bf16 %v980_v1, %v979_v62  ;;  %v946_v4 = vsel %vm818_vm14, %v649_v56, %v882_v60  ;;  %v978_v5 = vsel %vm850_vm15, %v777_v57, %v914_v61 }
 0x18a   : > { %1758 = vst [vmem:[%s2351_s15 + $0x78] sm:$0xff] %v1662_v0   ;;  %v1657_v6 = vpack.c.bf16 %v946_v4, %v945_v63  ;;  %v1737_v7 = vpack.c.bf16 %v978_v5, %v977_v2 }
 0x18b   : > { %1774 = vst [vmem:[%s2351_s15 + $0xf8] sm:$0xff] %v1742_v3  }
 0x18c   : > { %1757 = vst [vmem:[%s2351_s15 + $0x70] sm:$0xff] %v1657_v6   ;;  %1773 = vst [vmem:[%s2351_s15 + $0xf0] sm:$0xff] %v1737_v7  }
 0x18d   : > { %2083 = shalt.err (!%p2080_p7)
}
 0x18e   : > { %s2084_s20 = scalar_lea.hbm %s2395_s22, 4096  ;;  %s2088_s25 = scalar_lea.hbm %s2446_s2, 16384 }
 0x18f   : > { %p2085_p9 = scmp.ne.s32.totalorder %s2395_s22, %s2084_s20  ;;  %p2089_p5 = scmp.lt.u32.totalorder %s2395_s22, %s2446_s2 }
 0x190   : > { %p2090_p10 = scmp.lt.u32.totalorder %s2088_s25, %s2084_s20  ;;  %p2092_p4 = scmp.lt.u32.totalorder %s2084_s20, %s2395_s22 }
 0x191   : > { %p2086_p1 = pnand %p2085_p9, %p2250_p12 }
 0x192   : > { %p2091_p2 = por %p2090_p10, %p2089_p5 }
 0x193   : > { %p2087_p0 = pneg %p2086_p1 }
 0x194   : > { %p2093_p6 = por %p2092_p4, %p2091_p2 }
 0x196   : > { %p2094_p8 = pnand %p2093_p6, %p2087_p0 }
 0x198   : > { %2097 = shalt.err (!%p2094_p8)
}
 0x199   : > { %s2147_s30 = smov 64   ;;  %s2148_s23 = smov 4  }
 0x19a   : > { %1917 = dma.vmem_to_hbm [thread:$0]  (%p2250_p12), %s2397_s4, 4096, %s2395_s22, %s1302_s28, %s2147_s30, %s2147_s30, %s2148_s23  }
 0x19b PF: > { %p1934_p11 = scmp.ge.s32.totalorder %s2140_s12, 2  ;;  %s1330_s15 = sand.u32 1, %s2128_s9  }
 0x19c   : > { %p2461_p13 = scmp.ne.s32.totalorder %s2451_s16, 0  ;;  %s1331_s17 = scalar_lea.sflag [#allocation4], %s1330_s15 }
 0x19e   : > { %p1928_p3 = pnand %p1934_p11, %p2461_p13 }
 0x1a0   : > { %2123 = dma.done.wait (!%p1928_p3), %s1331_s17, 4096  }
 0x1a1   : > { %2125 = vsyncadd (!%p1928_p3), %s1331_s17, 4294963200  ;;  %p16_p7 = scmp.ge.s32.totalorder %s2217_s21, 6   ;;  %s2462_s9 = smov %s2132_s10 }
 0x1a2   : > { %s2463_s10 = smov %s2136_s11  ;;  %s2464_s11 = smov %s2246_s8 }
 0x1a3   : > { %s2465_s12 = smov %s2217_s21  ;;  %18 = sbr.rel (!%p16_p7) target bundleno = 6 (0x6), region = 77 }
 0x1aa   :  { %1336 = vsyncpa [#allocation3], 1 }
 0x1ab   :  { %1338 = vsyncpa [#allocation3 + $0x1], 1 }
 0x1ac   :  { %1339 = vsyncpa [#allocation6], 1 }
 0x1ad   :  { %1340 = vsyncpa [#allocation4], 1 }
 0x1ae   :  { %1342 = vsyncpa [#allocation4 + $0x1], 1 }

// kernel: discriminator_forward.6
= control target key start
LH: loop header
LB: loop body
LE: loop exit
PB: predicated region body
PF: predicated region fallthrough
CT: control target
= control target key end

     0   :  { %10 = vsyncpa [#allocation3], 0  ;;  %s2084_s0 = inlined_call_operand.hbm [shape: bf16[512,128], index: 0, kind: input, shape index: {}]   ;;  %s2085_s1 = inlined_call_operand.hbm [shape: bf16[128,128], index: 1, kind: input, shape index: {}]   ;;  %s2086_s2 = inlined_call_operand.hbm [shape: bf16[512,128], index: 2, kind: output, shape index: {0}]   ;;  %s2087_s3 = inlined_call_operand.hbm [shape: f32[16,128], index: 3, kind: output, shape index: {1}]   ;;  %s2088_s4 = inlined_call_operand.hbm [shape: f32[16,128], index: 4, kind: output, shape index: {2}]  }
   0x1   :  { %12 = vsyncpa [#allocation3 + $0x1], 0 }
   0x2   :  { %13 = vsyncpa [#allocation6], 0 }
   0x3   :  { %14 = vsyncpa [#allocation4], 0 }
   0x4   :  { %16 = vsyncpa [#allocation4 + $0x1], 0 }
   0x5   :  { %17 = vsyncpa [#allocation9], 0 }
   0x6   :  { %19 = vsyncpa [#allocation9 + $0x1], 0  ;;  %s1669_s15 = smov 0   ;;  %s1671_s16 = smov 0  }
   0x7   :  { %s1673_s17 = smov 0   ;;  %s1675_s18 = smov 0  }
   0x8 LB: > { %s1690_s19 = sadd.s32 4294967295, %s1633_s18   ;;  %s1055_s20 = sadd.s32 4294967294, %s1633_s18   ;;  %s1633_s18 = sphi %s1675_s18, %s2108_s18   ;;  %s1629_s17 = sphi %s1673_s17, %s2107_s17   ;;  %s1625_s16 = sphi %s1671_s16, %s2106_s16   ;;  %s1621_s15 = sphi %s1669_s15, %s2105_s15  }
   0x9   : > { %p45_p0 = scmp.ne.s32.totalorder %s1625_s16, %s1621_s15  ;;  %p2089_p1 = scmp.eq.s32.totalorder %s1690_s19, 0 }
   0xa   : > { %p96_p3 = scmp.eq.s32.totalorder %s1055_s20, 1  ;;  %p1056_p5 = scmp.ge.s32.totalorder %s1633_s18, 1 }
   0xb   : > { %p1701_p4 = por %p2089_p1, %p45_p0  ;;  %p155_p7 = scmp.lt.s32.totalorder %s1633_s18, 3 }
   0xc   : > { %p1706_p6 = por %p96_p3, %p45_p0  ;;  %s1635_s24 = smov [#allocation5]  }
   0xd   : > { %s2092_s21 = scalar_select %p1701_p4, 1, 0 }
   0xe   : > { %s2093_s22 = scalar_select %p1706_p6, 1, 0 }
   0xf   : > { %p1711_p8 = pnand %p1056_p5, %p155_p7  ;;  %s167_s25 = sshll.u32 %s1635_s24, 4  ;;  %s1715_s25 = int_to_ptr.vmem [resolvable:$true] %s167_s25 }
  0x10   : > { %s1727_s27 = sadd.s32 1, %s1633_s18   ;;  %s32_s28 = sadd.s32 1, %s1629_s17 }
  0x11   : > { %s2094_s23 = scalar_select %p1711_p8, 1, 0 }
  0x12   : > { %p1362_p9 = pneg %p1711_p8  ;;  %s29_s29 = ssub.s32 %s1633_s18, %s1727_s27 }
  0x13   : > { %s1445_s6 = scalar_lea.hbm %s2085_s1, 1024 }
  0x14   : > { %p1722_p11 = pnand %p1362_p9, %p2089_p1  ;;  %p1446_p12 = scmp.ne.s32.totalorder %s2085_s1, %s1445_s6 }
  0x15   : > { %p1452_p5 = scmp.lt.u32.totalorder %s1445_s6, %s2085_s1 }
  0x16   : > { %p1447_p13 = pneg %p1722_p11 }
  0x18   : > { %p1448_p0 = pnand %p1447_p13, %p1446_p12 }
  0x1a   : > { %p1449_p3 = pneg %p1448_p0 }
  0x1c   : > { %p1454_p7 = pnand %p1452_p5, %p1449_p3 }
  0x1e   : > { %1457 = shalt.err (!%p1454_p7)
}
  0x1f   : > { %s1458_s11 = scalar_lea.vmem %s1715_s25, 1024  ;;  %p1466_p2 = scmp.lt.s32.totalorder %s1715_s25, %s1715_s25 }
  0x20   : > { %p1459_p9 = scmp.ne.s32.totalorder %s1715_s25, %s1458_s11  ;;  %p1467_p6 = scmp.lt.s32.totalorder %s1458_s11, %s1458_s11 }
  0x22   : > { %p1461_p10 = pnand %p1459_p9, %p1447_p13  ;;  %p1468_p4 = por %p1467_p6, %p1466_p2 }
  0x24   : > { %p1462_p1 = pneg %p1461_p10 }
  0x26   : > { %p1469_p8 = pnand %p1468_p4, %p1462_p1 }
  0x28   : > { %1472 = shalt.err (!%p1469_p8)
}
  0x29   : > { %s1636_s12 = smov 64   ;;  %s1637_s13 = smov 4  }
  0x2a   : > { %1365 = dma.hbm_to_vmem [thread:$0]  (!%p1722_p11), %s2085_s1, 1024, %s1715_s25, [#allocation6], %s1636_s12, %s1636_s12, %s1637_s13  }
  0x2b   : > { %p30_p1 = scmp.eq.s32.totalorder %s29_s29, 0  ;;  %p39_p2 = scmp.ne.s32.totalorder %s1629_s17, %s1625_s16 }
  0x2c   : > { %p40_p4 = scmp.eq.s32.totalorder %s1633_s18, 0  ;;  %p1381_p6 = scmp.lt.s32.totalorder %s1633_s18, 2 }
  0x2d   : > { %s1761_s30 = scalar_select %p30_p1, %s1629_s17, %s32_s28  }
  0x2e   : > { %p41_p8 = por %p40_p4, %p39_p2  ;;  %p2096_p10 = scmp.eq.s32.totalorder %s1690_s19, 1 }
  0x2f   : > { %s181_s26 = sand.u32 1, %s1629_s17   ;;  %s1133_s6 = sshll.u32 %s1633_s18, 11 }
  0x30   : > { %p1765_p12 = por %p2096_p10, %p39_p2  ;;  %s1059_s7 = sshll.u32 %s181_s26, 7 }
  0x31   : > { %s1774_s10 = scalar_lea.hbm %s2084_s0, %s1133_s6  ;;  %s185_s25 = scalar_lea.vmem [#allocation2], %s1059_s7 }
  0x32   : > { %s192_s28 = sshll.u32 %s185_s25, 4  ;;  %p1776_p11 = pnand %p1381_p6, %p41_p8  ;;  %s1780_s28 = int_to_ptr.vmem [resolvable:$true] %s192_s28 }
  0x33   : > { %s1782_s11 = scalar_lea.sflag [#allocation3], %s181_s26  ;;  %s1473_s14 = scalar_lea.hbm %s1774_s10, 2048 }
  0x34   : > { %p1474_p13 = scmp.ne.s32.totalorder %s1774_s10, %s1473_s14  ;;  %p1475_p0 = pneg %p1776_p11 }
  0x35   : > { %s1478_s7 = scalar_lea.hbm %s2084_s0, 4096  ;;  %p1479_p7 = scmp.lt.u32.totalorder %s1774_s10, %s2084_s0 }
  0x36   : > { %p1476_p3 = pnand %p1475_p0, %p1474_p13  ;;  %p1480_p9 = scmp.lt.u32.totalorder %s1478_s7, %s1473_s14 }
  0x37   : > { %p1482_p2 = scmp.lt.u32.totalorder %s1473_s14, %s1774_s10 }
  0x38   : > { %p1477_p5 = pneg %p1476_p3  ;;  %p1481_p1 = por %p1480_p9, %p1479_p7 }
  0x3a   : > { %p1483_p4 = por %p1482_p2, %p1481_p1 }
  0x3c   : > { %p1484_p6 = pnand %p1483_p4, %p1477_p5 }
  0x3e   : > { %1487 = shalt.err (!%p1484_p6)
}
  0x3f   : > { %s1488_s26 = scalar_lea.vmem %s1780_s28, 2048  ;;  %s1638_s25 = smov [#allocation2]  }
  0x40   : > { %p1489_p8 = scmp.ne.s32.totalorder %s1780_s28, %s1488_s26  ;;  %s1493_s24 = sshll.u32 %s1638_s25, 4  ;;  %s1494_s24 = int_to_ptr.vmem [resolvable:$false] %s1493_s24 }
  0x41   : > { %s1495_s6 = scalar_lea.vmem %s1494_s24, 4096  ;;  %p1496_p3 = scmp.lt.s32.totalorder %s1780_s28, %s1494_s24 }
  0x42   : > { %p1491_p10 = pnand %p1489_p8, %p1475_p0  ;;  %p1497_p7 = scmp.lt.s32.totalorder %s1495_s6, %s1488_s26 }
  0x44   : > { %p1492_p13 = pneg %p1491_p10  ;;  %p1498_p9 = por %p1497_p7, %p1496_p3 }
  0x46   : > { %p1499_p1 = pnand %p1498_p9, %p1492_p13 }
  0x48   : > { %1502 = shalt.err (!%p1499_p1)
}
  0x49   : > { %1369 = dma.hbm_to_vmem [thread:$0]  (!%p1776_p11), %s1774_s10, 2048, %s1780_s28, %s1782_s11, %s1636_s12, %s1636_s12, %s1637_s13  }
  0x4a   : > { %p2099_p0 = scmp.ne.s32.totalorder %s2094_s23, 0 }
  0x4b   : > { %s1816_s14 = sand.u32 (!%p2099_p0), 1, %s1625_s16   ;;  %p2100_p5 = scmp.ne.s32.totalorder (!%p2099_p0), %s2092_s21, 0 }
  0x4c   : > { %204 = sbr.rel (%p2099_p0) target bundleno = 444 (0x1bc), region = 28  ;;  %s1063_s7 = sshll.u32 (!%p2099_p0), %s1816_s14, 7 }
  0x4d   : > { %s207_s8 = scalar_lea.sflag (!%p2099_p0), [#allocation3], %s1816_s14  ;;  %s1822_s29 = scalar_lea.vmem (!%p2099_p0), [#allocation2], %s1063_s7 }
  0x53   : > { %1604 = dma.done.wait (%p2100_p5), %s207_s8, 2048  }
  0x54   : > { %1606 = vsyncadd (%p2100_p5), %s207_s8, 4294965248  ;;  %p2101_p11 = scmp.eq.s32.totalorder %s1690_s19, 0 }
  0x56   : > { %1608 = dma.done.wait (%p2101_p11), [#allocation6], 1024   ;;  %p2102_p2 = pmov %p2101_p11 }
  0x57   : > { %v1421_v0 = vld [vmem:[#allocation5] sm:$0xff]   ;;  %v1422_v1 = vld [vmem:[#allocation5 + $0x8] sm:$0xff]   ;;  %v1423_v2 = vld [vmem:[#allocation5 + $0x10] sm:$0xff]   ;;  %s1862_s21 = scalar_lea.vmem [#allocation7], %s1063_s7  ;;  %s1166_s23 = sshll.u32 %s1690_s19, 11 }
  0x58   : > { %1610 = vsyncadd (%p2102_p2), [#allocation6], 4294966272  ;;  %1286 = vmatprep.subr.bf16.mxu0 %v1421_v0  ;;  %1334 = vmatprep.subr.bf16.mxu1 %v1421_v0  ;;  %v1424_v3 = vld [vmem:[#allocation5 + $0x18] sm:$0xff]   ;;  %v1429_v4 = vld [vmem:[%s1822_s29] sm:$0xff]   ;;  %s885_s12 = sshll.u32 %s1862_s21, 4  ;;  %s1915_s28 = scalar_lea.hbm %s2086_s2, %s1166_s23  ;;  %s1917_s12 = int_to_ptr.vmem [resolvable:$true] %s885_s12 }
  0x59   : > { %1287 = vmatpush3.bf16.msra.mxu0 %v1421_v0  ;;  %1342 = vmatpush3.bf16.msra.mxu1 %v1421_v0  ;;  %v1425_v5 = vld [vmem:[#allocation5 + $0x20] sm:$0xff]   ;;  %v1426_v6 = vld [vmem:[#allocation5 + $0x28] sm:$0xff]   ;;  %v1427_v8 = vld [vmem:[#allocation5 + $0x30] sm:$0xff]   ;;  %s862_s11 = scalar_lea.sflag [#allocation4], %s1816_s14  ;;  %s1503_s9 = scalar_lea.vmem %s1917_s12, 2048 }
  0x5a   : > { %1288 = vmatprep.subr.bf16.mxu0 %v1422_v1  ;;  %1335 = vmatprep.subr.bf16.mxu1 %v1422_v1  ;;  %v1437_v7 = vld [vmem:[%s1822_s29 + $0x40] sm:$0xff]   ;;  %v1428_v9 = vld [vmem:[#allocation5 + $0x38] sm:$0xff]   ;;  %v1430_v10 = vld [vmem:[%s1822_s29 + $0x8] sm:$0xff]   ;;  %p1504_p4 = scmp.ne.s32.totalorder %s1917_s12, %s1503_s9  ;;  %s1639_s26 = smov [#allocation7]  }
  0x5b   : > { %1302 = vmatprep.mubr.bf16.mxu0 %v1429_v4  ;;  %1318 = vmatprep.mubr.bf16.mxu1 %v1437_v7  ;;  %v1438_v11 = vld [vmem:[%s1822_s29 + $0x48] sm:$0xff]   ;;  %v1431_v12 = vld [vmem:[%s1822_s29 + $0x10] sm:$0xff]   ;;  %v1432_v14 = vld [vmem:[%s1822_s29 + $0x18] sm:$0xff]   ;;  %s1507_s25 = sshll.u32 %s1639_s26, 4  ;;  %s1508_s25 = int_to_ptr.vmem [resolvable:$false] %s1507_s25 }
  0x5c   : > { %v1439_v13 = vld [vmem:[%s1822_s29 + $0x50] sm:$0xff]   ;;  %v1440_v15 = vld [vmem:[%s1822_s29 + $0x58] sm:$0xff]   ;;  %v1433_v16 = vld [vmem:[%s1822_s29 + $0x20] sm:$0xff]   ;;  %p1505_p6 = pnand %p1504_p4, %p1765_p12  ;;  %s1509_s24 = scalar_lea.vmem %s1508_s25, 4096 }
  0x5d   : > { %1289 = vmatpush3.bf16.msra.mxu0 %v1422_v1  ;;  %1343 = vmatpush3.bf16.msra.mxu1 %v1422_v1  ;;  %v1441_v17 = vld [vmem:[%s1822_s29 + $0x60] sm:$0xff]   ;;  %v1434_v18 = vld [vmem:[%s1822_s29 + $0x28] sm:$0xff]   ;;  %v1435_v20 = vld [vmem:[%s1822_s29 + $0x30] sm:$0xff]   ;;  %p1510_p10 = scmp.lt.s32.totalorder %s1917_s12, %s1508_s25  ;;  %p1511_p13 = scmp.lt.s32.totalorder %s1509_s24, %s1503_s9 }
  0x5e   : > { %1290 = vmatprep.subr.bf16.mxu0 %v1423_v2  ;;  %1336 = vmatprep.subr.bf16.mxu1 %v1423_v2  ;;  %v1442_v19 = vld [vmem:[%s1822_s29 + $0x68] sm:$0xff]   ;;  %v1443_v21 = vld [vmem:[%s1822_s29 + $0x70] sm:$0xff]   ;;  %v1436_v22 = vld [vmem:[%s1822_s29 + $0x38] sm:$0xff]   ;;  %p1506_p8 = pneg %p1505_p6 }
  0x5f   : > { %v1444_v23 = vld [vmem:[%s1822_s29 + $0x78] sm:$0xff]   ;;  %p1512_p3 = por %p1511_p13, %p1510_p10 }
  0x61   : > { %1291 = vmatpush3.bf16.msra.mxu0 %v1423_v2  ;;  %1344 = vmatpush3.bf16.msra.mxu1 %v1423_v2  ;;  %p1513_p7 = pnand %p1512_p3, %p1506_p8 }
  0x62   : > { %1292 = vmatprep.subr.bf16.mxu0 %v1424_v3  ;;  %1337 = vmatprep.subr.bf16.mxu1 %v1424_v3 }
  0x65   : > { %1293 = vmatpush3.bf16.msra.mxu0 %v1424_v3  ;;  %1345 = vmatpush3.bf16.msra.mxu1 %v1424_v3 }
  0x66   : > { %1294 = vmatprep.subr.bf16.mxu0 %v1425_v5  ;;  %1338 = vmatprep.subr.bf16.mxu1 %v1425_v5 }
  0x69   : > { %1295 = vmatpush3.bf16.msra.mxu0 %v1425_v5  ;;  %1346 = vmatpush3.bf16.msra.mxu1 %v1425_v5 }
  0x6a   : > { %1296 = vmatprep.subr.bf16.mxu0 %v1426_v6  ;;  %1339 = vmatprep.subr.bf16.mxu1 %v1426_v6 }
  0x6d   : > { %1297 = vmatpush3.bf16.msra.mxu0 %v1426_v6  ;;  %1347 = vmatpush3.bf16.msra.mxu1 %v1426_v6 }
  0x6e   : > { %1298 = vmatprep.subr.bf16.mxu0 %v1427_v8  ;;  %1340 = vmatprep.subr.bf16.mxu1 %v1427_v8 }
  0x71   : > { %1299 = vmatpush3.bf16.msra.mxu0 %v1427_v8  ;;  %1348 = vmatpush3.bf16.msra.mxu1 %v1427_v8 }
  0x72   : > { %1300 = vmatprep.subr.bf16.mxu0 %v1428_v9  ;;  %1341 = vmatprep.subr.bf16.mxu1 %v1428_v9 }
  0x75   : > { %1301 = vmatpush3.bf16.msra.mxu0 %v1428_v9  ;;  %1349 = vmatpush3.bf16.msra.mxu1 %v1428_v9 }
  0x78   : > { %1303 = vmatmul.mubr.bf16.vlgmr.msra.gmra.mrb[0].mxu0 %v1430_v10  ;;  %1319 = vmatmul.mubr.bf16.vlgmr.msra.gmra.mrb[0].mxu1 %v1438_v11 }
  0x79   : > { %1306 = vmatprep.mubr.bf16.mxu0 %v1431_v12  ;;  %1322 = vmatprep.mubr.bf16.mxu1 %v1439_v13 }
  0x80   : > { %1307 = vmatmul.mubr.bf16.gmra.mrb[4].mxu0 %v1432_v14  ;;  %1323 = vmatmul.mubr.bf16.gmra.mrb[4].mxu1 %v1440_v15 }
  0x81   : > { %1310 = vmatprep.mubr.bf16.mxu0 %v1433_v16  ;;  %1326 = vmatprep.mubr.bf16.mxu1 %v1441_v17 }
  0x88   : > { %1311 = vmatmul.mubr.bf16.gmra.mrb[8].mxu0 %v1434_v18  ;;  %1327 = vmatmul.mubr.bf16.gmra.mrb[8].mxu1 %v1442_v19 }
  0x89   : > { %1314 = vmatprep.mubr.bf16.mxu0 %v1435_v20  ;;  %1330 = vmatprep.mubr.bf16.mxu1 %v1443_v21 }
  0x90   : > { %1315 = vmatmul.mubr.bf16.gmra.mrb[12].mxu0 %v1436_v22  ;;  %1331 = vmatmul.mubr.bf16.gmra.mrb[12].mxu1 %v1444_v23 }
 0x14b   : > { %v1304_v24 = vpop.f32.mrb[0].mxu0  ;;  %v1848_v25 = vpop.f32.mrb[0].mxu1 }
 0x14c   : > { %v478_v26 = vpop.f32.mrb[1].mxu0  ;;  %v1850_v27 = vpop.f32.mrb[1].mxu1  ;;  %v799_v39 = vmul.f32 %v1304_v24, %v1304_v24 }
 0x14d   : > { %v1305_v28 = vpop.f32.mrb[2].mxu0  ;;  %v1852_v29 = vpop.f32.mrb[2].mxu1  ;;  %v797_v30 = vmul.f32 %v478_v26, %v478_v26 }
 0x14e   : > { %v1175_v31 = vpack.c.bf16 %v1305_v28, %v1304_v24  ;;  %v481_v32 = vpop.f32.mrb[3].mxu0  ;;  %v1215_v33 = vpack.c.bf16 %v1852_v29, %v1848_v25  ;;  %v1856_v34 = vpop.f32.mrb[3].mxu1  ;;  %v800_v42 = vmul.f32 %v1305_v28, %v1305_v28 }
 0x14f   : > { %v1170_v35 = vpack.c.bf16 %v481_v32, %v478_v26  ;;  %v765_v36 = vadd.f32 %v481_v32, %v478_v26  ;;  %v798_v37 = vmul.f32 %v481_v32, %v481_v32  ;;  %v1210_v38 = vpack.c.bf16 %v1856_v34, %v1850_v27 }
 0x150   : > { %1247 = vst [vmem:[%s1862_s21 + $0x8] sm:$0xff] %v1175_v31   ;;  %1255 = vst [vmem:[%s1862_s21 + $0x48] sm:$0xff] %v1215_v33  }
 0x151   : > { %1171 = vst [vmem:[%s1862_s21] sm:$0xff] %v1170_v35   ;;  %v766_v40 = vadd.f32 %v1304_v24, %v765_v36  ;;  %v829_v41 = vadd.f32 %v798_v37, %v797_v30  ;;  %1254 = vst [vmem:[%s1862_s21 + $0x40] sm:$0xff] %v1210_v38  }
 0x153   : > { %v830_v43 = vadd.f32 %v829_v41, %v799_v39  ;;  %v1308_v44 = vpop.f32.mrb[4].mxu0  ;;  %v767_v45 = vadd.f32 %v1305_v28, %v766_v40  ;;  %v1868_v46 = vpop.f32.mrb[4].mxu1 }
 0x154   : > { %v494_v47 = vpop.f32.mrb[5].mxu0  ;;  %v1870_v48 = vpop.f32.mrb[5].mxu1  ;;  %v803_v63 = vmul.f32 %v1308_v44, %v1308_v44 }
 0x155   : > { %v768_v49 = vadd.f32 %v767_v45, %v494_v47  ;;  %v801_v50 = vmul.f32 %v494_v47, %v494_v47  ;;  %v831_v51 = vadd.f32 %v830_v43, %v800_v42  ;;  %v1309_v52 = vpop.f32.mrb[6].mxu0  ;;  %v1872_v53 = vpop.f32.mrb[6].mxu1 }
 0x156   : > { %v1185_v54 = vpack.c.bf16 %v1309_v52, %v1308_v44  ;;  %v497_v55 = vpop.f32.mrb[7].mxu0  ;;  %v1225_v56 = vpack.c.bf16 %v1872_v53, %v1868_v46  ;;  %v1876_v57 = vpop.f32.mrb[7].mxu1  ;;  %v804_v2 = vmul.f32 %v1309_v52, %v1309_v52 }
 0x157   : > { %v832_v58 = vadd.f32 %v831_v51, %v801_v50  ;;  %v1180_v59 = vpack.c.bf16 %v497_v55, %v494_v47  ;;  %v769_v60 = vadd.f32 %v768_v49, %v497_v55  ;;  %v802_v61 = vmul.f32 %v497_v55, %v497_v55 }
 0x158   : > { %1249 = vst [vmem:[%s1862_s21 + $0x18] sm:$0xff] %v1185_v54   ;;  %1257 = vst [vmem:[%s1862_s21 + $0x58] sm:$0xff] %v1225_v56   ;;  %v1220_v62 = vpack.c.bf16 %v1876_v57, %v1870_v48 }
 0x159   : > { %1248 = vst [vmem:[%s1862_s21 + $0x10] sm:$0xff] %v1180_v59   ;;  %v770_v0 = vadd.f32 %v1308_v44, %v769_v60  ;;  %v833_v1 = vadd.f32 %v832_v58, %v802_v61  ;;  %v813_v61 = vmul.f32 %v1850_v27, %v1850_v27 }
 0x15a   : > { %1256 = vst [vmem:[%s1862_s21 + $0x50] sm:$0xff] %v1220_v62  }
 0x15b   : > { %v834_v3 = vadd.f32 %v833_v1, %v803_v63  ;;  %v1312_v4 = vpop.f32.mrb[8].mxu0  ;;  %v771_v5 = vadd.f32 %v1309_v52, %v770_v0  ;;  %v1884_v6 = vpop.f32.mrb[8].mxu1 }
 0x15c   : > { %v510_v7 = vpop.f32.mrb[9].mxu0  ;;  %v1886_v8 = vpop.f32.mrb[9].mxu1  ;;  %v807_v23 = vmul.f32 %v1312_v4, %v1312_v4 }
 0x15d   : > { %v772_v9 = vadd.f32 %v771_v5, %v510_v7  ;;  %v805_v10 = vmul.f32 %v510_v7, %v510_v7  ;;  %v835_v11 = vadd.f32 %v834_v3, %v804_v2  ;;  %v1313_v12 = vpop.f32.mrb[10].mxu0  ;;  %v1888_v13 = vpop.f32.mrb[10].mxu1 }
 0x15e   : > { %v1195_v14 = vpack.c.bf16 %v1313_v12, %v1312_v4  ;;  %v513_v15 = vpop.f32.mrb[11].mxu0  ;;  %v1235_v16 = vpack.c.bf16 %v1888_v13, %v1884_v6  ;;  %v1892_v17 = vpop.f32.mrb[11].mxu1  ;;  %v808_v28 = vmul.f32 %v1313_v12, %v1313_v12 }
 0x15f   : > { %v836_v18 = vadd.f32 %v835_v11, %v805_v10  ;;  %v1190_v19 = vpack.c.bf16 %v513_v15, %v510_v7  ;;  %v773_v20 = vadd.f32 %v772_v9, %v513_v15  ;;  %v806_v21 = vmul.f32 %v513_v15, %v513_v15 }
 0x160   : > { %1251 = vst [vmem:[%s1862_s21 + $0x28] sm:$0xff] %v1195_v14   ;;  %1259 = vst [vmem:[%s1862_s21 + $0x68] sm:$0xff] %v1235_v16   ;;  %v1230_v22 = vpack.c.bf16 %v1892_v17, %v1886_v8 }
 0x161   : > { %1250 = vst [vmem:[%s1862_s21 + $0x20] sm:$0xff] %v1190_v19   ;;  %v774_v24 = vadd.f32 %v1312_v4, %v773_v20  ;;  %v837_v26 = vadd.f32 %v836_v18, %v806_v21 }
 0x162   : > { %1258 = vst [vmem:[%s1862_s21 + $0x60] sm:$0xff] %v1230_v22  }
 0x163   : > { %v838_v30 = vadd.f32 %v837_v26, %v807_v23  ;;  %v1316_v31 = vpop.f32.mrb[12].mxu0  ;;  %v775_v32 = vadd.f32 %v1313_v12, %v774_v24  ;;  %v1900_v33 = vpop.f32.mrb[12].mxu1 }
 0x164   : > { %v526_v35 = vpop.f32.mrb[13].mxu0  ;;  %v1902_v36 = vpop.f32.mrb[13].mxu1  ;;  %v811_v54 = vmul.f32 %v1316_v31, %v1316_v31 }
 0x165   : > { %v776_v37 = vadd.f32 %v775_v32, %v526_v35  ;;  %v809_v38 = vmul.f32 %v526_v35, %v526_v35  ;;  %v839_v39 = vadd.f32 %v838_v30, %v808_v28  ;;  %v1317_v40 = vpop.f32.mrb[14].mxu0  ;;  %v1906_v41 = vpop.f32.mrb[14].mxu1 }
 0x166   : > { %v1205_v42 = vpack.c.bf16 %v1317_v40, %v1316_v31  ;;  %v529_v43 = vpop.f32.mrb[15].mxu0  ;;  %v1245_v44 = vpack.c.bf16 %v1906_v41, %v1900_v33  ;;  %v1910_v45 = vpop.f32.mrb[15].mxu1  ;;  %v812_v58 = vmul.f32 %v1317_v40, %v1317_v40 }
 0x167   : > { %v840_v47 = vadd.f32 %v839_v39, %v809_v38  ;;  %v1200_v49 = vpack.c.bf16 %v529_v43, %v526_v35  ;;  %v777_v50 = vadd.f32 %v776_v37, %v529_v43  ;;  %v810_v51 = vmul.f32 %v529_v43, %v529_v43 }
 0x168   : > { %1253 = vst [vmem:[%s1862_s21 + $0x38] sm:$0xff] %v1205_v42   ;;  %1261 = vst [vmem:[%s1862_s21 + $0x78] sm:$0xff] %v1245_v44   ;;  %v1240_v52 = vpack.c.bf16 %v1910_v45, %v1902_v36 }
 0x169   : > { %1252 = vst [vmem:[%s1862_s21 + $0x30] sm:$0xff] %v1200_v49   ;;  %v778_v55 = vadd.f32 %v1316_v31, %v777_v50  ;;  %v841_v56 = vadd.f32 %v840_v47, %v810_v51 }
 0x16a   : > { %1260 = vst [vmem:[%s1862_s21 + $0x70] sm:$0xff] %v1240_v52  }
 0x16b   : > { %v842_v59 = vadd.f32 %v841_v56, %v811_v54  ;;  %v779_v60 = vadd.f32 %v1317_v40, %v778_v55 }
 0x16c   : > { %1516 = shalt.err (!%p1513_p7)
}
 0x16d   : > { %s1517_s6 = scalar_lea.hbm %s1915_s28, 2048  ;;  %s1521_s29 = scalar_lea.hbm %s2086_s2, 4096 }
 0x16e   : > { %p1518_p9 = scmp.ne.s32.totalorder %s1915_s28, %s1517_s6  ;;  %p1522_p5 = scmp.lt.u32.totalorder %s1915_s28, %s2086_s2 }
 0x16f   : > { %p1523_p11 = scmp.lt.u32.totalorder %s1521_s29, %s1517_s6  ;;  %p1525_p4 = scmp.lt.u32.totalorder %s1517_s6, %s1915_s28 }
 0x170   : > { %p1519_p1 = pnand %p1518_p9, %p1765_p12 }
 0x171   : > { %p1524_p2 = por %p1523_p11, %p1522_p5 }
 0x172   : > { %p1520_p0 = pneg %p1519_p1 }
 0x173   : > { %p1526_p6 = por %p1525_p4, %p1524_p2 }
 0x175   : > { %p1527_p8 = pnand %p1526_p6, %p1520_p0 }
 0x177   : > { %1530 = shalt.err (!%p1527_p8)
}
 0x178   : > { %s1640_s13 = smov 64   ;;  %s1641_s10 = smov 4   ;;  %v780_v62 = vadd.f32 %v779_v60, %v1850_v27  ;;  %v843_v63 = vadd.f32 %v842_v59, %v812_v58  ;;  %v814_v2 = vmul.f32 %v1856_v34, %v1856_v34  ;;  %v815_v3 = vmul.f32 %v1848_v25, %v1848_v25 }
 0x179   : > { %1356 = dma.vmem_to_hbm [thread:$0]  (%p1765_p12), %s1917_s12, 2048, %s1915_s28, %s862_s11, %s1640_s13, %s1640_s13, %s1641_s10   ;;  %v816_v7 = vmul.f32 %v1852_v29, %v1852_v29  ;;  %v817_v27 = vmul.f32 %v1870_v48, %v1870_v48  ;;  %v818_v15 = vmul.f32 %v1876_v57, %v1876_v57  ;;  %v821_v20 = vmul.f32 %v1886_v8, %v1886_v8 }
 0x17a   : > { %v844_v0 = vadd.f32 %v843_v63, %v813_v61  ;;  %v781_v1 = vadd.f32 %v780_v62, %v1856_v34  ;;  %v823_v24 = vmul.f32 %v1884_v6, %v1884_v6  ;;  %s1066_s12 = sshll.u32 %s1816_s14, 3  ;;  %v824_v28 = vmul.f32 %v1888_v13, %v1888_v13  ;;  %s866_s28 = sand.u32 1, %s1690_s19  }
 0x17b   : > { %v825_v31 = vmul.f32 %v1902_v36, %v1902_v36  ;;  %s1129_s14 = sshll.u32 %s1690_s19, 7  ;;  %s241_s11 = scalar_lea.vmem [#allocation8], %s1066_s12  ;;  %v827_v38 = vmul.f32 %v1900_v33, %v1900_v33 }
 0x17c   : > { %v782_v4 = vadd.f32 %v1848_v25, %v781_v1  ;;  %v845_v5 = vadd.f32 %v844_v0, %v814_v2  ;;  %v819_v25 = vmul.f32 %v1868_v46, %v1868_v46  ;;  %s901_s9 = sshll.u32 %s241_s11, 4  ;;  %s1997_s26 = scalar_lea.vmem [#allocation10], %s1066_s12  ;;  %s2008_s9 = int_to_ptr.vmem [resolvable:$true] %s901_s9 }
 0x17d   : > { %s914_s25 = sshll.u32 %s1997_s26, 4  ;;  %s2006_s6 = scalar_lea.hbm %s2087_s3, %s1129_s14  ;;  %s2015_s25 = int_to_ptr.vmem [resolvable:$true] %s914_s25 }
 0x17e   : > { %v846_v9 = vadd.f32 %v845_v5, %v815_v3  ;;  %v783_v10 = vadd.f32 %v1852_v29, %v782_v4  ;;  %v820_v29 = vmul.f32 %v1872_v53, %v1872_v53  ;;  %s2013_s29 = scalar_lea.hbm %s2088_s4, %s1129_s14  ;;  %s2017_s21 = scalar_lea.sflag [#allocation9], %s866_s28 }
 0x17f   : > { %s1531_s23 = scalar_lea.vmem %s2008_s9, 128  ;;  %s1642_s13 = smov [#allocation8]  }
 0x180   : > { %v784_v11 = vadd.f32 %v783_v10, %v1870_v48  ;;  %v847_v12 = vadd.f32 %v846_v9, %v816_v7  ;;  %p1532_p10 = scmp.ne.s32.totalorder %s2008_s9, %s1531_s23  ;;  %s1535_s10 = sshll.u32 %s1642_s13, 4  ;;  %s1536_s10 = int_to_ptr.vmem [resolvable:$false] %s1535_s10 }
 0x181   : > { %s1537_s12 = scalar_lea.vmem %s1536_s10, 256  ;;  %p1538_p7 = scmp.lt.s32.totalorder %s2008_s9, %s1536_s10 }
 0x182   : > { %v848_v14 = vadd.f32 %v847_v12, %v817_v27  ;;  %v785_v34 = vadd.f32 %v784_v11, %v1876_v57  ;;  %p1533_p13 = pnand %p1532_p10, %p1765_p12  ;;  %p1539_p9 = scmp.lt.s32.totalorder %s1537_s12, %s1531_s23 }
 0x184   : > { %v786_v16 = vadd.f32 %v1868_v46, %v785_v34  ;;  %v849_v18 = vadd.f32 %v848_v14, %v818_v15  ;;  %v822_v46 = vmul.f32 %v1892_v17, %v1892_v17  ;;  %p1534_p3 = pneg %p1533_p13  ;;  %p1540_p1 = por %p1539_p9, %p1538_p7 }
 0x186   : > { %v850_v19 = vadd.f32 %v849_v18, %v819_v25  ;;  %v787_v48 = vadd.f32 %v1872_v53, %v786_v16  ;;  %p1541_p0 = pnand %p1540_p1, %p1534_p3 }
 0x188   : > { %v788_v21 = vadd.f32 %v787_v48, %v1886_v8  ;;  %v851_v22 = vadd.f32 %v850_v19, %v820_v29 }
 0x18a   : > { %v852_v57 = vadd.f32 %v851_v22, %v821_v20  ;;  %v789_v23 = vadd.f32 %v788_v21, %v1892_v17 }
 0x18c   : > { %v790_v26 = vadd.f32 %v1884_v6, %v789_v23  ;;  %v853_v53 = vadd.f32 %v852_v57, %v822_v46  ;;  %v826_v6 = vmul.f32 %v1910_v45, %v1910_v45 }
 0x18e   : > { %v854_v8 = vadd.f32 %v853_v53, %v823_v24  ;;  %v791_v30 = vadd.f32 %v1888_v13, %v790_v26 }
 0x190   : > { %v792_v32 = vadd.f32 %v791_v30, %v1902_v36  ;;  %v855_v35 = vadd.f32 %v854_v8, %v824_v28  ;;  %v828_v36 = vmul.f32 %v1906_v41, %v1906_v41 }
 0x192   : > { %v856_v17 = vadd.f32 %v855_v35, %v825_v31  ;;  %v793_v37 = vadd.f32 %v792_v32, %v1910_v45 }
 0x194   : > { %v794_v13 = vadd.f32 %v1900_v33, %v793_v37  ;;  %v857_v39 = vadd.f32 %v856_v17, %v826_v6 }
 0x196   : > { %v795_v40 = vadd.f32 %v1906_v41, %v794_v13  ;;  %v858_v42 = vadd.f32 %v857_v39, %v827_v38 }
 0x198   : > { %v859_v33 = vadd.f32 %v858_v42, %v828_v36  ;;  %796 = vst [vmem:[%s241_s11] sm:$0xff] %v795_v40 }
 0x199   : > { %1544 = shalt.err (!%p1541_p0)
}
 0x19a   : > { %s1545_s28 = scalar_lea.hbm %s2006_s6, 128  ;;  %s1549_s19 = scalar_lea.hbm %s2087_s3, 256 }
 0x19b   : > { %p1546_p5 = scmp.ne.s32.totalorder %s2006_s6, %s1545_s28  ;;  %p1550_p4 = scmp.lt.u32.totalorder %s2006_s6, %s2087_s3 }
 0x19c   : > { %p1551_p6 = scmp.lt.u32.totalorder %s1549_s19, %s1545_s28  ;;  %p1553_p10 = scmp.lt.u32.totalorder %s1545_s28, %s2006_s6 }
 0x19d   : > { %p1547_p11 = pnand %p1546_p5, %p1765_p12 }
 0x19e   : > { %p1552_p8 = por %p1551_p6, %p1550_p4 }
 0x19f   : > { %p1548_p2 = pneg %p1547_p11 }
 0x1a0   : > { %p1554_p13 = por %p1553_p10, %p1552_p8 }
 0x1a2   : > { %p1555_p3 = pnand %p1554_p13, %p1548_p2 }
 0x1a4   : > { %1558 = shalt.err (!%p1555_p3)
}
 0x1a5   : > { %1357 = dma.vmem_to_hbm [thread:$0]  (%p1765_p12), %s2008_s9, 128, %s2006_s6, %s2017_s21   ;;  %860 = vst [vmem:[%s1997_s26] sm:$0xff] %v859_v33 }
 0x1a6   : > { %s1559_s8 = scalar_lea.vmem %s2015_s25, 128  ;;  %s1643_s23 = smov [#allocation10]  }
 0x1a7   : > { %p1560_p7 = scmp.ne.s32.totalorder %s2015_s25, %s1559_s8  ;;  %s1563_s13 = sshll.u32 %s1643_s23, 4  ;;  %s1564_s13 = int_to_ptr.vmem [resolvable:$false] %s1563_s13 }
 0x1a8   : > { %s1565_s10 = scalar_lea.vmem %s1564_s13, 256  ;;  %p1566_p0 = scmp.lt.s32.totalorder %s2015_s25, %s1564_s13 }
 0x1a9   : > { %p1561_p9 = pnand %p1560_p7, %p1765_p12  ;;  %p1567_p5 = scmp.lt.s32.totalorder %s1565_s10, %s1559_s8 }
 0x1ab   : > { %p1562_p1 = pneg %p1561_p9  ;;  %p1568_p11 = por %p1567_p5, %p1566_p0 }
 0x1ad   : > { %p1569_p2 = pnand %p1568_p11, %p1562_p1 }
 0x1af   : > { %1572 = shalt.err (!%p1569_p2)
}
 0x1b0   : > { %s1573_s9 = scalar_lea.hbm %s2013_s29, 128  ;;  %s1577_s12 = scalar_lea.hbm %s2088_s4, 256 }
 0x1b1   : > { %p1574_p4 = scmp.ne.s32.totalorder %s2013_s29, %s1573_s9  ;;  %p1578_p10 = scmp.lt.u32.totalorder %s2013_s29, %s2088_s4 }
 0x1b2   : > { %p1579_p13 = scmp.lt.u32.totalorder %s1577_s12, %s1573_s9  ;;  %p1581_p7 = scmp.lt.u32.totalorder %s1573_s9, %s2013_s29 }
 0x1b3   : > { %p1575_p6 = pnand %p1574_p4, %p1765_p12 }
 0x1b4   : > { %p1580_p3 = por %p1579_p13, %p1578_p10 }
 0x1b5   : > { %p1576_p8 = pneg %p1575_p6 }
 0x1b6   : > { %p1582_p9 = por %p1581_p7, %p1580_p3 }
 0x1b8   : > { %p1583_p1 = pnand %p1582_p9, %p1576_p8 }
 0x1ba   : > { %1586 = shalt.err (!%p1583_p1)
}
 0x1bb   : > { %1358 = dma.vmem_to_hbm [thread:$0]  (%p1765_p12), %s2015_s25, 128, %s2013_s29, %s2017_s21  }
 0x1bc PF: > { %s926_s11 = sand.u32 1, %s1621_s15   ;;  %p2103_p0 = scmp.ne.s32.totalorder %s2093_s22, 0 }
 0x1bd   : > { %p2104_p5 = scmp.ge.s32.totalorder %s1633_s18, 2  ;;  %s927_s19 = scalar_lea.sflag [#allocation4], %s926_s11 }
 0x1bf   : > { %p1371_p11 = pnand %p2104_p5, %p2103_p0 }
 0x1c1   : > { %1612 = dma.done.wait (!%p1371_p11), %s927_s19, 2048  }
 0x1c2   : > { %1614 = vsyncadd (!%p1371_p11), %s927_s19, 4294965248  ;;  %s935_s24 = sand.u32 1, %s1055_s20  }
 0x1c3   : > { %s936_s7 = scalar_lea.sflag [#allocation9], %s935_s24 }
 0x1c4   : > { %1616 = dma.done.wait (!%p1371_p11), %s936_s7, 256  }
 0x1c5   : > { %1618 = vsyncadd (!%p1371_p11), %s936_s7, 4294967040  ;;  %p22_p12 = scmp.ge.s32.totalorder %s1727_s27, 4   ;;  %s2105_s15 = smov %s1625_s16 }
 0x1c6   : > { %s2106_s16 = smov %s1629_s17  ;;  %s2107_s17 = smov %s1761_s30 }
 0x1c7   : > { %s2108_s18 = smov %s1727_s27  ;;  %24 = sbr.rel (!%p22_p12) target bundleno = 8 (0x8), region = 109 }
 0x1ce   :  { %950 = vsyncpa [#allocation3], 1 }
 0x1cf   :  { %952 = vsyncpa [#allocation3 + $0x1], 1 }
 0x1d0   :  { %953 = vsyncpa [#allocation6], 1 }
 0x1d1   :  { %954 = vsyncpa [#allocation4], 1 }
 0x1d2   :  { %956 = vsyncpa [#allocation4 + $0x1], 1 }
 0x1d3   :  { %957 = vsyncpa [#allocation9], 1 }
 0x1d4   :  { %959 = vsyncpa [#allocation9 + $0x1], 1 }

// kernel: discriminator_forward.7
= control target key start
LH: loop header
LB: loop body
LE: loop exit
PB: predicated region body
PF: predicated region fallthrough
CT: control target
= control target key end

     0   :  { %10 = vsyncpa [#allocation3], 0  ;;  %s1520_s0 = inlined_call_operand.hbm [shape: bf16[128,256], index: 0, kind: input, shape index: {}]   ;;  %s1521_s1 = inlined_call_operand.hbm [shape: bf16[256,128], index: 1, kind: input, shape index: {}]   ;;  %s1522_s2 = inlined_call_operand.hbm [shape: bf16[128,128], index: 2, kind: output, shape index: {0}]   ;;  %s1523_s3 = inlined_call_operand.hbm [shape: f32[16,128], index: 3, kind: output, shape index: {1}]   ;;  %s1524_s4 = inlined_call_operand.hbm [shape: f32[16,128], index: 4, kind: output, shape index: {2}]  }
   0x1   :  { %12 = vsyncpa [#allocation3 + $0x1], 0 }
   0x2   :  { %13 = vsyncpa [#allocation6], 0 }
   0x3   :  { %14 = vsyncpa [#allocation4], 0 }
   0x4   :  { %16 = vsyncpa [#allocation4 + $0x1], 0 }
   0x5   :  { %17 = vsyncpa [#allocation9], 0 }
   0x6   :  { %19 = vsyncpa [#allocation9 + $0x1], 0  ;;  %s1224_s15 = smov 0   ;;  %s1226_s16 = smov 0  }
   0x7   :  { %s1228_s17 = smov 0   ;;  %s1230_s18 = smov 0  }
   0x8 LB: > { %s1245_s19 = sadd.s32 4294967295, %s1186_s18   ;;  %s752_s20 = sadd.s32 4294967294, %s1186_s18   ;;  %s1186_s18 = sphi %s1230_s18, %s1544_s18   ;;  %s1182_s17 = sphi %s1228_s17, %s1543_s17   ;;  %s1178_s16 = sphi %s1226_s16, %s1542_s16   ;;  %s1174_s15 = sphi %s1224_s15, %s1541_s15  }
   0x9   : > { %p45_p0 = scmp.ne.s32.totalorder %s1178_s16, %s1174_s15  ;;  %p1525_p1 = scmp.eq.s32.totalorder %s1245_s19, 0 }
   0xa   : > { %p96_p3 = scmp.eq.s32.totalorder %s752_s20, 1  ;;  %p753_p5 = scmp.ge.s32.totalorder %s1186_s18, 1 }
   0xb   : > { %p1256_p4 = por %p1525_p1, %p45_p0  ;;  %p155_p7 = scmp.lt.s32.totalorder %s1186_s18, 3 }
   0xc   : > { %p1261_p6 = por %p96_p3, %p45_p0  ;;  %s1188_s24 = smov [#allocation5]  }
   0xd   : > { %s1528_s21 = scalar_select %p1256_p4, 1, 0 }
   0xe   : > { %s1529_s22 = scalar_select %p1261_p6, 1, 0 }
   0xf   : > { %p1266_p8 = pnand %p753_p5, %p155_p7  ;;  %s167_s25 = sshll.u32 %s1188_s24, 4  ;;  %s1270_s25 = int_to_ptr.vmem [resolvable:$true] %s167_s25 }
  0x10   : > { %s1282_s27 = sadd.s32 1, %s1186_s18   ;;  %s32_s28 = sadd.s32 1, %s1182_s17 }
  0x11   : > { %s1530_s23 = scalar_select %p1266_p8, 1, 0 }
  0x12   : > { %p909_p9 = pneg %p1266_p8  ;;  %s29_s29 = ssub.s32 %s1186_s18, %s1282_s27 }
  0x13   : > { %s998_s6 = scalar_lea.hbm %s1521_s1, 2048 }
  0x14   : > { %p1277_p11 = pnand %p909_p9, %p1525_p1  ;;  %p999_p12 = scmp.ne.s32.totalorder %s1521_s1, %s998_s6 }
  0x15   : > { %p1005_p5 = scmp.lt.u32.totalorder %s998_s6, %s1521_s1 }
  0x16   : > { %p1000_p13 = pneg %p1277_p11 }
  0x18   : > { %p1001_p0 = pnand %p1000_p13, %p999_p12 }
  0x1a   : > { %p1002_p3 = pneg %p1001_p0 }
  0x1c   : > { %p1007_p7 = pnand %p1005_p5, %p1002_p3 }
  0x1e   : > { %1010 = shalt.err (!%p1007_p7)
}
  0x1f   : > { %s1011_s11 = scalar_lea.vmem %s1270_s25, 2048  ;;  %p1019_p2 = scmp.lt.s32.totalorder %s1270_s25, %s1270_s25 }
  0x20   : > { %p1012_p9 = scmp.ne.s32.totalorder %s1270_s25, %s1011_s11  ;;  %p1020_p6 = scmp.lt.s32.totalorder %s1011_s11, %s1011_s11 }
  0x22   : > { %p1014_p10 = pnand %p1012_p9, %p1000_p13  ;;  %p1021_p4 = por %p1020_p6, %p1019_p2 }
  0x24   : > { %p1015_p1 = pneg %p1014_p10 }
  0x26   : > { %p1022_p8 = pnand %p1021_p4, %p1015_p1 }
  0x28   : > { %1025 = shalt.err (!%p1022_p8)
}
  0x29   : > { %s1189_s12 = smov 64   ;;  %s1190_s13 = smov 4  }
  0x2a   : > { %912 = dma.hbm_to_vmem [thread:$0]  (!%p1277_p11), %s1521_s1, 2048, %s1270_s25, [#allocation6], %s1189_s12, %s1189_s12, %s1190_s13  }
  0x2b   : > { %p30_p2 = scmp.eq.s32.totalorder %s29_s29, 0  ;;  %p39_p1 = scmp.ne.s32.totalorder %s1182_s17, %s1178_s16 }
  0x2c   : > { %p40_p4 = scmp.eq.s32.totalorder %s1186_s18, 0  ;;  %p928_p6 = scmp.lt.s32.totalorder %s1186_s18, 2 }
  0x2d   : > { %s1313_s30 = scalar_select %p30_p2, %s1182_s17, %s32_s28  }
  0x2e   : > { %p41_p8 = por %p40_p4, %p39_p1  ;;  %p1532_p10 = scmp.eq.s32.totalorder %s1245_s19, 1 }
  0x2f   : > { %s181_s6 = sand.u32 1, %s1182_s17   ;;  %s808_s7 = sshll.u32 %s1186_s18, 10 }
  0x30   : > { %p1317_p12 = por %p1532_p10, %p39_p1  ;;  %s756_s8 = sshll.u32 %s181_s6, 6 }
  0x31   : > { %s1326_s10 = scalar_lea.hbm %s1520_s0, %s808_s7  ;;  %s185_s25 = scalar_lea.vmem [#allocation2], %s756_s8 }
  0x32   : > { %s193_s28 = sshll.u32 %s185_s25, 4  ;;  %p1328_p11 = pnand %p928_p6, %p41_p8  ;;  %s1332_s28 = int_to_ptr.vmem [resolvable:$true] %s193_s28 }
  0x33   : > { %s1334_s11 = scalar_lea.sflag [#allocation3], %s181_s6  ;;  %s1026_s12 = scalar_lea.hbm %s1326_s10, 1024 }
  0x34   : > { %p1027_p13 = scmp.ne.s32.totalorder %s1326_s10, %s1026_s12  ;;  %p1028_p0 = pneg %p1328_p11 }
  0x35   : > { %s1031_s24 = scalar_lea.hbm %s1520_s0, 2048  ;;  %p1032_p7 = scmp.lt.u32.totalorder %s1326_s10, %s1520_s0 }
  0x36   : > { %p1029_p3 = pnand %p1028_p0, %p1027_p13  ;;  %p1033_p9 = scmp.lt.u32.totalorder %s1031_s24, %s1026_s12 }
  0x37   : > { %p1035_p1 = scmp.lt.u32.totalorder %s1026_s12, %s1326_s10 }
  0x38   : > { %p1030_p5 = pneg %p1029_p3  ;;  %p1034_p2 = por %p1033_p9, %p1032_p7 }
  0x3a   : > { %p1036_p4 = por %p1035_p1, %p1034_p2 }
  0x3c   : > { %p1037_p6 = pnand %p1036_p4, %p1030_p5 }
  0x3e   : > { %1040 = shalt.err (!%p1037_p6)
}
  0x3f   : > { %s1041_s6 = scalar_lea.vmem %s1332_s28, 1024  ;;  %s1191_s26 = smov [#allocation2]  }
  0x40   : > { %p1042_p8 = scmp.ne.s32.totalorder %s1332_s28, %s1041_s6  ;;  %s1046_s9 = sshll.u32 %s1191_s26, 4  ;;  %s1047_s9 = int_to_ptr.vmem [resolvable:$false] %s1046_s9 }
  0x41   : > { %s1048_s25 = scalar_lea.vmem %s1047_s9, 2048  ;;  %p1049_p3 = scmp.lt.s32.totalorder %s1332_s28, %s1047_s9 }
  0x42   : > { %p1044_p10 = pnand %p1042_p8, %p1028_p0  ;;  %p1050_p7 = scmp.lt.s32.totalorder %s1048_s25, %s1041_s6 }
  0x44   : > { %p1045_p13 = pneg %p1044_p10  ;;  %p1051_p9 = por %p1050_p7, %p1049_p3 }
  0x46   : > { %p1052_p2 = pnand %p1051_p9, %p1045_p13 }
  0x48   : > { %1055 = shalt.err (!%p1052_p2)
}
  0x49   : > { %s1192_s12 = smov 128   ;;  %s1193_s13 = smov 8  }
  0x4a   : > { %916 = dma.hbm_to_vmem [thread:$0]  (!%p1328_p11), %s1326_s10, 1024, %s1332_s28, %s1334_s11, %s1192_s12, %s1192_s12, %s1193_s13  }
  0x4b   : > { %p1535_p0 = scmp.ne.s32.totalorder %s1530_s23, 0 }
  0x4c   : > { %s1365_s14 = sand.u32 (!%p1535_p0), 1, %s1178_s16   ;;  %p1536_p5 = scmp.ne.s32.totalorder (!%p1535_p0), %s1528_s21, 0 }
  0x4d   : > { %205 = sbr.rel (%p1535_p0) target bundleno = 413 (0x19d), region = 28  ;;  %s761_s24 = sshll.u32 (!%p1535_p0), %s1365_s14, 6 }
  0x4e   : > { %s208_s7 = scalar_lea.sflag (!%p1535_p0), [#allocation3], %s1365_s14  ;;  %s1369_s8 = scalar_lea.vmem (!%p1535_p0), [#allocation2], %s761_s24 }
  0x54   : > { %1157 = dma.done.wait (%p1536_p5), %s208_s7, 1024  }
  0x55   : > { %1159 = vsyncadd (%p1536_p5), %s208_s7, 4294966272  ;;  %p1537_p11 = scmp.eq.s32.totalorder %s1245_s19, 0 }
  0x57   : > { %1161 = dma.done.wait (%p1537_p11), [#allocation6], 2048   ;;  %p1538_p1 = pmov %p1537_p11 }
  0x58   : > { %v970_v0 = vld [vmem:[#allocation5 + $0x40] sm:$0xff]   ;;  %v972_v2 = vld [vmem:[#allocation5 + $0x48] sm:$0xff]   ;;  %v974_v4 = vld [vmem:[#allocation5 + $0x50] sm:$0xff]   ;;  %s763_s21 = sshll.u32 %s1365_s14, 5  ;;  %s817_s28 = sshll.u32 %s1245_s19, 9 }
  0x59   : > { %1163 = vsyncadd (%p1538_p1), [#allocation6], 4294965248  ;;  %v971_v1 = vld [vmem:[#allocation5] sm:$0xff]   ;;  %841 = vmatprep.subr.bf16.mxu0 %v970_v0  ;;  %881 = vmatprep.subr.bf16.mxu1 %v970_v0  ;;  %v973_v3 = vld [vmem:[#allocation5 + $0x8] sm:$0xff]   ;;  %s1388_s23 = scalar_lea.vmem [#allocation7], %s763_s21  ;;  %s764_s29 = sshll.u32 %s1365_s14, 3 }
  0x5a   : > { %842 = vmatpush3.bf16.msra.mxu0 %v971_v1  ;;  %889 = vmatpush3.bf16.msra.mxu1 %v971_v1  ;;  %v975_v5 = vld [vmem:[#allocation5 + $0x10] sm:$0xff]   ;;  %v976_v6 = vld [vmem:[#allocation5 + $0x58] sm:$0xff]   ;;  %v978_v8 = vld [vmem:[#allocation5 + $0x60] sm:$0xff]   ;;  %s582_s10 = sshll.u32 %s1388_s23, 4  ;;  %s1400_s26 = scalar_lea.hbm %s1522_s2, %s817_s28  ;;  %s1394_s10 = int_to_ptr.vmem [resolvable:$true] %s582_s10 }
  0x5b   : > { %843 = vmatprep.subr.bf16.mxu0 %v972_v2  ;;  %882 = vmatprep.subr.bf16.mxu1 %v972_v2  ;;  %v977_v7 = vld [vmem:[#allocation5 + $0x18] sm:$0xff]   ;;  %v979_v9 = vld [vmem:[#allocation5 + $0x20] sm:$0xff]   ;;  %v980_v10 = vld [vmem:[#allocation5 + $0x68] sm:$0xff]   ;;  %s563_s9 = sand.u32 1, %s1245_s19   ;;  %s559_s25 = scalar_lea.sflag [#allocation4], %s1365_s14 }
  0x5c   : > { %v988_v11 = vld [vmem:[%s1369_s8 + $0x4] ss:$8 sps:$4 sm:$0xff]   ;;  %v982_v14 = vld [vmem:[#allocation5 + $0x70] sm:$0xff]   ;;  %v984_v16 = vld [vmem:[#allocation5 + $0x78] sm:$0xff]   ;;  %s1056_s12 = scalar_lea.vmem %s1394_s10, 512  ;;  %s1194_s13 = smov [#allocation7]  }
  0x5d   : > { %v991_v12 = vld [vmem:[%s1369_s8 + $0x24] ss:$8 sps:$4 sm:$0xff]   ;;  %461 = vmatprep.mubr.bf16.mxu0 %v988_v11  ;;  %v983_v15 = vld [vmem:[#allocation5 + $0x30] sm:$0xff]   ;;  %v985_v17 = vld [vmem:[#allocation5 + $0x38] sm:$0xff]   ;;  %p1057_p4 = scmp.ne.s32.totalorder %s1394_s10, %s1056_s12  ;;  %s1060_s24 = sshll.u32 %s1194_s13, 4  ;;  %s1061_s24 = int_to_ptr.vmem [resolvable:$false] %s1060_s24 }
  0x5e   : > { %844 = vmatpush3.bf16.msra.mxu0 %v973_v3  ;;  %890 = vmatpush3.bf16.msra.mxu1 %v973_v3  ;;  %v981_v13 = vld [vmem:[#allocation5 + $0x28] sm:$0xff]   ;;  %v992_v20 = vld [vmem:[%s1369_s8 + $0x14] ss:$8 sps:$4 sm:$0xff]   ;;  %v994_v22 = vld [vmem:[%s1369_s8 + $0x10] ss:$8 sps:$4 sm:$0xff]   ;;  %s1062_s7 = scalar_lea.vmem %s1061_s24, 1024  ;;  %p1063_p10 = scmp.lt.s32.totalorder %s1394_s10, %s1061_s24 }
  0x5f   : > { %845 = vmatprep.subr.bf16.mxu0 %v974_v4  ;;  %883 = vmatprep.subr.bf16.mxu1 %v974_v4  ;;  %v986_v18 = vld [vmem:[%s1369_s8] ss:$8 sps:$4 sm:$0xff]   ;;  %v995_v21 = vld [vmem:[%s1369_s8 + $0x34] ss:$8 sps:$4 sm:$0xff]   ;;  %v997_v23 = vld [vmem:[%s1369_s8 + $0x30] ss:$8 sps:$4 sm:$0xff]   ;;  %p1058_p6 = pnand %p1057_p4, %p1317_p12  ;;  %p1064_p13 = scmp.lt.s32.totalorder %s1062_s7, %s1056_s12 }
  0x60   : > { %477 = vmatprep.mubr.bf16.mxu1 %v991_v12  ;;  %v989_v19 = vld [vmem:[%s1369_s8 + $0x20] ss:$8 sps:$4 sm:$0xff]  }
  0x61   : > { %p1059_p8 = pneg %p1058_p6  ;;  %p1065_p3 = por %p1064_p13, %p1063_p10 }
  0x62   : > { %846 = vmatpush3.bf16.msra.mxu0 %v975_v5  ;;  %891 = vmatpush3.bf16.msra.mxu1 %v975_v5 }
  0x63   : > { %847 = vmatprep.subr.bf16.mxu0 %v976_v6  ;;  %884 = vmatprep.subr.bf16.mxu1 %v976_v6  ;;  %p1066_p7 = pnand %p1065_p3, %p1059_p8 }
  0x66   : > { %848 = vmatpush3.bf16.msra.mxu0 %v977_v7  ;;  %892 = vmatpush3.bf16.msra.mxu1 %v977_v7 }
  0x67   : > { %849 = vmatprep.subr.bf16.mxu0 %v978_v8  ;;  %885 = vmatprep.subr.bf16.mxu1 %v978_v8 }
  0x6a   : > { %850 = vmatpush3.bf16.msra.mxu0 %v979_v9  ;;  %893 = vmatpush3.bf16.msra.mxu1 %v979_v9 }
  0x6b   : > { %851 = vmatprep.subr.bf16.mxu0 %v980_v10  ;;  %886 = vmatprep.subr.bf16.mxu1 %v980_v10 }
  0x6e   : > { %852 = vmatpush3.bf16.msra.mxu0 %v981_v13  ;;  %894 = vmatpush3.bf16.msra.mxu1 %v981_v13 }
  0x6f   : > { %853 = vmatprep.subr.bf16.mxu0 %v982_v14  ;;  %887 = vmatprep.subr.bf16.mxu1 %v982_v14 }
  0x72   : > { %854 = vmatpush3.bf16.msra.mxu0 %v983_v15  ;;  %895 = vmatpush3.bf16.msra.mxu1 %v983_v15 }
  0x73   : > { %855 = vmatprep.subr.bf16.mxu0 %v984_v16  ;;  %888 = vmatprep.subr.bf16.mxu1 %v984_v16 }
  0x76   : > { %856 = vmatpush3.bf16.msra.mxu0 %v985_v17  ;;  %896 = vmatpush3.bf16.msra.mxu1 %v985_v17 }
  0x79   : > { %462 = vmatmul.mubr.bf16.vlgmr.msra.gmra.mrb[0].mxu0 %v986_v18  ;;  %478 = vmatmul.mubr.bf16.vlgmr.msra.gmra.mrb[0].mxu1 %v989_v19 }
  0x7a   : > { %469 = vmatprep.mubr.bf16.mxu0 %v992_v20  ;;  %485 = vmatprep.mubr.bf16.mxu1 %v995_v21 }
  0x81   : > { %470 = vmatmul.mubr.bf16.gmra.mrb[4].mxu0 %v994_v22  ;;  %486 = vmatmul.mubr.bf16.gmra.mrb[4].mxu1 %v997_v23 }
 0x14c   : > { %v857_v24 = vpop.f32.mrb[0].mxu0  ;;  %v869_v25 = vpop.f32.mrb[0].mxu1 }
 0x14d   : > { %v858_v26 = vpop.f32.mrb[1].mxu0  ;;  %v870_v27 = vpop.f32.mrb[1].mxu1 }
 0x14e   : > { %v859_v28 = vadd.f32 %v858_v26, %v857_v24  ;;  %v860_v29 = vpop.f32.mrb[2].mxu0  ;;  %v871_v30 = vadd.f32 %v870_v27, %v869_v25  ;;  %v872_v31 = vpop.f32.mrb[2].mxu1 }
 0x14f   : > { %v861_v32 = vpop.f32.mrb[3].mxu0  ;;  %v873_v33 = vpop.f32.mrb[3].mxu1 }
 0x150   : > { %v862_v34 = vadd.f32 %v861_v32, %v860_v29  ;;  %v874_v35 = vadd.f32 %v873_v33, %v872_v31  ;;  %v542_v36 = vmul.f32 %v859_v28, %v859_v28  ;;  %v546_v61 = vmul.f32 %v871_v30, %v871_v30 }
 0x152   : > { %v821_v37 = vpack.c.bf16 %v862_v34, %v859_v28  ;;  %v534_v38 = vadd.f32 %v862_v34, %v859_v28  ;;  %v543_v39 = vmul.f32 %v862_v34, %v862_v34  ;;  %v831_v40 = vpack.c.bf16 %v874_v35, %v871_v30 }
 0x153   : > { %v547_v0 = vmul.f32 %v874_v35, %v874_v35 }
 0x154   : > { %822 = vst [vmem:[%s1388_s23] sm:$0xff] %v821_v37   ;;  %v550_v41 = vadd.f32 %v543_v39, %v542_v36  ;;  %v863_v42 = vpop.f32.mrb[4].mxu0  ;;  %839 = vst [vmem:[%s1388_s23 + $0x10] sm:$0xff] %v831_v40   ;;  %v875_v43 = vpop.f32.mrb[4].mxu1 }
 0x155   : > { %v864_v44 = vpop.f32.mrb[5].mxu0  ;;  %v876_v45 = vpop.f32.mrb[5].mxu1 }
 0x156   : > { %v865_v46 = vadd.f32 %v864_v44, %v863_v42  ;;  %v866_v47 = vpop.f32.mrb[6].mxu0  ;;  %v877_v48 = vadd.f32 %v876_v45, %v875_v43  ;;  %v878_v49 = vpop.f32.mrb[6].mxu1 }
 0x157   : > { %v867_v50 = vpop.f32.mrb[7].mxu0  ;;  %v879_v51 = vpop.f32.mrb[7].mxu1 }
 0x158   : > { %v535_v52 = vadd.f32 %v865_v46, %v534_v38  ;;  %v544_v53 = vmul.f32 %v865_v46, %v865_v46  ;;  %v868_v54 = vadd.f32 %v867_v50, %v866_v47  ;;  %v880_v55 = vadd.f32 %v879_v51, %v878_v49 }
 0x159   : > { %v548_v3 = vmul.f32 %v877_v48, %v877_v48 }
 0x15a   : > { %v551_v56 = vadd.f32 %v550_v41, %v544_v53  ;;  %v826_v57 = vpack.c.bf16 %v868_v54, %v865_v46  ;;  %v536_v58 = vadd.f32 %v868_v54, %v535_v52  ;;  %v545_v59 = vmul.f32 %v868_v54, %v868_v54 }
 0x15b   : > { %v836_v60 = vpack.c.bf16 %v880_v55, %v877_v48 }
 0x15c   : > { %838 = vst [vmem:[%s1388_s23 + $0x8] sm:$0xff] %v826_v57   ;;  %v537_v62 = vadd.f32 %v871_v30, %v536_v58  ;;  %v552_v63 = vadd.f32 %v551_v56, %v545_v59 }
 0x15d   : > { %840 = vst [vmem:[%s1388_s23 + $0x18] sm:$0xff] %v836_v60  }
 0x15e   : > { %v553_v1 = vadd.f32 %v552_v63, %v546_v61  ;;  %v538_v2 = vadd.f32 %v874_v35, %v537_v62 }
 0x15f   : > { %1069 = shalt.err (!%p1066_p7)
}
 0x160   : > { %s1070_s8 = scalar_lea.hbm %s1400_s26, 512  ;;  %s1074_s28 = scalar_lea.hbm %s1522_s2, 1024 }
 0x161   : > { %p1071_p9 = scmp.ne.s32.totalorder %s1400_s26, %s1070_s8  ;;  %p1075_p5 = scmp.lt.u32.totalorder %s1400_s26, %s1522_s2 }
 0x162   : > { %p1076_p11 = scmp.lt.u32.totalorder %s1074_s28, %s1070_s8  ;;  %p1078_p4 = scmp.lt.u32.totalorder %s1070_s8, %s1400_s26 }
 0x163   : > { %p1072_p2 = pnand %p1071_p9, %p1317_p12 }
 0x164   : > { %p1077_p1 = por %p1076_p11, %p1075_p5 }
 0x165   : > { %p1073_p0 = pneg %p1072_p2 }
 0x166   : > { %p1079_p6 = por %p1078_p4, %p1077_p1 }
 0x168   : > { %p1080_p8 = pnand %p1079_p6, %p1073_p0 }
 0x16a   : > { %1083 = shalt.err (!%p1080_p8)
}
 0x16b   : > { %s1195_s12 = smov 64   ;;  %s1196_s13 = smov 4   ;;  %v539_v4 = vadd.f32 %v877_v48, %v538_v2  ;;  %v554_v5 = vadd.f32 %v553_v1, %v547_v0  ;;  %v549_v8 = vmul.f32 %v880_v55, %v880_v55 }
 0x16c   : > { %903 = dma.vmem_to_hbm [thread:$0]  (%p1317_p12), %s1394_s10, 512, %s1400_s26, %s559_s25, %s1195_s12, %s1195_s12, %s1196_s13  }
 0x16d   : > { %s803_s24 = sshll.u32 %s1245_s19, 7  ;;  %s242_s7 = scalar_lea.vmem [#allocation8], %s764_s29  ;;  %v555_v6 = vadd.f32 %v554_v5, %v548_v3  ;;  %v540_v7 = vadd.f32 %v880_v55, %v539_v4 }
 0x16e   : > { %s598_s8 = sshll.u32 %s242_s7, 4  ;;  %s1434_s21 = scalar_lea.vmem [#allocation10], %s764_s29  ;;  %s1442_s8 = int_to_ptr.vmem [resolvable:$true] %s598_s8 }
 0x16f   : > { %s611_s23 = sshll.u32 %s1434_s21, 4  ;;  %s1440_s10 = scalar_lea.hbm %s1523_s3, %s803_s24  ;;  %v556_v9 = vadd.f32 %v555_v6, %v549_v8  ;;  %541 = vst [vmem:[%s242_s7] sm:$0xff] %v540_v7  ;;  %s1449_s23 = int_to_ptr.vmem [resolvable:$true] %s611_s23 }
 0x170   : > { %s1447_s26 = scalar_lea.hbm %s1524_s4, %s803_s24  ;;  %s1453_s25 = scalar_lea.sflag [#allocation9], %s563_s9 }
 0x171   : > { %s1084_s6 = scalar_lea.vmem %s1442_s8, 128  ;;  %s1197_s12 = smov [#allocation8]  }
 0x172   : > { %p1085_p10 = scmp.ne.s32.totalorder %s1442_s8, %s1084_s6  ;;  %s1088_s13 = sshll.u32 %s1197_s12, 4  ;;  %s1089_s13 = int_to_ptr.vmem [resolvable:$false] %s1088_s13 }
 0x173   : > { %s1090_s28 = scalar_lea.vmem %s1089_s13, 256  ;;  %p1091_p7 = scmp.lt.s32.totalorder %s1442_s8, %s1089_s13 }
 0x174   : > { %p1086_p13 = pnand %p1085_p10, %p1317_p12  ;;  %p1092_p9 = scmp.lt.s32.totalorder %s1090_s28, %s1084_s6 }
 0x176   : > { %p1087_p3 = pneg %p1086_p13  ;;  %p1093_p2 = por %p1092_p9, %p1091_p7 }
 0x178   : > { %p1094_p0 = pnand %p1093_p2, %p1087_p3 }
 0x17a   : > { %1097 = shalt.err (!%p1094_p0)
}
 0x17b   : > { %s1098_s19 = scalar_lea.hbm %s1440_s10, 128  ;;  %s1102_s7 = scalar_lea.hbm %s1523_s3, 256 }
 0x17c   : > { %p1099_p5 = scmp.ne.s32.totalorder %s1440_s10, %s1098_s19  ;;  %p1103_p4 = scmp.lt.u32.totalorder %s1440_s10, %s1523_s3 }
 0x17d   : > { %p1104_p6 = scmp.lt.u32.totalorder %s1102_s7, %s1098_s19  ;;  %p1106_p10 = scmp.lt.u32.totalorder %s1098_s19, %s1440_s10 }
 0x17e   : > { %p1100_p11 = pnand %p1099_p5, %p1317_p12 }
 0x17f   : > { %p1105_p8 = por %p1104_p6, %p1103_p4 }
 0x180   : > { %p1101_p1 = pneg %p1100_p11 }
 0x181   : > { %p1107_p13 = por %p1106_p10, %p1105_p8 }
 0x183   : > { %p1108_p3 = pnand %p1107_p13, %p1101_p1 }
 0x185   : > { %1111 = shalt.err (!%p1108_p3)
}
 0x186   : > { %904 = dma.vmem_to_hbm [thread:$0]  (%p1317_p12), %s1442_s8, 128, %s1440_s10, %s1453_s25   ;;  %557 = vst [vmem:[%s1434_s21] sm:$0xff] %v556_v9 }
 0x187   : > { %s1112_s29 = scalar_lea.vmem %s1449_s23, 128  ;;  %s1198_s6 = smov [#allocation10]  }
 0x188   : > { %p1113_p7 = scmp.ne.s32.totalorder %s1449_s23, %s1112_s29  ;;  %s1116_s12 = sshll.u32 %s1198_s6, 4  ;;  %s1117_s12 = int_to_ptr.vmem [resolvable:$false] %s1116_s12 }
 0x189   : > { %s1118_s13 = scalar_lea.vmem %s1117_s12, 256  ;;  %p1119_p0 = scmp.lt.s32.totalorder %s1449_s23, %s1117_s12 }
 0x18a   : > { %p1114_p9 = pnand %p1113_p7, %p1317_p12  ;;  %p1120_p5 = scmp.lt.s32.totalorder %s1118_s13, %s1112_s29 }
 0x18c   : > { %p1115_p2 = pneg %p1114_p9  ;;  %p1121_p11 = por %p1120_p5, %p1119_p0 }
 0x18e   : > { %p1122_p1 = pnand %p1121_p11, %p1115_p2 }
 0x190   : > { %1125 = shalt.err (!%p1122_p1)
}
 0x191   : > { %s1126_s8 = scalar_lea.hbm %s1447_s26, 128  ;;  %s1130_s28 = scalar_lea.hbm %s1524_s4, 256 }
 0x192   : > { %p1127_p4 = scmp.ne.s32.totalorder %s1447_s26, %s1126_s8  ;;  %p1131_p10 = scmp.lt.u32.totalorder %s1447_s26, %s1524_s4 }
 0x193   : > { %p1132_p13 = scmp.lt.u32.totalorder %s1130_s28, %s1126_s8  ;;  %p1134_p7 = scmp.lt.u32.totalorder %s1126_s8, %s1447_s26 }
 0x194   : > { %p1128_p6 = pnand %p1127_p4, %p1317_p12 }
 0x195   : > { %p1133_p3 = por %p1132_p13, %p1131_p10 }
 0x196   : > { %p1129_p8 = pneg %p1128_p6 }
 0x197   : > { %p1135_p9 = por %p1134_p7, %p1133_p3 }
 0x199   : > { %p1136_p2 = pnand %p1135_p9, %p1129_p8 }
 0x19b   : > { %1139 = shalt.err (!%p1136_p2)
}
 0x19c   : > { %905 = dma.vmem_to_hbm [thread:$0]  (%p1317_p12), %s1449_s23, 128, %s1447_s26, %s1453_s25  }
 0x19d PF: > { %s623_s24 = sand.u32 1, %s1174_s15   ;;  %p1539_p0 = scmp.ne.s32.totalorder %s1529_s22, 0 }
 0x19e   : > { %p1540_p5 = scmp.ge.s32.totalorder %s1186_s18, 2  ;;  %s624_s7 = scalar_lea.sflag [#allocation4], %s623_s24 }
 0x1a0   : > { %p918_p11 = pnand %p1540_p5, %p1539_p0 }
 0x1a2   : > { %1165 = dma.done.wait (!%p918_p11), %s624_s7, 512  }
 0x1a3   : > { %1167 = vsyncadd (!%p918_p11), %s624_s7, 4294966784  ;;  %s632_s11 = sand.u32 1, %s752_s20  }
 0x1a4   : > { %s633_s14 = scalar_lea.sflag [#allocation9], %s632_s11 }
 0x1a5   : > { %1169 = dma.done.wait (!%p918_p11), %s633_s14, 256  }
 0x1a6   : > { %1171 = vsyncadd (!%p918_p11), %s633_s14, 4294967040  ;;  %p22_p12 = scmp.ge.s32.totalorder %s1282_s27, 4   ;;  %s1541_s15 = smov %s1178_s16 }
 0x1a7   : > { %s1542_s16 = smov %s1182_s17  ;;  %s1543_s17 = smov %s1313_s30 }
 0x1a8   : > { %s1544_s18 = smov %s1282_s27  ;;  %24 = sbr.rel (!%p22_p12) target bundleno = 8 (0x8), region = 109 }
 0x1af   :  { %647 = vsyncpa [#allocation3], 1 }
 0x1b0   :  { %649 = vsyncpa [#allocation3 + $0x1], 1 }
 0x1b1   :  { %650 = vsyncpa [#allocation6], 1 }
 0x1b2   :  { %651 = vsyncpa [#allocation4], 1 }
 0x1b3   :  { %653 = vsyncpa [#allocation4 + $0x1], 1 }
 0x1b4   :  { %654 = vsyncpa [#allocation9], 1 }
 0x1b5   :  { %656 = vsyncpa [#allocation9 + $0x1], 1 }

// kernel: discriminator_forward.8
= control target key start
LH: loop header
LB: loop body
LE: loop exit
PB: predicated region body
PF: predicated region fallthrough
CT: control target
= control target key end

     0   :  { %s1559_s0 = inlined_call_operand.hbm [shape: bf16[32,512], index: 0, kind: input, shape index: {}]   ;;  %s1560_s1 = inlined_call_operand.hbm [shape: bf16[512,128], index: 1, kind: input, shape index: {}]   ;;  %s1561_s2 = inlined_call_operand.hbm [shape: bf16[32,128], index: 2, kind: output, shape index: {0}]   ;;  %s1562_s3 = inlined_call_operand.hbm [shape: f32[16,128], index: 3, kind: output, shape index: {1}]   ;;  %s1563_s4 = inlined_call_operand.hbm [shape: f32[16,128], index: 4, kind: output, shape index: {2}]  }
   0x1   :  { %1569 = sst [smem:[#allocation15_spill]] %s1559_s0 }
   0x2   :  { %10 = vsyncpa [#allocation3], 0 }
   0x3   :  { %12 = vsyncpa [#allocation3 + $0x1], 0 }
   0x4   :  { %13 = vsyncpa [#allocation6], 0 }
   0x5   :  { %14 = vsyncpa [#allocation4], 0 }
   0x6   :  { %16 = vsyncpa [#allocation4 + $0x1], 0 }
   0x7   :  { %17 = vsyncpa [#allocation9], 0 }
   0x8   :  { %19 = vsyncpa [#allocation9 + $0x1], 0  ;;  %s1277_s15 = smov 0   ;;  %s1279_s16 = smov 0  }
   0x9   :  { %s1281_s17 = smov 0   ;;  %s1283_s18 = smov 0  }
   0xa LB: > { %s1298_s19 = sadd.s32 4294967295, %s1239_s18   ;;  %s1567_s20 = sadd.s32 4294967294, %s1239_s18   ;;  %s1239_s18 = sphi %s1283_s18, %s1589_s18   ;;  %s1235_s17 = sphi %s1281_s17, %s1588_s17   ;;  %s1231_s16 = sphi %s1279_s16, %s1587_s16   ;;  %s1227_s15 = sphi %s1277_s15, %s1586_s15  }
   0xb   : > { %p45_p0 = scmp.ne.s32.totalorder %s1231_s16, %s1227_s15  ;;  %p1564_p1 = scmp.eq.s32.totalorder %s1298_s19, 0 }
   0xc   : > { %p96_p3 = scmp.eq.s32.totalorder %s1567_s20, 1  ;;  %p826_p5 = scmp.ge.s32.totalorder %s1239_s18, 1 }
   0xd   : > { %p1309_p4 = por %p1564_p1, %p45_p0  ;;  %p155_p7 = scmp.lt.s32.totalorder %s1239_s18, 3 }
   0xe   : > { %p1314_p6 = por %p96_p3, %p45_p0  ;;  %s1241_s24 = smov [#allocation5]  }
   0xf   : > { %s1570_s21 = scalar_select %p1309_p4, 1, 0 }
  0x10   : > { %s1571_s22 = scalar_select %p1314_p6, 1, 0 }
  0x11   : > { %p1319_p8 = pnand %p826_p5, %p155_p7  ;;  %s167_s25 = sshll.u32 %s1241_s24, 4  ;;  %s1323_s25 = int_to_ptr.vmem [resolvable:$true] %s167_s25 }
  0x12   : > { %s1335_s27 = sadd.s32 1, %s1239_s18   ;;  %s32_s28 = sadd.s32 1, %s1235_s17 }
  0x13   : > { %s1572_s23 = scalar_select %p1319_p8, 1, 0 }
  0x14   : > { %p952_p9 = pneg %p1319_p8  ;;  %s29_s29 = ssub.s32 %s1239_s18, %s1335_s27 }
  0x15   : > { %s1051_s6 = scalar_lea.hbm %s1560_s1, 4096 }
  0x16   : > { %p1330_p11 = pnand %p952_p9, %p1564_p1  ;;  %p1052_p12 = scmp.ne.s32.totalorder %s1560_s1, %s1051_s6 }
  0x17   : > { %p1058_p5 = scmp.lt.u32.totalorder %s1051_s6, %s1560_s1 }
  0x18   : > { %p1053_p13 = pneg %p1330_p11 }
  0x1a   : > { %p1054_p0 = pnand %p1053_p13, %p1052_p12 }
  0x1c   : > { %p1055_p3 = pneg %p1054_p0 }
  0x1e   : > { %p1060_p7 = pnand %p1058_p5, %p1055_p3 }
  0x20   : > { %1063 = shalt.err (!%p1060_p7)
}
  0x21   : > { %s1064_s11 = scalar_lea.vmem %s1323_s25, 4096  ;;  %p1072_p2 = scmp.lt.s32.totalorder %s1323_s25, %s1323_s25 }
  0x22   : > { %p1065_p9 = scmp.ne.s32.totalorder %s1323_s25, %s1064_s11  ;;  %p1073_p6 = scmp.lt.s32.totalorder %s1064_s11, %s1064_s11 }
  0x24   : > { %p1067_p10 = pnand %p1065_p9, %p1053_p13  ;;  %p1074_p4 = por %p1073_p6, %p1072_p2 }
  0x26   : > { %p1068_p1 = pneg %p1067_p10 }
  0x28   : > { %p1075_p8 = pnand %p1074_p4, %p1068_p1 }
  0x2a   : > { %1078 = shalt.err (!%p1075_p8)
}
  0x2b   : > { %s1242_s12 = smov 64   ;;  %s1243_s13 = smov 4  }
  0x2c   : > { %955 = dma.hbm_to_vmem [thread:$0]  (!%p1330_p11), %s1560_s1, 4096, %s1323_s25, [#allocation6], %s1242_s12, %s1242_s12, %s1243_s13  }
  0x2d   : > { %p30_p2 = scmp.eq.s32.totalorder %s29_s29, 0  ;;  %p39_p1 = scmp.ne.s32.totalorder %s1235_s17, %s1231_s16 }
  0x2e   : > { %p40_p4 = scmp.eq.s32.totalorder %s1239_s18, 0  ;;  %p971_p6 = scmp.lt.s32.totalorder %s1239_s18, 2 }
  0x2f   : > { %s1366_s30 = scalar_select %p30_p2, %s1235_s17, %s32_s28  }
  0x30   : > { %p41_p8 = por %p40_p4, %p39_p1  ;;  %p1574_p10 = scmp.eq.s32.totalorder %s1298_s19, 1 }
  0x31   : > { %s181_s6 = sand.u32 1, %s1235_s17   ;;  %s887_s7 = sshll.u32 %s1239_s18, 9 }
  0x32   : > { %p1370_p12 = por %p1574_p10, %p39_p1  ;;  %s829_s8 = sshll.u32 %s181_s6, 5 }
  0x33   : > { %s1576_s0 = sld [smem:[#allocation15_spill]]  ;;  %s185_s25 = scalar_lea.vmem [#allocation2], %s829_s8 }
  0x34   : > { %s193_s28 = sshll.u32 %s185_s25, 4  ;;  %p1381_p11 = pnand %p971_p6, %p41_p8  ;;  %s1385_s28 = int_to_ptr.vmem [resolvable:$true] %s193_s28 }
  0x35   : > { %s1387_s11 = scalar_lea.sflag [#allocation3], %s181_s6 }
  0x36   : > { %p1081_p0 = pneg %p1381_p11 }
  0x39   : > { %s1379_s10 = scalar_lea.hbm %s1576_s0, %s887_s7  ;;  %s1084_s24 = scalar_lea.hbm %s1576_s0, 1024 }
  0x3a   : > { %s1079_s12 = scalar_lea.hbm %s1379_s10, 512  ;;  %p1085_p7 = scmp.lt.u32.totalorder %s1379_s10, %s1576_s0 }
  0x3b   : > { %p1080_p13 = scmp.ne.s32.totalorder %s1379_s10, %s1079_s12  ;;  %p1086_p9 = scmp.lt.u32.totalorder %s1084_s24, %s1079_s12 }
  0x3c   : > { %p1088_p1 = scmp.lt.u32.totalorder %s1079_s12, %s1379_s10 }
  0x3d   : > { %p1082_p3 = pnand %p1081_p0, %p1080_p13  ;;  %p1087_p2 = por %p1086_p9, %p1085_p7 }
  0x3f   : > { %p1083_p5 = pneg %p1082_p3  ;;  %p1089_p4 = por %p1088_p1, %p1087_p2 }
  0x41   : > { %p1090_p6 = pnand %p1089_p4, %p1083_p5 }
  0x43   : > { %1093 = shalt.err (!%p1090_p6)
}
  0x44   : > { %s1094_s6 = scalar_lea.vmem %s1385_s28, 512  ;;  %s1244_s26 = smov [#allocation2]  }
  0x45   : > { %p1095_p8 = scmp.ne.s32.totalorder %s1385_s28, %s1094_s6  ;;  %s1099_s9 = sshll.u32 %s1244_s26, 4  ;;  %s1100_s9 = int_to_ptr.vmem [resolvable:$false] %s1099_s9 }
  0x46   : > { %s1101_s25 = scalar_lea.vmem %s1100_s9, 1024  ;;  %p1102_p3 = scmp.lt.s32.totalorder %s1385_s28, %s1100_s9 }
  0x47   : > { %p1097_p10 = pnand %p1095_p8, %p1081_p0  ;;  %p1103_p7 = scmp.lt.s32.totalorder %s1101_s25, %s1094_s6 }
  0x49   : > { %p1098_p13 = pneg %p1097_p10  ;;  %p1104_p9 = por %p1103_p7, %p1102_p3 }
  0x4b   : > { %p1105_p2 = pnand %p1104_p9, %p1098_p13 }
  0x4d   : > { %1108 = shalt.err (!%p1105_p2)
}
  0x4e   : > { %s1245_s12 = smov 256   ;;  %s1246_s13 = smov 16  }
  0x4f   : > { %959 = dma.hbm_to_vmem [thread:$0]  (!%p1381_p11), %s1379_s10, 512, %s1385_s28, %s1387_s11, %s1245_s12, %s1245_s12, %s1246_s13  }
  0x50   : > { %p1578_p0 = scmp.ne.s32.totalorder %s1572_s23, 0 }
  0x51   : > { %s1418_s14 = sand.u32 (!%p1578_p0), 1, %s1231_s16   ;;  %p1579_p5 = scmp.ne.s32.totalorder (!%p1578_p0), %s1570_s21, 0 }
  0x52   : > { %205 = sbr.rel (%p1578_p0) target bundleno = 410 (0x19a), region = 28  ;;  %s834_s24 = sshll.u32 (!%p1578_p0), %s1418_s14, 5 }
  0x53   : > { %s208_s7 = scalar_lea.sflag (!%p1578_p0), [#allocation3], %s1418_s14  ;;  %s1422_s8 = scalar_lea.vmem (!%p1578_p0), [#allocation2], %s834_s24 }
  0x59   : > { %1210 = dma.done.wait (%p1579_p5), %s208_s7, 512  }
  0x5a   : > { %1212 = vsyncadd (%p1579_p5), %s208_s7, 4294966784  ;;  %p1580_p11 = scmp.eq.s32.totalorder %s1298_s19, 0 }
  0x5c   : > { %1214 = dma.done.wait (%p1580_p11), [#allocation6], 4096   ;;  %p1581_p1 = pmov %p1580_p11 }
  0x5d   : > { %v1013_v0 = vld [vmem:[#allocation5 + $0x40] sm:$0xff]   ;;  %v1017_v4 = vld [vmem:[#allocation5 + $0x48] sm:$0xff]   ;;  %v1021_v8 = vld [vmem:[#allocation5 + $0x50] sm:$0xff]   ;;  %s1437_s21 = sshll.u32 %s1418_s14, 3  ;;  %s636_s23 = sand.u32 1, %s1298_s19  }
  0x5e   : > { %1216 = vsyncadd (%p1581_p1), [#allocation6], 4294963200  ;;  %v1014_v1 = vld [vmem:[#allocation5 + $0xc0] sm:$0xff]   ;;  %896 = vmatprep.subr.bf16.mxu0 %v1013_v0  ;;  %v1018_v5 = vld [vmem:[#allocation5 + $0xc8] sm:$0xff]   ;;  %s890_s10 = sshll.u32 %s1298_s19, 7  ;;  %s242_s28 = scalar_lea.vmem [#allocation8], %s1437_s21 }
  0x5f   : > { %v1015_v2 = vld [vmem:[#allocation5] sm:$0xff]   ;;  %918 = vmatprep.subr.bf16.mxu1 %v1014_v1  ;;  %v1019_v6 = vld [vmem:[#allocation5 + $0x8] sm:$0xff]   ;;  %v1022_v9 = vld [vmem:[#allocation5 + $0xd0] sm:$0xff]   ;;  %s671_s29 = sshll.u32 %s242_s28, 4  ;;  %s1445_s26 = scalar_lea.hbm %s1561_s2, %s890_s10  ;;  %s1453_s29 = int_to_ptr.vmem [resolvable:$true] %s671_s29 }
  0x60   : > { %v1016_v3 = vld [vmem:[#allocation5 + $0x80] sm:$0xff]   ;;  %897 = vmatpush3.bf16.msra.mxu0 %v1015_v2  ;;  %v1020_v7 = vld [vmem:[#allocation5 + $0x88] sm:$0xff]   ;;  %v1023_v10 = vld [vmem:[#allocation5 + $0x10] sm:$0xff]   ;;  %s1450_s12 = scalar_lea.hbm %s1562_s3, %s890_s10  ;;  %s235_s13 = scalar_lea.vmem [#allocation7], %s1437_s21 }
  0x61   : > { %919 = vmatpush3.bf16.msra.mxu1 %v1016_v3  ;;  %898 = vmatprep.subr.bf16.mxu0 %v1017_v4  ;;  %v1024_v11 = vld [vmem:[#allocation5 + $0x90] sm:$0xff]   ;;  %v1025_v12 = vld [vmem:[#allocation5 + $0x58] sm:$0xff]   ;;  %v1029_v16 = vld [vmem:[#allocation5 + $0x60] sm:$0xff]   ;;  %s655_s24 = sshll.u32 %s235_s13, 4  ;;  %s1568_s19 = scalar_lea.vmem [#allocation10], %s1437_s21  ;;  %s1458_s24 = int_to_ptr.vmem [resolvable:$true] %s655_s24 }
  0x62   : > { %920 = vmatprep.subr.bf16.mxu1 %v1018_v5  ;;  %v1026_v13 = vld [vmem:[#allocation5 + $0xd8] sm:$0xff]   ;;  %v1030_v17 = vld [vmem:[#allocation5 + $0xe0] sm:$0xff]   ;;  %v1033_v20 = vld [vmem:[#allocation5 + $0x68] sm:$0xff]   ;;  %s684_s7 = sshll.u32 %s1568_s19, 4  ;;  %s1463_s6 = scalar_lea.hbm %s1563_s4, %s890_s10  ;;  %s1465_s7 = int_to_ptr.vmem [resolvable:$true] %s684_s7 }
  0x63   : > { %v1027_v14 = vld [vmem:[#allocation5 + $0x18] sm:$0xff]   ;;  %v1031_v18 = vld [vmem:[#allocation5 + $0x20] sm:$0xff]   ;;  %v1034_v21 = vld [vmem:[#allocation5 + $0xe8] sm:$0xff]   ;;  %s1467_s9 = scalar_lea.sflag [#allocation9], %s636_s23  ;;  %s1109_s25 = scalar_lea.vmem %s1453_s29, 128 }
  0x64   : > { %899 = vmatpush3.bf16.msra.mxu0 %v1019_v6  ;;  %v1028_v15 = vld [vmem:[#allocation5 + $0x98] sm:$0xff]   ;;  %v1032_v19 = vld [vmem:[#allocation5 + $0xa0] sm:$0xff]   ;;  %v1035_v22 = vld [vmem:[#allocation5 + $0x28] sm:$0xff]   ;;  %p1110_p4 = scmp.ne.s32.totalorder %s1453_s29, %s1109_s25  ;;  %s1247_s20 = smov [#allocation8]  }
  0x65   : > { %921 = vmatpush3.bf16.msra.mxu1 %v1020_v7  ;;  %900 = vmatprep.subr.bf16.mxu0 %v1021_v8  ;;  %v1036_v23 = vld [vmem:[#allocation5 + $0xa8] sm:$0xff]   ;;  %v1037_v24 = vld [vmem:[#allocation5 + $0x70] sm:$0xff]   ;;  %v1041_v28 = vld [vmem:[#allocation5 + $0x78] sm:$0xff]   ;;  %s1113_s19 = sshll.u32 %s1247_s20, 4  ;;  %s1114_s19 = int_to_ptr.vmem [resolvable:$false] %s1113_s19 }
  0x66   : > { %922 = vmatprep.subr.bf16.mxu1 %v1022_v9  ;;  %v1038_v25 = vld [vmem:[#allocation5 + $0xf0] sm:$0xff]   ;;  %v1042_v29 = vld [vmem:[#allocation5 + $0xf8] sm:$0xff]   ;;  %p1111_p6 = pnand %p1110_p4, %p1370_p12  ;;  %s1115_s0 = scalar_lea.vmem %s1114_s19, 256 }
  0x67   : > { %v1039_v26 = vld [vmem:[#allocation5 + $0x30] sm:$0xff]   ;;  %v1043_v30 = vld [vmem:[#allocation5 + $0x38] sm:$0xff]   ;;  %p1116_p10 = scmp.lt.s32.totalorder %s1453_s29, %s1114_s19  ;;  %p1117_p13 = scmp.lt.s32.totalorder %s1115_s0, %s1109_s25 }
  0x68   : > { %901 = vmatpush3.bf16.msra.mxu0 %v1023_v10  ;;  %v1040_v27 = vld [vmem:[#allocation5 + $0xb0] sm:$0xff]   ;;  %v1044_v31 = vld [vmem:[#allocation5 + $0xb8] sm:$0xff]   ;;  %p1112_p8 = pneg %p1111_p6 }
  0x69   : > { %923 = vmatpush3.bf16.msra.mxu1 %v1024_v11  ;;  %902 = vmatprep.subr.bf16.mxu0 %v1025_v12  ;;  %v1045_v32 = vld [vmem:[%s1422_s8] ss:$16 sps:$4 sm:$0xff]   ;;  %v1047_v33 = vld [vmem:[%s1422_s8 + $0x4] ss:$16 sps:$4 sm:$0xff]   ;;  %v1048_v34 = vld [vmem:[%s1422_s8 + $0x8] ss:$16 sps:$4 sm:$0xff]   ;;  %p1118_p3 = por %p1117_p13, %p1116_p10 }
  0x6a   : > { %924 = vmatprep.subr.bf16.mxu1 %v1026_v13  ;;  %v1050_v35 = vld [vmem:[%s1422_s8 + $0xc] ss:$16 sps:$4 sm:$0xff]   ;;  %565 = vmatprep.mubr.bf16.mxu0 %v1047_v33 }
  0x6b   : > { %606 = vmatprep.mubr.bf16.mxu1 %v1050_v35  ;;  %p1119_p7 = pnand %p1118_p3, %p1112_p8 }
  0x6c   : > { %903 = vmatpush3.bf16.msra.mxu0 %v1027_v14 }
  0x6d   : > { %925 = vmatpush3.bf16.msra.mxu1 %v1028_v15  ;;  %904 = vmatprep.subr.bf16.mxu0 %v1029_v16 }
  0x6e   : > { %926 = vmatprep.subr.bf16.mxu1 %v1030_v17 }
  0x70   : > { %905 = vmatpush3.bf16.msra.mxu0 %v1031_v18 }
  0x71   : > { %927 = vmatpush3.bf16.msra.mxu1 %v1032_v19  ;;  %906 = vmatprep.subr.bf16.mxu0 %v1033_v20 }
  0x72   : > { %928 = vmatprep.subr.bf16.mxu1 %v1034_v21 }
  0x74   : > { %907 = vmatpush3.bf16.msra.mxu0 %v1035_v22 }
  0x75   : > { %929 = vmatpush3.bf16.msra.mxu1 %v1036_v23  ;;  %908 = vmatprep.subr.bf16.mxu0 %v1037_v24 }
  0x76   : > { %930 = vmatprep.subr.bf16.mxu1 %v1038_v25 }
  0x78   : > { %909 = vmatpush3.bf16.msra.mxu0 %v1039_v26 }
  0x79   : > { %931 = vmatpush3.bf16.msra.mxu1 %v1040_v27  ;;  %910 = vmatprep.subr.bf16.mxu0 %v1041_v28 }
  0x7a   : > { %932 = vmatprep.subr.bf16.mxu1 %v1042_v29 }
  0x7c   : > { %911 = vmatpush3.bf16.msra.mxu0 %v1043_v30 }
  0x7d   : > { %933 = vmatpush3.bf16.msra.mxu1 %v1044_v31 }
  0x7f   : > { %566 = vmatmul.mubr.bf16.vlgmr.msra.gmra.mrb[0].mxu0 %v1045_v32 }
  0x80   : > { %607 = vmatmul.mubr.bf16.vlgmr.msra.gmra.mrb[0].mxu1 %v1048_v34 }
 0x152   : > { %v912_v36 = vpop.f32.mrb[0].mxu0 }
 0x153   : > { %v934_v37 = vpop.f32.mrb[0].mxu1  ;;  %v913_v38 = vpop.f32.mrb[1].mxu0 }
 0x154   : > { %v914_v39 = vadd.f32 %v913_v38, %v912_v36  ;;  %v935_v40 = vpop.f32.mrb[1].mxu1  ;;  %v915_v41 = vpop.f32.mrb[2].mxu0 }
 0x155   : > { %v936_v42 = vadd.f32 %v935_v40, %v934_v37  ;;  %v937_v43 = vpop.f32.mrb[2].mxu1  ;;  %v916_v44 = vpop.f32.mrb[3].mxu0 }
 0x156   : > { %v917_v45 = vadd.f32 %v916_v44, %v915_v41  ;;  %v938_v46 = vpop.f32.mrb[3].mxu1 }
 0x157   : > { %v609_v47 = vadd.f32 %v936_v42, %v914_v39  ;;  %v939_v48 = vadd.f32 %v938_v46, %v937_v43 }
 0x159   : > { %v612_v49 = vadd.f32 %v939_v48, %v917_v45  ;;  %v627_v50 = vmul.f32 %v609_v47, %v609_v47 }
 0x15b   : > { %v894_v51 = vpack.c.bf16 %v612_v49, %v609_v47  ;;  %v625_v52 = vadd.f32 %v612_v49, %v609_v47  ;;  %v628_v53 = vmul.f32 %v612_v49, %v612_v49 }
 0x15d   : > { %v629_v54 = vadd.f32 %v628_v53, %v627_v50  ;;  %626 = vst [vmem:[%s242_s28] sm:$0xff] %v625_v52  ;;  %895 = vst [vmem:[%s235_s13] sm:$0xff] %v894_v51  }
 0x15e   : > { %1122 = shalt.err (!%p1119_p7)
}
 0x15f   : > { %s1123_s23 = scalar_lea.hbm %s1450_s12, 128  ;;  %s1127_s20 = scalar_lea.hbm %s1562_s3, 256 }
 0x160   : > { %p1124_p9 = scmp.ne.s32.totalorder %s1450_s12, %s1123_s23  ;;  %p1128_p5 = scmp.lt.u32.totalorder %s1450_s12, %s1562_s3 }
 0x161   : > { %p1129_p11 = scmp.lt.u32.totalorder %s1127_s20, %s1123_s23  ;;  %p1131_p4 = scmp.lt.u32.totalorder %s1123_s23, %s1450_s12 }
 0x162   : > { %p1125_p2 = pnand %p1124_p9, %p1370_p12 }
 0x163   : > { %p1130_p1 = por %p1129_p11, %p1128_p5 }
 0x164   : > { %p1126_p0 = pneg %p1125_p2 }
 0x165   : > { %p1132_p6 = por %p1131_p4, %p1130_p1 }
 0x167   : > { %p1133_p8 = pnand %p1132_p6, %p1126_p0 }
 0x169   : > { %1136 = shalt.err (!%p1133_p8)
}
 0x16a   : > { %947 = dma.vmem_to_hbm [thread:$0]  (%p1370_p12), %s1453_s29, 128, %s1450_s12, %s1467_s9  }
 0x16b   : > { %s632_s0 = scalar_lea.sflag [#allocation4], %s1418_s14  ;;  %s1137_s8 = scalar_lea.vmem %s1458_s24, 128 }
 0x16c   : > { %p1138_p10 = scmp.ne.s32.totalorder %s1458_s24, %s1137_s8  ;;  %s1248_s11 = smov [#allocation7]  }
 0x16d   : > { %s1141_s25 = sshll.u32 %s1248_s11, 4  ;;  %s1142_s25 = int_to_ptr.vmem [resolvable:$false] %s1141_s25 }
 0x16e   : > { %p1139_p13 = pnand %p1138_p10, %p1370_p12  ;;  %s1143_s23 = scalar_lea.vmem %s1142_s25, 256 }
 0x16f   : > { %p1144_p7 = scmp.lt.s32.totalorder %s1458_s24, %s1142_s25  ;;  %p1145_p9 = scmp.lt.s32.totalorder %s1143_s23, %s1137_s8 }
 0x170   : > { %p1140_p3 = pneg %p1139_p13 }
 0x171   : > { %p1146_p2 = por %p1145_p9, %p1144_p7 }
 0x173   : > { %p1147_p0 = pnand %p1146_p2, %p1140_p3 }
 0x175   : > { %1150 = shalt.err (!%p1147_p0)
}
 0x176   : > { %s1151_s29 = scalar_lea.hbm %s1445_s26, 128  ;;  %s1155_s28 = scalar_lea.hbm %s1561_s2, 256 }
 0x177   : > { %p1152_p5 = scmp.ne.s32.totalorder %s1445_s26, %s1151_s29  ;;  %p1156_p4 = scmp.lt.u32.totalorder %s1445_s26, %s1561_s2 }
 0x178   : > { %p1157_p6 = scmp.lt.u32.totalorder %s1155_s28, %s1151_s29  ;;  %p1159_p10 = scmp.lt.u32.totalorder %s1151_s29, %s1445_s26 }
 0x179   : > { %p1153_p11 = pnand %p1152_p5, %p1370_p12 }
 0x17a   : > { %p1158_p8 = por %p1157_p6, %p1156_p4 }
 0x17b   : > { %p1154_p1 = pneg %p1153_p11 }
 0x17c   : > { %p1160_p13 = por %p1159_p10, %p1158_p8 }
 0x17e   : > { %p1161_p3 = pnand %p1160_p13, %p1154_p1 }
 0x180   : > { %1164 = shalt.err (!%p1161_p3)
}
 0x181   : > { %s1249_s19 = smov 64   ;;  %s1250_s8 = smov 4  }
 0x182   : > { %946 = dma.vmem_to_hbm [thread:$0]  (%p1370_p12), %s1458_s24, 128, %s1445_s26, %s632_s0, %s1249_s19, %s1249_s19, %s1250_s8  }
 0x183   : > { %s1582_s11 = scalar_lea.vmem [#allocation10], %s1437_s21  ;;  %s1165_s25 = scalar_lea.vmem %s1465_s7, 128 }
 0x184   : > { %630 = vst [vmem:[%s1582_s11] sm:$0xff] %v629_v54  ;;  %p1166_p7 = scmp.ne.s32.totalorder %s1465_s7, %s1165_s25  ;;  %s1251_s23 = smov [#allocation10]  }
 0x185   : > { %s1169_s29 = sshll.u32 %s1251_s23, 4  ;;  %s1170_s29 = int_to_ptr.vmem [resolvable:$false] %s1169_s29 }
 0x186   : > { %p1167_p9 = pnand %p1166_p7, %p1370_p12  ;;  %s1171_s12 = scalar_lea.vmem %s1170_s29, 256 }
 0x187   : > { %p1172_p0 = scmp.lt.s32.totalorder %s1465_s7, %s1170_s29  ;;  %p1173_p5 = scmp.lt.s32.totalorder %s1171_s12, %s1165_s25 }
 0x188   : > { %p1168_p2 = pneg %p1167_p9 }
 0x189   : > { %p1174_p11 = por %p1173_p5, %p1172_p0 }
 0x18b   : > { %p1175_p1 = pnand %p1174_p11, %p1168_p2 }
 0x18d   : > { %1178 = shalt.err (!%p1175_p1)
}
 0x18e   : > { %s1179_s14 = scalar_lea.hbm %s1463_s6, 128  ;;  %s1183_s24 = scalar_lea.hbm %s1563_s4, 256 }
 0x18f   : > { %p1180_p4 = scmp.ne.s32.totalorder %s1463_s6, %s1179_s14  ;;  %p1184_p10 = scmp.lt.u32.totalorder %s1463_s6, %s1563_s4 }
 0x190   : > { %p1185_p13 = scmp.lt.u32.totalorder %s1183_s24, %s1179_s14  ;;  %p1187_p7 = scmp.lt.u32.totalorder %s1179_s14, %s1463_s6 }
 0x191   : > { %p1181_p6 = pnand %p1180_p4, %p1370_p12 }
 0x192   : > { %p1186_p3 = por %p1185_p13, %p1184_p10 }
 0x193   : > { %p1182_p8 = pneg %p1181_p6 }
 0x194   : > { %p1188_p9 = por %p1187_p7, %p1186_p3 }
 0x196   : > { %p1189_p2 = pnand %p1188_p9, %p1182_p8 }
 0x198   : > { %1192 = shalt.err (!%p1189_p2)
}
 0x199   : > { %948 = dma.vmem_to_hbm [thread:$0]  (%p1370_p12), %s1465_s7, 128, %s1463_s6, %s1467_s9  }
 0x19a PF: > { %s696_s28 = sand.u32 1, %s1227_s15   ;;  %p1583_p0 = scmp.ne.s32.totalorder %s1571_s22, 0 }
 0x19b   : > { %p1584_p5 = scmp.ge.s32.totalorder %s1239_s18, 2  ;;  %s697_s20 = scalar_lea.sflag [#allocation4], %s696_s28 }
 0x19d   : > { %p961_p11 = pnand %p1584_p5, %p1583_p0 }
 0x19f   : > { %1218 = dma.done.wait (!%p961_p11), %s697_s20, 128  }
 0x1a0   : > { %1220 = vsyncadd (!%p961_p11), %s697_s20, 4294967168  ;;  %s1585_s13 = sadd.s32 4294967294, %s1239_s18  }
 0x1a1   : > { %s705_s19 = sand.u32 1, %s1585_s13  }
 0x1a2   : > { %s706_s8 = scalar_lea.sflag [#allocation9], %s705_s19 }
 0x1a3   : > { %1222 = dma.done.wait (!%p961_p11), %s706_s8, 256  }
 0x1a4   : > { %1224 = vsyncadd (!%p961_p11), %s706_s8, 4294967040  ;;  %p22_p12 = scmp.ge.s32.totalorder %s1335_s27, 4   ;;  %s1586_s15 = smov %s1231_s16 }
 0x1a5   : > { %s1587_s16 = smov %s1235_s17  ;;  %s1588_s17 = smov %s1366_s30 }
 0x1a6   : > { %s1589_s18 = smov %s1335_s27  ;;  %24 = sbr.rel (!%p22_p12) target bundleno = 10 (0xa), region = 109 }
 0x1ad   :  { %720 = vsyncpa [#allocation3], 1 }
 0x1ae   :  { %722 = vsyncpa [#allocation3 + $0x1], 1 }
 0x1af   :  { %723 = vsyncpa [#allocation6], 1 }
 0x1b0   :  { %724 = vsyncpa [#allocation4], 1 }
 0x1b1   :  { %726 = vsyncpa [#allocation4 + $0x1], 1 }
 0x1b2   :  { %727 = vsyncpa [#allocation9], 1 }
 0x1b3   :  { %729 = vsyncpa [#allocation9 + $0x1], 1 }

// kernel: discriminator_forward.9
= control target key start
LH: loop header
LB: loop body
LE: loop exit
PB: predicated region body
PF: predicated region fallthrough
CT: control target
= control target key end

     0   :  { %7 = vsyncpa [#allocation3], 0  ;;  %s1143_s0 = inlined_call_operand.hbm [shape: bf16[8,1024], index: 0, kind: input, shape index: {}]   ;;  %s1144_s1 = inlined_call_operand.hbm [shape: bf16[1024,128], index: 1, kind: input, shape index: {}]   ;;  %s1145_s2 = inlined_call_operand.hbm [shape: f32[8,128], index: 2, kind: output, shape index: {}]  }
   0x1   :  { %8 = vsyncpa [#allocation6], 0 }
   0x2   :  { %9 = vsyncpa [#allocation4], 0  ;;  %s1080_s9 = smov [#allocation2]   ;;  %s1081_s11 = smov [#allocation5]  }
   0x3   :  { %s16_s10 = sshll.u32 %s1080_s9, 4  ;;  %s25_s12 = sshll.u32 %s1081_s11, 4  ;;  %s17_s10 = int_to_ptr.vmem [resolvable:$true] %s16_s10  ;;  %s1100_s12 = int_to_ptr.vmem [resolvable:$true] %s25_s12 }
   0x4   :  { %s1008_s15 = scalar_lea.hbm %s1143_s0, 512 }
   0x5   :  { %p1009_p0 = scmp.ne.s32.totalorder %s1143_s0, %s1008_s15  ;;  %p1012_p1 = scmp.lt.u32.totalorder %s1008_s15, %s1143_s0 }
   0x7   :  { %p1014_p2 = pnand %p1012_p1, %p1009_p0 }
   0x9   :  { %1017 = shalt.err (!%p1014_p2)
}
   0xa   :  { %s1018_s20 = scalar_lea.vmem %s17_s10, 512  ;;  %p1023_p4 = scmp.lt.s32.totalorder %s17_s10, %s17_s10 }
   0xb   :  { %p1019_p3 = scmp.ne.s32.totalorder %s17_s10, %s1018_s20  ;;  %p1024_p5 = scmp.lt.s32.totalorder %s1018_s20, %s1018_s20 }
   0xd   :  { %p1025_p6 = por %p1024_p5, %p1023_p4 }
   0xf   :  { %p1026_p7 = pnand %p1025_p6, %p1019_p3 }
  0x11   :  { %1029 = shalt.err (!%p1026_p7)
}
  0x12   :  { %19 = dma.hbm_to_vmem [thread:$0]  %s1143_s0, 512, %s17_s10, [#allocation3]  }
  0x13   :  { %s1030_s25 = scalar_lea.hbm %s1144_s1, 8192 }
  0x14   :  { %p1031_p8 = scmp.ne.s32.totalorder %s1144_s1, %s1030_s25  ;;  %p1034_p9 = scmp.lt.u32.totalorder %s1030_s25, %s1144_s1 }
  0x16   :  { %p1036_p10 = pnand %p1034_p9, %p1031_p8 }
  0x18   :  { %1039 = shalt.err (!%p1036_p10)
}
  0x19   :  { %s1040_s30 = scalar_lea.vmem %s1100_s12, 8192  ;;  %p1045_p12 = scmp.lt.s32.totalorder %s1100_s12, %s1100_s12 }
  0x1a   :  { %p1041_p11 = scmp.ne.s32.totalorder %s1100_s12, %s1040_s30  ;;  %p1046_p13 = scmp.lt.s32.totalorder %s1040_s30, %s1040_s30 }
  0x1c   :  { %p1047_p0 = por %p1046_p13, %p1045_p12 }
  0x1e   :  { %p1048_p1 = pnand %p1047_p0, %p1041_p11 }
  0x20   :  { %1051 = shalt.err (!%p1048_p1)
}
  0x21   :  { %s1082_s0 = smov 64   ;;  %s1083_s3 = smov 4  }
  0x22   :  { %31 = dma.hbm_to_vmem [thread:$0]  %s1144_s1, 8192, %s1100_s12, [#allocation6], %s1082_s0, %s1082_s0, %s1083_s3  }
  0x23   :  { %1074 = dma.done.wait [#allocation3], 512  }
  0x24   :  { %1075 = vsyncadd [#allocation3], 4294966784 }
  0x25   :  { %1076 = dma.done.wait [#allocation6], 8192  }
  0x26   :  { %1077 = vsyncadd [#allocation6], 4294959104  ;;  %v932_v0 = vld [vmem:[#allocation5 + $0x40] sm:$0xff]   ;;  %v936_v4 = vld [vmem:[#allocation5 + $0x48] sm:$0xff]   ;;  %s1084_s1 = smov [#allocation7]  }
  0x27   :  { %v933_v1 = vld [vmem:[#allocation5 + $0xc0] sm:$0xff]   ;;  %839 = vmatprep.subr.bf16.mxu0 %v932_v0  ;;  %v937_v5 = vld [vmem:[#allocation5 + $0xc8] sm:$0xff]   ;;  %v940_v8 = vld [vmem:[#allocation5 + $0x50] sm:$0xff]   ;;  %s756_s6 = sshll.u32 %s1084_s1, 4  ;;  %s757_s6 = int_to_ptr.vmem [resolvable:$true] %s756_s6 }
  0x28   :  { %v934_v2 = vld [vmem:[#allocation5] sm:$0xff]   ;;  %861 = vmatprep.subr.bf16.mxu1 %v933_v1  ;;  %v938_v6 = vld [vmem:[#allocation5 + $0x8] sm:$0xff]   ;;  %v941_v9 = vld [vmem:[#allocation5 + $0xd0] sm:$0xff]   ;;  %s1052_s7 = scalar_lea.vmem %s757_s6, 128  ;;  %p1057_p3 = scmp.lt.s32.totalorder %s757_s6, %s757_s6 }
  0x29   :  { %v935_v3 = vld [vmem:[#allocation5 + $0x80] sm:$0xff]   ;;  %840 = vmatpush3.bf16.msra.mxu0 %v934_v2  ;;  %v939_v7 = vld [vmem:[#allocation5 + $0x88] sm:$0xff]   ;;  %v942_v10 = vld [vmem:[#allocation5 + $0x10] sm:$0xff]   ;;  %p1053_p2 = scmp.ne.s32.totalorder %s757_s6, %s1052_s7  ;;  %p1058_p4 = scmp.lt.s32.totalorder %s1052_s7, %s1052_s7 }
  0x2a   :  { %862 = vmatpush3.bf16.msra.mxu1 %v935_v3  ;;  %841 = vmatprep.subr.bf16.mxu0 %v936_v4  ;;  %v943_v11 = vld [vmem:[#allocation5 + $0x90] sm:$0xff]   ;;  %v944_v12 = vld [vmem:[#allocation5 + $0x58] sm:$0xff]   ;;  %v948_v16 = vld [vmem:[#allocation5 + $0x60] sm:$0xff]  }
  0x2b   :  { %863 = vmatprep.subr.bf16.mxu1 %v937_v5  ;;  %v945_v13 = vld [vmem:[#allocation5 + $0xd8] sm:$0xff]   ;;  %v949_v17 = vld [vmem:[#allocation5 + $0xe0] sm:$0xff]   ;;  %v952_v20 = vld [vmem:[#allocation5 + $0x68] sm:$0xff]   ;;  %p1059_p5 = por %p1058_p4, %p1057_p3 }
  0x2c   :  { %v946_v14 = vld [vmem:[#allocation5 + $0x18] sm:$0xff]   ;;  %v950_v18 = vld [vmem:[#allocation5 + $0x20] sm:$0xff]   ;;  %v953_v21 = vld [vmem:[#allocation5 + $0xe8] sm:$0xff]  }
  0x2d   :  { %842 = vmatpush3.bf16.msra.mxu0 %v938_v6  ;;  %v947_v15 = vld [vmem:[#allocation5 + $0x98] sm:$0xff]   ;;  %v951_v19 = vld [vmem:[#allocation5 + $0xa0] sm:$0xff]   ;;  %v954_v22 = vld [vmem:[#allocation5 + $0x28] sm:$0xff]   ;;  %p1060_p6 = pnand %p1059_p5, %p1053_p2 }
  0x2e   :  { %864 = vmatpush3.bf16.msra.mxu1 %v939_v7  ;;  %843 = vmatprep.subr.bf16.mxu0 %v940_v8  ;;  %v955_v23 = vld [vmem:[#allocation5 + $0xa8] sm:$0xff]   ;;  %v956_v24 = vld [vmem:[#allocation5 + $0x70] sm:$0xff]   ;;  %v960_v28 = vld [vmem:[#allocation5 + $0x78] sm:$0xff]  }
  0x2f   :  { %865 = vmatprep.subr.bf16.mxu1 %v941_v9  ;;  %v957_v25 = vld [vmem:[#allocation5 + $0xf0] sm:$0xff]   ;;  %v961_v29 = vld [vmem:[#allocation5 + $0xf8] sm:$0xff]   ;;  %v39_v32 = vld [vmem:[#allocation2] sm:$0xff] }
  0x30   :  { %v958_v26 = vld [vmem:[#allocation5 + $0x30] sm:$0xff]   ;;  %v962_v30 = vld [vmem:[#allocation5 + $0x38] sm:$0xff]   ;;  %v40_v33 = vld [vmem:[#allocation2 + $0x8] sm:$0xff]  ;;  %v766_v34 = vcombine.low %v39_v32, %v39_v32  ;;  %v767_v35 = vcombine.high %v39_v32, %v39_v32 }
  0x31   :  { %844 = vmatpush3.bf16.msra.mxu0 %v942_v10  ;;  %v959_v27 = vld [vmem:[#allocation5 + $0xb0] sm:$0xff]   ;;  %v963_v31 = vld [vmem:[#allocation5 + $0xb8] sm:$0xff]   ;;  %v768_v36 = vcombine.low %v40_v33, %v40_v33  ;;  %v769_v37 = vcombine.high %v40_v33, %v40_v33  ;;  %v968_v38 = vld [vmem:[#allocation5 + $0x140] sm:$0xff]  }
  0x32   :  { %866 = vmatpush3.bf16.msra.mxu1 %v943_v11  ;;  %845 = vmatprep.subr.bf16.mxu0 %v944_v12  ;;  %v969_v39 = vld [vmem:[#allocation5 + $0x1c0] sm:$0xff]   ;;  %v972_v42 = vld [vmem:[#allocation5 + $0x148] sm:$0xff]   ;;  %v976_v46 = vld [vmem:[#allocation5 + $0x150] sm:$0xff]  }
  0x33   :  { %867 = vmatprep.subr.bf16.mxu1 %v945_v13  ;;  %615 = vmatprep.mubr.bf16.mxu0 %v767_v35  ;;  %v970_v40 = vld [vmem:[#allocation5 + $0x100] sm:$0xff]   ;;  %v973_v43 = vld [vmem:[#allocation5 + $0x1c8] sm:$0xff]   ;;  %v977_v47 = vld [vmem:[#allocation5 + $0x1d0] sm:$0xff]  }
  0x34   :  { %655 = vmatprep.mubr.bf16.mxu1 %v769_v37  ;;  %v971_v41 = vld [vmem:[#allocation5 + $0x180] sm:$0xff]   ;;  %v974_v44 = vld [vmem:[#allocation5 + $0x108] sm:$0xff]   ;;  %v978_v48 = vld [vmem:[#allocation5 + $0x110] sm:$0xff]  }
  0x35   :  { %846 = vmatpush3.bf16.msra.mxu0 %v946_v14  ;;  %v975_v45 = vld [vmem:[#allocation5 + $0x188] sm:$0xff]   ;;  %v979_v49 = vld [vmem:[#allocation5 + $0x190] sm:$0xff]   ;;  %v980_v50 = vld [vmem:[#allocation5 + $0x158] sm:$0xff]  }
  0x36   :  { %868 = vmatpush3.bf16.msra.mxu1 %v947_v15  ;;  %847 = vmatprep.subr.bf16.mxu0 %v948_v16  ;;  %v981_v51 = vld [vmem:[#allocation5 + $0x1d8] sm:$0xff]   ;;  %v984_v54 = vld [vmem:[#allocation5 + $0x160] sm:$0xff]   ;;  %v988_v58 = vld [vmem:[#allocation5 + $0x168] sm:$0xff]  }
  0x37   :  { %869 = vmatprep.subr.bf16.mxu1 %v949_v17  ;;  %v982_v52 = vld [vmem:[#allocation5 + $0x118] sm:$0xff]   ;;  %v985_v55 = vld [vmem:[#allocation5 + $0x1e0] sm:$0xff]   ;;  %v989_v59 = vld [vmem:[#allocation5 + $0x1e8] sm:$0xff]  }
  0x38   :  { %v983_v53 = vld [vmem:[#allocation5 + $0x198] sm:$0xff]   ;;  %v986_v56 = vld [vmem:[#allocation5 + $0x120] sm:$0xff]   ;;  %v990_v60 = vld [vmem:[#allocation5 + $0x128] sm:$0xff]  }
  0x39   :  { %848 = vmatpush3.bf16.msra.mxu0 %v950_v18  ;;  %v987_v57 = vld [vmem:[#allocation5 + $0x1a0] sm:$0xff]   ;;  %v991_v61 = vld [vmem:[#allocation5 + $0x1a8] sm:$0xff]   ;;  %v992_v62 = vld [vmem:[#allocation5 + $0x170] sm:$0xff]  }
  0x3a   :  { %870 = vmatpush3.bf16.msra.mxu1 %v951_v19  ;;  %849 = vmatprep.subr.bf16.mxu0 %v952_v20  ;;  %v993_v63 = vld [vmem:[#allocation5 + $0x1f0] sm:$0xff]   ;;  %v996_v2 = vld [vmem:[#allocation5 + $0x178] sm:$0xff]  }
  0x3b   :  { %871 = vmatprep.subr.bf16.mxu1 %v953_v21  ;;  %v994_v0 = vld [vmem:[#allocation5 + $0x130] sm:$0xff]   ;;  %v997_v3 = vld [vmem:[#allocation5 + $0x1f8] sm:$0xff]  }
  0x3c   :  { %v995_v1 = vld [vmem:[#allocation5 + $0x1b0] sm:$0xff]   ;;  %v998_v4 = vld [vmem:[#allocation5 + $0x138] sm:$0xff]  }
  0x3d   :  { %850 = vmatpush3.bf16.msra.mxu0 %v954_v22  ;;  %v999_v5 = vld [vmem:[#allocation5 + $0x1b8] sm:$0xff]   ;;  %v41_v6 = vld [vmem:[#allocation2 + $0x10] sm:$0xff] }
  0x3e   :  { %872 = vmatpush3.bf16.msra.mxu1 %v955_v23  ;;  %851 = vmatprep.subr.bf16.mxu0 %v956_v24  ;;  %v770_v7 = vcombine.low %v41_v6, %v41_v6  ;;  %v771_v8 = vcombine.high %v41_v6, %v41_v6  ;;  %v42_v9 = vld [vmem:[#allocation2 + $0x18] sm:$0xff] }
  0x3f   :  { %873 = vmatprep.subr.bf16.mxu1 %v957_v25  ;;  %v772_v10 = vcombine.low %v42_v9, %v42_v9  ;;  %v773_v11 = vcombine.high %v42_v9, %v42_v9 }
  0x41   :  { %852 = vmatpush3.bf16.msra.mxu0 %v958_v26 }
  0x42   :  { %874 = vmatpush3.bf16.msra.mxu1 %v959_v27  ;;  %853 = vmatprep.subr.bf16.mxu0 %v960_v28 }
  0x43   :  { %875 = vmatprep.subr.bf16.mxu1 %v961_v29 }
  0x45   :  { %854 = vmatpush3.bf16.msra.mxu0 %v962_v30 }
  0x46   :  { %876 = vmatpush3.bf16.msra.mxu1 %v963_v31  ;;  %883 = vmatprep.subr.bf16.mxu0 %v968_v38 }
  0x47   :  { %905 = vmatprep.subr.bf16.mxu1 %v969_v39 }
  0x48   :  { %616 = vmatmul.mubr.bf16.vlgmr.msra.gmra.mrb[0].mxu0 %v766_v34 }
  0x49   :  { %656 = vmatmul.mubr.bf16.vlgmr.msra.gmra.mrb[0].mxu1 %v768_v36  ;;  %884 = vmatpush3.bf16.msra.mxu0 %v970_v40 }
  0x4a   :  { %906 = vmatpush3.bf16.msra.mxu1 %v971_v41  ;;  %885 = vmatprep.subr.bf16.mxu0 %v972_v42 }
  0x4b   :  { %907 = vmatprep.subr.bf16.mxu1 %v973_v43  ;;  %695 = vmatprep.mubr.bf16.mxu0 %v771_v8 }
  0x4c   :  { %735 = vmatprep.mubr.bf16.mxu1 %v773_v11 }
  0x4d   :  { %886 = vmatpush3.bf16.msra.mxu0 %v974_v44 }
  0x4e   :  { %908 = vmatpush3.bf16.msra.mxu1 %v975_v45  ;;  %887 = vmatprep.subr.bf16.mxu0 %v976_v46 }
  0x4f   :  { %909 = vmatprep.subr.bf16.mxu1 %v977_v47 }
  0x51   :  { %888 = vmatpush3.bf16.msra.mxu0 %v978_v48 }
  0x52   :  { %910 = vmatpush3.bf16.msra.mxu1 %v979_v49  ;;  %889 = vmatprep.subr.bf16.mxu0 %v980_v50 }
  0x53   :  { %911 = vmatprep.subr.bf16.mxu1 %v981_v51 }
  0x55   :  { %890 = vmatpush3.bf16.msra.mxu0 %v982_v52 }
  0x56   :  { %912 = vmatpush3.bf16.msra.mxu1 %v983_v53  ;;  %891 = vmatprep.subr.bf16.mxu0 %v984_v54 }
  0x57   :  { %913 = vmatprep.subr.bf16.mxu1 %v985_v55 }
  0x59   :  { %892 = vmatpush3.bf16.msra.mxu0 %v986_v56 }
  0x5a   :  { %914 = vmatpush3.bf16.msra.mxu1 %v987_v57  ;;  %893 = vmatprep.subr.bf16.mxu0 %v988_v58 }
  0x5b   :  { %915 = vmatprep.subr.bf16.mxu1 %v989_v59 }
  0x5d   :  { %894 = vmatpush3.bf16.msra.mxu0 %v990_v60 }
  0x5e   :  { %916 = vmatpush3.bf16.msra.mxu1 %v991_v61  ;;  %895 = vmatprep.subr.bf16.mxu0 %v992_v62 }
  0x5f   :  { %917 = vmatprep.subr.bf16.mxu1 %v993_v63 }
  0x61   :  { %896 = vmatpush3.bf16.msra.mxu0 %v994_v0 }
  0x62   :  { %918 = vmatpush3.bf16.msra.mxu1 %v995_v1  ;;  %897 = vmatprep.subr.bf16.mxu0 %v996_v2 }
  0x63   :  { %919 = vmatprep.subr.bf16.mxu1 %v997_v3 }
  0x65   :  { %898 = vmatpush3.bf16.msra.mxu0 %v998_v4 }
  0x66   :  { %920 = vmatpush3.bf16.msra.mxu1 %v999_v5 }
  0x68   :  { %696 = vmatmul.mubr.bf16.vlgmr.msra.gmra.mrb[4].mxu0 %v770_v7 }
  0x69   :  { %736 = vmatmul.mubr.bf16.vlgmr.msra.gmra.mrb[4].mxu1 %v772_v10 }
 0x11b   :  { %v855_v12 = vpop.f32.mrb[0].mxu0 }
 0x11c   :  { %v877_v13 = vpop.f32.mrb[0].mxu1  ;;  %v856_v14 = vpop.f32.mrb[1].mxu0 }
 0x11d   :  { %v878_v15 = vpop.f32.mrb[1].mxu1  ;;  %v857_v16 = vadd.f32 %v856_v14, %v855_v12  ;;  %v858_v18 = vpop.f32.mrb[2].mxu0 }
 0x11e   :  { %v879_v17 = vadd.f32 %v878_v15, %v877_v13  ;;  %v880_v19 = vpop.f32.mrb[2].mxu1  ;;  %v859_v20 = vpop.f32.mrb[3].mxu0 }
 0x11f   :  { %v881_v21 = vpop.f32.mrb[3].mxu1 }
 0x120   :  { %v658_v22 = vadd.f32 %v879_v17, %v857_v16 }
 0x13b   :  { %v899_v23 = vpop.f32.mrb[4].mxu0 }
 0x13c   :  { %v921_v24 = vpop.f32.mrb[4].mxu1  ;;  %v900_v25 = vpop.f32.mrb[5].mxu0 }
 0x13d   :  { %v922_v26 = vpop.f32.mrb[5].mxu1  ;;  %v901_v27 = vadd.f32 %v900_v25, %v899_v23  ;;  %v902_v29 = vpop.f32.mrb[6].mxu0 }
 0x13e   :  { %v923_v28 = vadd.f32 %v922_v26, %v921_v24  ;;  %v924_v30 = vpop.f32.mrb[6].mxu1  ;;  %v903_v31 = vpop.f32.mrb[7].mxu0 }
 0x13f   :  { %v925_v32 = vpop.f32.mrb[7].mxu1  ;;  %v698_v33 = vadd.f32 %v901_v27, %v658_v22 }
 0x141   :  { %v738_v34 = vadd.f32 %v923_v28, %v698_v33 }
 0x143   :  { %v838_v35 = vmul.f32 -1.442695, %v738_v34 }
 0x145   :  { %1004 = vpow2.f32 %v838_v35 }
 0x14f   :  { %v1005_v36 = vpop.eup %1004 }
 0x150   :  { %v746_v37 = vadd.f32 1.0, %v1005_v36 }
 0x152   :  { %1006 = vrcp.f32 %v746_v37 }
 0x15c   :  { %v1007_v38 = vpop.eup %1006 }
 0x15d   :  { %749 = vst [vmem:[#allocation7] sm:$0xff] %v1007_v38 }
 0x15e   :  { %1063 = shalt.err (!%p1060_p6)
}
 0x15f   :  { %s1064_s10 = scalar_lea.hbm %s1145_s2, 128 }
 0x160   :  { %p1065_p7 = scmp.ne.s32.totalorder %s1145_s2, %s1064_s10  ;;  %p1068_p8 = scmp.lt.u32.totalorder %s1064_s10, %s1145_s2 }
 0x162   :  { %p1070_p9 = pnand %p1068_p8, %p1065_p7 }
 0x164   :  { %1073 = shalt.err (!%p1070_p9)
}
 0x165   :  { %759 = dma.vmem_to_hbm [thread:$0]  %s757_s6, 128, %s1145_s2, [#allocation4]  }
 0x166   :  { %1078 = dma.done.wait [#allocation4], 128  }
 0x167   :  { %1079 = vsyncadd [#allocation4], 4294967168 }
 0x168   :  { %763 = vsyncpa [#allocation3], 1 }
 0x169   :  { %764 = vsyncpa [#allocation6], 1 }
 0x16a   :  { %765 = vsyncpa [#allocation4], 1 }

</bundles_post_ra>
